<compile_context>
chip_gen: v7x
topology: tpu7x:2x2x1
jax: 0.10.0
libtpu: 0.0.40
codegen_flags: <defaults>
</compile_context>

<pallas_src>
import jax
import jax.numpy as jnp
from jax import lax
from jax.experimental import pallas as pl
from jax.experimental.pallas import tpu as pltpu


# ---------------------------------------------------------------------------
# Fused layer kernel (one B_TILE batch slab per grid step, all blocks unrolled)
# ---------------------------------------------------------------------------

def _make_layer_kernel(H, W, C, blocks, b_tile, matmul_dtype):
    WC = W * C                       # packed lane width of one activation row

    def kernel(x_ref, w1_ref, b1_ref, w2_ref, b2_ref, o_ref, pad_ref):
        # x_ref : (b_tile, H, WC)            activations (lane-dense, f32 in HBM)
        # w*_ref: (blocks, 3, WC, WC)        per-dy banded conv weights (matmul_dtype)
        # b*_ref: (blocks, 1, WC)            biases tiled along W (f32)
        # o_ref : (b_tile, H, WC)            output
        # pad_ref: VMEM (b_tile, H+2, WC)    shared row-padded scratch (matmul_dtype)

        # Zero ONLY the two halo rows; the interior is always overwritten before
        # it is read.  Must run every grid step (megacore-safe).
        zero_row = jnp.zeros((b_tile, 1, WC), matmul_dtype)
        pad_ref[:, 0:1, :] = zero_row
        pad_ref[:, H + 1:H + 2, :] = zero_row

        act = x_ref[...].astype(jnp.float32)               # (b_tile, H, WC) f32

        def conv3x3_htanh(w_ref, blk, b_row):
            # 3 banded matmuls: dy via aligned row shifts of the padded scratch,
            # dx folded into the (WC, WC) band; f32 accumulation on the MXU.
            acc = jnp.zeros((b_tile * H, WC), jnp.float32)
            for dy in range(3):
                lhs = pad_ref[:, dy:dy + H, :].reshape(b_tile * H, WC)
                acc = acc + jnp.dot(lhs, w_ref[blk, dy],
                                    preferred_element_type=jnp.float32)
            out = jnp.clip(acc + b_row, -1.0, 1.0)          # bias + Hardtanh (f32)
            return out.reshape(b_tile, H, WC)

        for blk in range(blocks):                           # unrolled at trace time
            residual = act                                  # IdentitySNNLayer (f32)
            # conv1 + Hardtanh  (cast once into the bf16 scratch interior)
            pad_ref[:, 1:H + 1, :] = act.astype(matmul_dtype)
            h = conv3x3_htanh(w1_ref, blk, b1_ref[blk])
            # conv2 + Hardtanh  (scratch contents of conv1 are dead -> reuse)
            pad_ref[:, 1:H + 1, :] = h.astype(matmul_dtype)
            y = conv3x3_htanh(w2_ref, blk, b2_ref[blk])
            # AddSNNLayer_Htanh: residual add + Hardtanh (f32 epilogue)
            act = jnp.clip(y + residual, -1.0, 1.0)

        o_ref[...] = act.astype(o_ref.dtype)

    return kernel


# ---------------------------------------------------------------------------
# Parameter construction: fused conv+BN, per-dy banded packed-layout weights
# ---------------------------------------------------------------------------

def _fused_conv_params(key, cin, cout):
    """PyTorch-style conv init fused with an eval-mode BN that has default
    statistics (gamma=1, beta=0, mean=0, var=1)."""
    k_w, k_b = jax.random.split(key)
    fan_in = cin * 9
    bound = 1.0 / jnp.sqrt(float(fan_in))
    w = jax.random.uniform(k_w, (cout, cin, 3, 3), jnp.float32, -bound, bound)
    b = jax.random.uniform(k_b, (cout,), jnp.float32, -bound, bound)
    bn_scale = 1.0 / jnp.sqrt(1.0 + 1e-5)                 # gamma / sqrt(var + eps)
    w = (w * bn_scale).transpose(2, 3, 1, 0)              # OIHW -> HWIO
    b = b * bn_scale
    return w, b                                           # (3,3,cin,cout), (cout,)


def _banded_weights(w_hwio, W):
    """HWIO (3,3,Cin,Cout) -> (3, W*Cin, W*Cout).  For each dy, a banded matrix
    that maps a full packed input row (x-major, channel-minor) to a packed
    output row; the dx taps and the zero-pad truncation at the W boundary are
    folded into the band, so the 3x3 conv becomes 3 row-shifted matmuls."""
    kh, kw, cin, cout = w_hwio.shape
    bands = []
    for dy in range(kh):
        band = jnp.zeros((W * cin, W * cout), jnp.float32)
        for dx in range(kw):
            # sel[p, w] = 1  iff  p == w + dx - 1  and  0 <= p < W
            sel = jnp.eye(W, W, k=1 - dx, dtype=jnp.float32)
            band = band + jnp.einsum('pw,io->piwo', sel,
                                     w_hwio[dy, dx]).reshape(W * cin, W * cout)
        bands.append(band)
    return jnp.stack(bands)                                # (3, W*Cin, W*Cout)


def _pick_batch_tile(B, H, target_rows=128):
    """Largest divisor of B such that b_tile*H is close to (<=) target_rows."""
    bt = max(1, min(B, max(1, target_rows // H)))
    while B % bt:
        bt -= 1
    return bt


# ---------------------------------------------------------------------------
# LayerSNN_all equivalent
# ---------------------------------------------------------------------------

class LayerSNNAllPallas:
    def __init__(self, key, inplanes, planes, blocks, H, W,
                 matmul_dtype=jnp.bfloat16):
        # no-downsample configuration (stride=1, inplanes == planes), matching
        # how LayerSNN_all builds ResidualSNNBlock_all for interior layers.
        assert inplanes == planes, "downsample path not exercised in this config"
        self.blocks = blocks
        self.H, self.W, self.C = H, W, planes
        self.matmul_dtype = matmul_dtype

        raw, w1l, b1l, w2l, b2l = [], [], [], [], []
        for i in range(blocks):
            key, k1, k2 = jax.random.split(key, 3)
            cin = inplanes if i == 0 else planes
            w1, b1 = _fused_conv_params(k1, cin, planes)     # conv1 (+BN fused)
            w2, b2 = _fused_conv_params(k2, planes, planes)  # conv2 (+BN fused)
            raw.append((w1, b1, w2, b2))
            w1l.append(_banded_weights(w1, W))
            w2l.append(_banded_weights(w2, W))
            b1l.append(jnp.tile(b1, W).reshape(1, W * planes))
            b2l.append(jnp.tile(b2, W).reshape(1, W * planes))

        self.raw_params = raw                                 # for reference fwd
        self.w1_bd = jnp.stack(w1l).astype(matmul_dtype)      # (blocks, 3, WC, WC)
        self.w2_bd = jnp.stack(w2l).astype(matmul_dtype)
        self.b1_t = jnp.stack(b1l)                            # (blocks, 1, WC) f32
        self.b2_t = jnp.stack(b2l)
        self._fwd = jax.jit(self._forward)

    def _forward(self, x_nhwc):
        B, H, W, C = x_nhwc.shape
        WC = W * C
        blocks = self.blocks
        b_tile = _pick_batch_tile(B, H)                       # fold batch into M
        x_packed = x_nhwc.reshape(B, H, WC)                   # free reshape
        kernel = _make_layer_kernel(H, W, C, blocks, b_tile, self.matmul_dtype)

        out_packed = pl.pallas_call(
            kernel,
            out_shape=jax.ShapeDtypeStruct((B, H, WC), x_nhwc.dtype),
            grid=(B // b_tile,),
            in_specs=[
                pl.BlockSpec((b_tile, H, WC), lambda b: (b, 0, 0)),
                pl.BlockSpec((blocks, 3, WC, WC), lambda b: (0, 0, 0, 0)),
                pl.BlockSpec((blocks, 1, WC), lambda b: (0, 0, 0)),
                pl.BlockSpec((blocks, 3, WC, WC), lambda b: (0, 0, 0, 0)),
                pl.BlockSpec((blocks, 1, WC), lambda b: (0, 0, 0)),
            ],
            out_specs=pl.BlockSpec((b_tile, H, WC), lambda b: (b, 0, 0)),
            scratch_shapes=[
                pltpu.VMEM((b_tile, H + 2, WC), self.matmul_dtype),  # shared pad
            ],
            compiler_params=pltpu.CompilerParams(
                dimension_semantics=("parallel",)),
        )(x_packed, self.w1_bd, self.b1_t, self.w2_bd, self.b2_t)

        return out_packed.reshape(B, H, W, C)

    def __call__(self, x_nhwc):
        return self._fwd(x_nhwc)


# ---------------------------------------------------------------------------
# Pure-JAX reference (same math, full f32) for a correctness self-check
# ---------------------------------------------------------------------------

def _reference_forward(x_nhwc, raw_params):
    dn = ('NHWC', 'HWIO', 'NHWC')
    x = x_nhwc
    for (w1, b1, w2, b2) in raw_params:
        res = x
        h = jnp.clip(lax.conv_general_dilated(x, w1, (1, 1), 'SAME',
                                              dimension_numbers=dn) + b1, -1.0, 1.0)
        y = jnp.clip(lax.conv_general_dilated(h, w2, (1, 1), 'SAME',
                                              dimension_numbers=dn) + b2, -1.0, 1.0)
        x = jnp.clip(y + res, -1.0, 1.0)
    return x


if __name__ == "__main__":
    key = jax.random.PRNGKey(0)
    k_param, k_input = jax.random.split(key)

    # PyTorch NCHW input shape.  W*C = 128 lanes (lane-dense), H=16, B=16 so the
    # batch folds into M = b_tile*H = 128 with grid=(2,) (one step per core).
    B, C, H, W = 16, 8, 16, 16
    inplanes = planes = C
    blocks = 2

    x_nchw = jax.random.normal(k_input, (B, C, H, W), jnp.float32)
    x_nhwc = jnp.transpose(x_nchw, (0, 2, 3, 1))        # kernel layout NHWC

    layer = LayerSNNAllPallas(k_param, inplanes, planes, blocks, H, W)
    out_nhwc = layer(x_nhwc)
    out_nchw = jnp.transpose(out_nhwc, (0, 3, 1, 2))    # back to PyTorch NCHW
    jax.block_until_ready(out_nchw)
    assert out_nchw.shape == (B, planes, H, W)

    # Numeric self-check vs. pure-JAX f32 reference (loose tol: bf16 MXU operands).
    ref_nhwc = _reference_forward(x_nhwc, layer.raw_params)
    max_err = float(jnp.max(jnp.abs(out_nhwc - ref_nhwc)))
    assert max_err < 5e-2, f"kernel/reference mismatch: max |err| = {max_err}"

    print("KERNEL_OK")
</pallas_src>

<mosaic_0001>
module attributes {stable_mosaic.version = 11 : i64} {
  func.func @kernel(%arg0: i32, %arg1: memref<8x16x128xf32, #tpu.memory_space<vmem>>, %arg2: memref<2x3x128x128xbf16, #tpu.memory_space<vmem>>, %arg3: memref<2x1x128xf32, #tpu.memory_space<vmem>>, %arg4: memref<2x3x128x128xbf16, #tpu.memory_space<vmem>>, %arg5: memref<2x1x128xf32, #tpu.memory_space<vmem>>, %arg6: memref<8x16x128xf32, #tpu.memory_space<vmem>>, %arg7: memref<8x18x128xbf16, #tpu.memory_space<vmem>>) attributes {dimension_semantics = [#tpu.dimension_semantics<parallel>], iteration_bounds = array<i64: 2>, scalar_prefetch = 0 : i64, scratch_operands = 1 : i64, tpu.core_type = #tpu.core_type<tc>, window_params = [{transform_indices = @transform_0, window_bounds = array<i64: 8, 16, 128>}, {pipeline_mode = #tpu.pipeline_mode<synchronous>, transform_indices = @transform_1, window_bounds = array<i64: 2, 3, 128, 128>}, {pipeline_mode = #tpu.pipeline_mode<synchronous>, transform_indices = @transform_2, window_bounds = array<i64: 2, 1, 128>}, {pipeline_mode = #tpu.pipeline_mode<synchronous>, transform_indices = @transform_3, window_bounds = array<i64: 2, 3, 128, 128>}, {pipeline_mode = #tpu.pipeline_mode<synchronous>, transform_indices = @transform_4, window_bounds = array<i64: 2, 1, 128>}, {transform_indices = @transform_5, window_bounds = array<i64: 8, 16, 128>}]} {
    %cst = arith.constant 0.000000e+00 : bf16
    %0 = vector.broadcast %cst : bf16 to vector<8x1x128xbf16>
    %c0 = arith.constant 0 : index
    %c0_0 = arith.constant 0 : index
    %c0_1 = arith.constant 0 : index
    %1 = vector.load %arg7[%c0, %c0_0, %c0_1] : memref<8x18x128xbf16, #tpu.memory_space<vmem>>, vector<8x1x128xbf16>
    tpu.vector_store %arg7[%c0, %c0_0, %c0_1], %0 {strides = array<i32>} : memref<8x18x128xbf16, #tpu.memory_space<vmem>>, vector<8x1x128xbf16>,
    %c0_2 = arith.constant 0 : index
    %c17 = arith.constant 17 : index
    %c0_3 = arith.constant 0 : index
    %2 = vector.load %arg7[%c0_2, %c17, %c0_3] : memref<8x18x128xbf16, #tpu.memory_space<vmem>>, vector<8x1x128xbf16>
    tpu.vector_store %arg7[%c0_2, %c17, %c0_3], %0 {strides = array<i32>} : memref<8x18x128xbf16, #tpu.memory_space<vmem>>, vector<8x1x128xbf16>,
    %c0_4 = arith.constant 0 : index
    %c0_5 = arith.constant 0 : index
    %c0_6 = arith.constant 0 : index
    %3 = vector.load %arg1[%c0_4, %c0_5, %c0_6] : memref<8x16x128xf32, #tpu.memory_space<vmem>>, vector<8x16x128xf32>
    %4 = arith.truncf %3 : vector<8x16x128xf32> to vector<8x16x128xbf16>
    %c0_7 = arith.constant 0 : index
    %c1 = arith.constant 1 : index
    %c0_8 = arith.constant 0 : index
    %5 = vector.load %arg7[%c0_7, %c1, %c0_8] : memref<8x18x128xbf16, #tpu.memory_space<vmem>>, vector<8x16x128xbf16>
    tpu.vector_store %arg7[%c0_7, %c1, %c0_8], %4 {strides = array<i32>} : memref<8x18x128xbf16, #tpu.memory_space<vmem>>, vector<8x16x128xbf16>,
    %c0_9 = arith.constant 0 : index
    %c0_10 = arith.constant 0 : index
    %c0_11 = arith.constant 0 : index
    %6 = vector.load %arg3[%c0_9, %c0_10, %c0_11] : memref<2x1x128xf32, #tpu.memory_space<vmem>>, vector<1x1x128xf32>
    %7 = vector.shape_cast %6 : vector<1x1x128xf32> to vector<1x128xf32>
    %cst_12 = arith.constant 0.000000e+00 : f32
    %8 = vector.broadcast %cst_12 : f32 to vector<128x128xf32>
    %c0_13 = arith.constant 0 : index
    %c0_14 = arith.constant 0 : index
    %c0_15 = arith.constant 0 : index
    %9 = vector.load %arg7[%c0_13, %c0_14, %c0_15] : memref<8x18x128xbf16, #tpu.memory_space<vmem>>, vector<8x16x128xbf16>
    %10 = vector.shape_cast %9 : vector<8x16x128xbf16> to vector<128x128xbf16>
    %c0_16 = arith.constant 0 : index
    %c0_17 = arith.constant 0 : index
    %c0_18 = arith.constant 0 : index
    %c0_19 = arith.constant 0 : index
    %11 = vector.load %arg2[%c0_16, %c0_17, %c0_18, %c0_19] : memref<2x3x128x128xbf16, #tpu.memory_space<vmem>>, vector<1x1x128x128xbf16>
    %12 = vector.shape_cast %11 : vector<1x1x128x128xbf16> to vector<128x128xbf16>
    %cst_20 = arith.constant dense<0.000000e+00> : vector<128x128xf32>
    %13 = tpu.matmul %10, %12, %cst_20 {dimension_numbers = #tpu.dot_dimension_numbers<[1], [0], [0], [1], [0, 0, 1, 1], [], []>} : vector<128x128xbf16>, vector<128x128xbf16>, vector<128x128xf32> -> vector<128x128xf32>
    %14 = arith.addf %8, %13 : vector<128x128xf32>
    %c0_21 = arith.constant 0 : index
    %c1_22 = arith.constant 1 : index
    %c0_23 = arith.constant 0 : index
    %15 = vector.load %arg7[%c0_21, %c1_22, %c0_23] : memref<8x18x128xbf16, #tpu.memory_space<vmem>>, vector<8x16x128xbf16>
    %16 = vector.shape_cast %15 : vector<8x16x128xbf16> to vector<128x128xbf16>
    %c0_24 = arith.constant 0 : index
    %c1_25 = arith.constant 1 : index
    %c0_26 = arith.constant 0 : index
    %c0_27 = arith.constant 0 : index
    %17 = vector.load %arg2[%c0_24, %c1_25, %c0_26, %c0_27] : memref<2x3x128x128xbf16, #tpu.memory_space<vmem>>, vector<1x1x128x128xbf16>
    %18 = vector.shape_cast %17 : vector<1x1x128x128xbf16> to vector<128x128xbf16>
    %cst_28 = arith.constant dense<0.000000e+00> : vector<128x128xf32>
    %19 = tpu.matmul %16, %18, %cst_28 {dimension_numbers = #tpu.dot_dimension_numbers<[1], [0], [0], [1], [0, 0, 1, 1], [], []>} : vector<128x128xbf16>, vector<128x128xbf16>, vector<128x128xf32> -> vector<128x128xf32>
    %20 = arith.addf %14, %19 : vector<128x128xf32>
    %c0_29 = arith.constant 0 : index
    %c2 = arith.constant 2 : index
    %c0_30 = arith.constant 0 : index
    %21 = vector.load %arg7[%c0_29, %c2, %c0_30] : memref<8x18x128xbf16, #tpu.memory_space<vmem>>, vector<8x16x128xbf16>
    %22 = vector.shape_cast %21 : vector<8x16x128xbf16> to vector<128x128xbf16>
    %c0_31 = arith.constant 0 : index
    %c2_32 = arith.constant 2 : index
    %c0_33 = arith.constant 0 : index
    %c0_34 = arith.constant 0 : index
    %23 = vector.load %arg2[%c0_31, %c2_32, %c0_33, %c0_34] : memref<2x3x128x128xbf16, #tpu.memory_space<vmem>>, vector<1x1x128x128xbf16>
    %24 = vector.shape_cast %23 : vector<1x1x128x128xbf16> to vector<128x128xbf16>
    %cst_35 = arith.constant dense<0.000000e+00> : vector<128x128xf32>
    %25 = tpu.matmul %22, %24, %cst_35 {dimension_numbers = #tpu.dot_dimension_numbers<[1], [0], [0], [1], [0, 0, 1, 1], [], []>} : vector<128x128xbf16>, vector<128x128xbf16>, vector<128x128xf32> -> vector<128x128xf32>
    %26 = arith.addf %20, %25 : vector<128x128xf32>
    %27 = vector.broadcast %7 : vector<1x128xf32> to vector<128x128xf32>
    %28 = arith.addf %26, %27 : vector<128x128xf32>
    %cst_36 = arith.constant -1.000000e+00 : f32
    %cst_37 = arith.constant 1.000000e+00 : f32
    %29 = vector.broadcast %cst_36 : f32 to vector<128x128xf32>
    %30 = arith.maximumf %29, %28 : vector<128x128xf32>
    %31 = vector.broadcast %cst_37 : f32 to vector<128x128xf32>
    %32 = arith.minimumf %31, %30 : vector<128x128xf32>
    %33 = vector.shape_cast %32 : vector<128x128xf32> to vector<8x16x128xf32>
    %34 = arith.truncf %33 : vector<8x16x128xf32> to vector<8x16x128xbf16>
    %c0_38 = arith.constant 0 : index
    %c1_39 = arith.constant 1 : index
    %c0_40 = arith.constant 0 : index
    %35 = vector.load %arg7[%c0_38, %c1_39, %c0_40] : memref<8x18x128xbf16, #tpu.memory_space<vmem>>, vector<8x16x128xbf16>
    tpu.vector_store %arg7[%c0_38, %c1_39, %c0_40], %34 {strides = array<i32>} : memref<8x18x128xbf16, #tpu.memory_space<vmem>>, vector<8x16x128xbf16>,
    %c0_41 = arith.constant 0 : index
    %c0_42 = arith.constant 0 : index
    %c0_43 = arith.constant 0 : index
    %36 = vector.load %arg5[%c0_41, %c0_42, %c0_43] : memref<2x1x128xf32, #tpu.memory_space<vmem>>, vector<1x1x128xf32>
    %37 = vector.shape_cast %36 : vector<1x1x128xf32> to vector<1x128xf32>
    %cst_44 = arith.constant 0.000000e+00 : f32
    %38 = vector.broadcast %cst_44 : f32 to vector<128x128xf32>
    %c0_45 = arith.constant 0 : index
    %c0_46 = arith.constant 0 : index
    %c0_47 = arith.constant 0 : index
    %39 = vector.load %arg7[%c0_45, %c0_46, %c0_47] : memref<8x18x128xbf16, #tpu.memory_space<vmem>>, vector<8x16x128xbf16>
    %40 = vector.shape_cast %39 : vector<8x16x128xbf16> to vector<128x128xbf16>
    %c0_48 = arith.constant 0 : index
    %c0_49 = arith.constant 0 : index
    %c0_50 = arith.constant 0 : index
    %c0_51 = arith.constant 0 : index
    %41 = vector.load %arg4[%c0_48, %c0_49, %c0_50, %c0_51] : memref<2x3x128x128xbf16, #tpu.memory_space<vmem>>, vector<1x1x128x128xbf16>
    %42 = vector.shape_cast %41 : vector<1x1x128x128xbf16> to vector<128x128xbf16>
    %cst_52 = arith.constant dense<0.000000e+00> : vector<128x128xf32>
    %43 = tpu.matmul %40, %42, %cst_52 {dimension_numbers = #tpu.dot_dimension_numbers<[1], [0], [0], [1], [0, 0, 1, 1], [], []>} : vector<128x128xbf16>, vector<128x128xbf16>, vector<128x128xf32> -> vector<128x128xf32>
    %44 = arith.addf %38, %43 : vector<128x128xf32>
    %c0_53 = arith.constant 0 : index
    %c1_54 = arith.constant 1 : index
    %c0_55 = arith.constant 0 : index
    %45 = vector.load %arg7[%c0_53, %c1_54, %c0_55] : memref<8x18x128xbf16, #tpu.memory_space<vmem>>, vector<8x16x128xbf16>
    %46 = vector.shape_cast %45 : vector<8x16x128xbf16> to vector<128x128xbf16>
    %c0_56 = arith.constant 0 : index
    %c1_57 = arith.constant 1 : index
    %c0_58 = arith.constant 0 : index
    %c0_59 = arith.constant 0 : index
    %47 = vector.load %arg4[%c0_56, %c1_57, %c0_58, %c0_59] : memref<2x3x128x128xbf16, #tpu.memory_space<vmem>>, vector<1x1x128x128xbf16>
    %48 = vector.shape_cast %47 : vector<1x1x128x128xbf16> to vector<128x128xbf16>
    %cst_60 = arith.constant dense<0.000000e+00> : vector<128x128xf32>
    %49 = tpu.matmul %46, %48, %cst_60 {dimension_numbers = #tpu.dot_dimension_numbers<[1], [0], [0], [1], [0, 0, 1, 1], [], []>} : vector<128x128xbf16>, vector<128x128xbf16>, vector<128x128xf32> -> vector<128x128xf32>
    %50 = arith.addf %44, %49 : vector<128x128xf32>
    %c0_61 = arith.constant 0 : index
    %c2_62 = arith.constant 2 : index
    %c0_63 = arith.constant 0 : index
    %51 = vector.load %arg7[%c0_61, %c2_62, %c0_63] : memref<8x18x128xbf16, #tpu.memory_space<vmem>>, vector<8x16x128xbf16>
    %52 = vector.shape_cast %51 : vector<8x16x128xbf16> to vector<128x128xbf16>
    %c0_64 = arith.constant 0 : index
    %c2_65 = arith.constant 2 : index
    %c0_66 = arith.constant 0 : index
    %c0_67 = arith.constant 0 : index
    %53 = vector.load %arg4[%c0_64, %c2_65, %c0_66, %c0_67] : memref<2x3x128x128xbf16, #tpu.memory_space<vmem>>, vector<1x1x128x128xbf16>
    %54 = vector.shape_cast %53 : vector<1x1x128x128xbf16> to vector<128x128xbf16>
    %cst_68 = arith.constant dense<0.000000e+00> : vector<128x128xf32>
    %55 = tpu.matmul %52, %54, %cst_68 {dimension_numbers = #tpu.dot_dimension_numbers<[1], [0], [0], [1], [0, 0, 1, 1], [], []>} : vector<128x128xbf16>, vector<128x128xbf16>, vector<128x128xf32> -> vector<128x128xf32>
    %56 = arith.addf %50, %55 : vector<128x128xf32>
    %57 = vector.broadcast %37 : vector<1x128xf32> to vector<128x128xf32>
    %58 = arith.addf %56, %57 : vector<128x128xf32>
    %cst_69 = arith.constant -1.000000e+00 : f32
    %cst_70 = arith.constant 1.000000e+00 : f32
    %59 = vector.broadcast %cst_69 : f32 to vector<128x128xf32>
    %60 = arith.maximumf %59, %58 : vector<128x128xf32>
    %61 = vector.broadcast %cst_70 : f32 to vector<128x128xf32>
    %62 = arith.minimumf %61, %60 : vector<128x128xf32>
    %63 = vector.shape_cast %62 : vector<128x128xf32> to vector<8x16x128xf32>
    %64 = arith.addf %63, %3 : vector<8x16x128xf32>
    %cst_71 = arith.constant -1.000000e+00 : f32
    %cst_72 = arith.constant 1.000000e+00 : f32
    %65 = vector.broadcast %cst_71 : f32 to vector<8x16x128xf32>
    %66 = arith.maximumf %65, %64 : vector<8x16x128xf32>
    %67 = vector.broadcast %cst_72 : f32 to vector<8x16x128xf32>
    %68 = arith.minimumf %67, %66 : vector<8x16x128xf32>
    %69 = arith.truncf %68 : vector<8x16x128xf32> to vector<8x16x128xbf16>
    %c0_73 = arith.constant 0 : index
    %c1_74 = arith.constant 1 : index
    %c0_75 = arith.constant 0 : index
    %70 = vector.load %arg7[%c0_73, %c1_74, %c0_75] : memref<8x18x128xbf16, #tpu.memory_space<vmem>>, vector<8x16x128xbf16>
    tpu.vector_store %arg7[%c0_73, %c1_74, %c0_75], %69 {strides = array<i32>} : memref<8x18x128xbf16, #tpu.memory_space<vmem>>, vector<8x16x128xbf16>,
    %c1_76 = arith.constant 1 : index
    %c0_77 = arith.constant 0 : index
    %c0_78 = arith.constant 0 : index
    %71 = vector.load %arg3[%c1_76, %c0_77, %c0_78] : memref<2x1x128xf32, #tpu.memory_space<vmem>>, vector<1x1x128xf32>
    %72 = vector.shape_cast %71 : vector<1x1x128xf32> to vector<1x128xf32>
    %cst_79 = arith.constant 0.000000e+00 : f32
    %73 = vector.broadcast %cst_79 : f32 to vector<128x128xf32>
    %c0_80 = arith.constant 0 : index
    %c0_81 = arith.constant 0 : index
    %c0_82 = arith.constant 0 : index
    %74 = vector.load %arg7[%c0_80, %c0_81, %c0_82] : memref<8x18x128xbf16, #tpu.memory_space<vmem>>, vector<8x16x128xbf16>
    %75 = vector.shape_cast %74 : vector<8x16x128xbf16> to vector<128x128xbf16>
    %c1_83 = arith.constant 1 : index
    %c0_84 = arith.constant 0 : index
    %c0_85 = arith.constant 0 : index
    %c0_86 = arith.constant 0 : index
    %76 = vector.load %arg2[%c1_83, %c0_84, %c0_85, %c0_86] : memref<2x3x128x128xbf16, #tpu.memory_space<vmem>>, vector<1x1x128x128xbf16>
    %77 = vector.shape_cast %76 : vector<1x1x128x128xbf16> to vector<128x128xbf16>
    %cst_87 = arith.constant dense<0.000000e+00> : vector<128x128xf32>
    %78 = tpu.matmul %75, %77, %cst_87 {dimension_numbers = #tpu.dot_dimension_numbers<[1], [0], [0], [1], [0, 0, 1, 1], [], []>} : vector<128x128xbf16>, vector<128x128xbf16>, vector<128x128xf32> -> vector<128x128xf32>
    %79 = arith.addf %73, %78 : vector<128x128xf32>
    %c0_88 = arith.constant 0 : index
    %c1_89 = arith.constant 1 : index
    %c0_90 = arith.constant 0 : index
    %80 = vector.load %arg7[%c0_88, %c1_89, %c0_90] : memref<8x18x128xbf16, #tpu.memory_space<vmem>>, vector<8x16x128xbf16>
    %81 = vector.shape_cast %80 : vector<8x16x128xbf16> to vector<128x128xbf16>
    %c1_91 = arith.constant 1 : index
    %c1_92 = arith.constant 1 : index
    %c0_93 = arith.constant 0 : index
    %c0_94 = arith.constant 0 : index
    %82 = vector.load %arg2[%c1_91, %c1_92, %c0_93, %c0_94] : memref<2x3x128x128xbf16, #tpu.memory_space<vmem>>, vector<1x1x128x128xbf16>
    %83 = vector.shape_cast %82 : vector<1x1x128x128xbf16> to vector<128x128xbf16>
    %cst_95 = arith.constant dense<0.000000e+00> : vector<128x128xf32>
    %84 = tpu.matmul %81, %83, %cst_95 {dimension_numbers = #tpu.dot_dimension_numbers<[1], [0], [0], [1], [0, 0, 1, 1], [], []>} : vector<128x128xbf16>, vector<128x128xbf16>, vector<128x128xf32> -> vector<128x128xf32>
    %85 = arith.addf %79, %84 : vector<128x128xf32>
    %c0_96 = arith.constant 0 : index
    %c2_97 = arith.constant 2 : index
    %c0_98 = arith.constant 0 : index
    %86 = vector.load %arg7[%c0_96, %c2_97, %c0_98] : memref<8x18x128xbf16, #tpu.memory_space<vmem>>, vector<8x16x128xbf16>
    %87 = vector.shape_cast %86 : vector<8x16x128xbf16> to vector<128x128xbf16>
    %c1_99 = arith.constant 1 : index
    %c2_100 = arith.constant 2 : index
    %c0_101 = arith.constant 0 : index
    %c0_102 = arith.constant 0 : index
    %88 = vector.load %arg2[%c1_99, %c2_100, %c0_101, %c0_102] : memref<2x3x128x128xbf16, #tpu.memory_space<vmem>>, vector<1x1x128x128xbf16>
    %89 = vector.shape_cast %88 : vector<1x1x128x128xbf16> to vector<128x128xbf16>
    %cst_103 = arith.constant dense<0.000000e+00> : vector<128x128xf32>
    %90 = tpu.matmul %87, %89, %cst_103 {dimension_numbers = #tpu.dot_dimension_numbers<[1], [0], [0], [1], [0, 0, 1, 1], [], []>} : vector<128x128xbf16>, vector<128x128xbf16>, vector<128x128xf32> -> vector<128x128xf32>
    %91 = arith.addf %85, %90 : vector<128x128xf32>
    %92 = vector.broadcast %72 : vector<1x128xf32> to vector<128x128xf32>
    %93 = arith.addf %91, %92 : vector<128x128xf32>
    %cst_104 = arith.constant -1.000000e+00 : f32
    %cst_105 = arith.constant 1.000000e+00 : f32
    %94 = vector.broadcast %cst_104 : f32 to vector<128x128xf32>
    %95 = arith.maximumf %94, %93 : vector<128x128xf32>
    %96 = vector.broadcast %cst_105 : f32 to vector<128x128xf32>
    %97 = arith.minimumf %96, %95 : vector<128x128xf32>
    %98 = vector.shape_cast %97 : vector<128x128xf32> to vector<8x16x128xf32>
    %99 = arith.truncf %98 : vector<8x16x128xf32> to vector<8x16x128xbf16>
    %c0_106 = arith.constant 0 : index
    %c1_107 = arith.constant 1 : index
    %c0_108 = arith.constant 0 : index
    %100 = vector.load %arg7[%c0_106, %c1_107, %c0_108] : memref<8x18x128xbf16, #tpu.memory_space<vmem>>, vector<8x16x128xbf16>
    tpu.vector_store %arg7[%c0_106, %c1_107, %c0_108], %99 {strides = array<i32>} : memref<8x18x128xbf16, #tpu.memory_space<vmem>>, vector<8x16x128xbf16>,
    %c1_109 = arith.constant 1 : index
    %c0_110 = arith.constant 0 : index
    %c0_111 = arith.constant 0 : index
    %101 = vector.load %arg5[%c1_109, %c0_110, %c0_111] : memref<2x1x128xf32, #tpu.memory_space<vmem>>, vector<1x1x128xf32>
    %102 = vector.shape_cast %101 : vector<1x1x128xf32> to vector<1x128xf32>
    %cst_112 = arith.constant 0.000000e+00 : f32
    %103 = vector.broadcast %cst_112 : f32 to vector<128x128xf32>
    %c0_113 = arith.constant 0 : index
    %c0_114 = arith.constant 0 : index
    %c0_115 = arith.constant 0 : index
    %104 = vector.load %arg7[%c0_113, %c0_114, %c0_115] : memref<8x18x128xbf16, #tpu.memory_space<vmem>>, vector<8x16x128xbf16>
    %105 = vector.shape_cast %104 : vector<8x16x128xbf16> to vector<128x128xbf16>
    %c1_116 = arith.constant 1 : index
    %c0_117 = arith.constant 0 : index
    %c0_118 = arith.constant 0 : index
    %c0_119 = arith.constant 0 : index
    %106 = vector.load %arg4[%c1_116, %c0_117, %c0_118, %c0_119] : memref<2x3x128x128xbf16, #tpu.memory_space<vmem>>, vector<1x1x128x128xbf16>
    %107 = vector.shape_cast %106 : vector<1x1x128x128xbf16> to vector<128x128xbf16>
    %cst_120 = arith.constant dense<0.000000e+00> : vector<128x128xf32>
    %108 = tpu.matmul %105, %107, %cst_120 {dimension_numbers = #tpu.dot_dimension_numbers<[1], [0], [0], [1], [0, 0, 1, 1], [], []>} : vector<128x128xbf16>, vector<128x128xbf16>, vector<128x128xf32> -> vector<128x128xf32>
    %109 = arith.addf %103, %108 : vector<128x128xf32>
    %c0_121 = arith.constant 0 : index
    %c1_122 = arith.constant 1 : index
    %c0_123 = arith.constant 0 : index
    %110 = vector.load %arg7[%c0_121, %c1_122, %c0_123] : memref<8x18x128xbf16, #tpu.memory_space<vmem>>, vector<8x16x128xbf16>
    %111 = vector.shape_cast %110 : vector<8x16x128xbf16> to vector<128x128xbf16>
    %c1_124 = arith.constant 1 : index
    %c1_125 = arith.constant 1 : index
    %c0_126 = arith.constant 0 : index
    %c0_127 = arith.constant 0 : index
    %112 = vector.load %arg4[%c1_124, %c1_125, %c0_126, %c0_127] : memref<2x3x128x128xbf16, #tpu.memory_space<vmem>>, vector<1x1x128x128xbf16>
    %113 = vector.shape_cast %112 : vector<1x1x128x128xbf16> to vector<128x128xbf16>
    %cst_128 = arith.constant dense<0.000000e+00> : vector<128x128xf32>
    %114 = tpu.matmul %111, %113, %cst_128 {dimension_numbers = #tpu.dot_dimension_numbers<[1], [0], [0], [1], [0, 0, 1, 1], [], []>} : vector<128x128xbf16>, vector<128x128xbf16>, vector<128x128xf32> -> vector<128x128xf32>
    %115 = arith.addf %109, %114 : vector<128x128xf32>
    %c0_129 = arith.constant 0 : index
    %c2_130 = arith.constant 2 : index
    %c0_131 = arith.constant 0 : index
    %116 = vector.load %arg7[%c0_129, %c2_130, %c0_131] : memref<8x18x128xbf16, #tpu.memory_space<vmem>>, vector<8x16x128xbf16>
    %117 = vector.shape_cast %116 : vector<8x16x128xbf16> to vector<128x128xbf16>
    %c1_132 = arith.constant 1 : index
    %c2_133 = arith.constant 2 : index
    %c0_134 = arith.constant 0 : index
    %c0_135 = arith.constant 0 : index
    %118 = vector.load %arg4[%c1_132, %c2_133, %c0_134, %c0_135] : memref<2x3x128x128xbf16, #tpu.memory_space<vmem>>, vector<1x1x128x128xbf16>
    %119 = vector.shape_cast %118 : vector<1x1x128x128xbf16> to vector<128x128xbf16>
    %cst_136 = arith.constant dense<0.000000e+00> : vector<128x128xf32>
    %120 = tpu.matmul %117, %119, %cst_136 {dimension_numbers = #tpu.dot_dimension_numbers<[1], [0], [0], [1], [0, 0, 1, 1], [], []>} : vector<128x128xbf16>, vector<128x128xbf16>, vector<128x128xf32> -> vector<128x128xf32>
    %121 = arith.addf %115, %120 : vector<128x128xf32>
    %122 = vector.broadcast %102 : vector<1x128xf32> to vector<128x128xf32>
    %123 = arith.addf %121, %122 : vector<128x128xf32>
    %cst_137 = arith.constant -1.000000e+00 : f32
    %cst_138 = arith.constant 1.000000e+00 : f32
    %124 = vector.broadcast %cst_137 : f32 to vector<128x128xf32>
    %125 = arith.maximumf %124, %123 : vector<128x128xf32>
    %126 = vector.broadcast %cst_138 : f32 to vector<128x128xf32>
    %127 = arith.minimumf %126, %125 : vector<128x128xf32>
    %128 = vector.shape_cast %127 : vector<128x128xf32> to vector<8x16x128xf32>
    %129 = arith.addf %128, %68 : vector<8x16x128xf32>
    %cst_139 = arith.constant -1.000000e+00 : f32
    %cst_140 = arith.constant 1.000000e+00 : f32
    %130 = vector.broadcast %cst_139 : f32 to vector<8x16x128xf32>
    %131 = arith.maximumf %130, %129 : vector<8x16x128xf32>
    %132 = vector.broadcast %cst_140 : f32 to vector<8x16x128xf32>
    %133 = arith.minimumf %132, %131 : vector<8x16x128xf32>
    %c0_141 = arith.constant 0 : index
    %c0_142 = arith.constant 0 : index
    %c0_143 = arith.constant 0 : index
    %134 = vector.load %arg6[%c0_141, %c0_142, %c0_143] : memref<8x16x128xf32, #tpu.memory_space<vmem>>, vector<8x16x128xf32>
    tpu.vector_store %arg6[%c0_141, %c0_142, %c0_143], %133 {strides = array<i32>} : memref<8x16x128xf32, #tpu.memory_space<vmem>>, vector<8x16x128xf32>,
    return
  }
  func.func @transform_0(%arg0: i32) -> (i32, i32, i32) {
    %c0_i32 = arith.constant 0 : i32
    %c0_i32_0 = arith.constant 0 : i32
    %c0_i32_1 = arith.constant 0 : i32
    return %arg0, %c0_i32, %c0_i32_0 : i32, i32, i32
  }
  func.func @transform_1(%arg0: i32) -> (i32, i32, i32, i32) {
    %c0_i32 = arith.constant 0 : i32
    %c0_i32_0 = arith.constant 0 : i32
    %c0_i32_1 = arith.constant 0 : i32
    %c0_i32_2 = arith.constant 0 : i32
    %c0_i32_3 = arith.constant 0 : i32
    return %c0_i32, %c0_i32_0, %c0_i32_1, %c0_i32_2 : i32, i32, i32, i32
  }
  func.func @transform_2(%arg0: i32) -> (i32, i32, i32) {
    %c0_i32 = arith.constant 0 : i32
    %c0_i32_0 = arith.constant 0 : i32
    %c0_i32_1 = arith.constant 0 : i32
    %c0_i32_2 = arith.constant 0 : i32
    return %c0_i32, %c0_i32_0, %c0_i32_1 : i32, i32, i32
  }
  func.func @transform_3(%arg0: i32) -> (i32, i32, i32, i32) {
    %c0_i32 = arith.constant 0 : i32
    %c0_i32_0 = arith.constant 0 : i32
    %c0_i32_1 = arith.constant 0 : i32
    %c0_i32_2 = arith.constant 0 : i32
    %c0_i32_3 = arith.constant 0 : i32
    return %c0_i32, %c0_i32_0, %c0_i32_1, %c0_i32_2 : i32, i32, i32, i32
  }
  func.func @transform_4(%arg0: i32) -> (i32, i32, i32) {
    %c0_i32 = arith.constant 0 : i32
    %c0_i32_0 = arith.constant 0 : i32
    %c0_i32_1 = arith.constant 0 : i32
    %c0_i32_2 = arith.constant 0 : i32
    return %c0_i32, %c0_i32_0, %c0_i32_1 : i32, i32, i32
  }
  func.func @transform_5(%arg0: i32) -> (i32, i32, i32) {
    %c0_i32 = arith.constant 0 : i32
    %c0_i32_0 = arith.constant 0 : i32
    %c0_i32_1 = arith.constant 0 : i32
    return %arg0, %c0_i32, %c0_i32_0 : i32, i32, i32
  }
}

</mosaic_0001>

<bundles_post_ra>
// kernel: _forward.1
= control target key start
LH: loop header
LB: loop body
LE: loop exit
PB: predicated region body
PF: predicated region fallthrough
CT: control target
= control target key end

     0   :  { %s6920_s18 = smov 0   ;;  %s8610_s0 = inlined_call_operand.vmem [shape: f32[16,16,128], index: 0, kind: input, shape index: {}]   ;;  %s8611_s1 = inlined_call_operand.vmem [shape: bf16[2,3,128,128], index: 1, kind: input, shape index: {}]   ;;  %s8612_s2 = inlined_call_operand.vmem [shape: f32[2,1,128], index: 2, kind: input, shape index: {}]   ;;  %s8613_s3 = inlined_call_operand.vmem [shape: bf16[2,3,128,128], index: 3, kind: input, shape index: {}]   ;;  %s8614_s4 = inlined_call_operand.vmem [shape: f32[2,1,128], index: 4, kind: input, shape index: {}]   ;;  %s8615_s5 = inlined_call_operand.vmem [shape: f32[16,16,128], index: 5, kind: output, shape index: {}]  }
   0x1 LB: > { %s5396_s19 = sadd.s32 4294967295, %s6888_s18   ;;  %p5400_p0 = scmp.ge.s32.totalorder %s6888_s18, 1  ;;  %s6888_s18 = sphi %s6920_s18, %s15_s18  }
   0x2   : > { %p189_p1 = scmp.lt.s32.totalorder %s6888_s18, 3 }
   0x4   : > { %p190_p2 = pnand %p5400_p0, %p189_p1 }
   0x6   : > { %193 = sbr.rel (%p190_p2) target bundleno = 1406 (0x57e), region = 40 }
   0xd   : > { %v6737_v0 = vld [vmem:[%s8611_s1 + $0x40] sm:$0xff]   ;;  %s5401_s22 = sshll.u32 %s5396_s19, 3  ;;  %v6738_v1 = vld [vmem:[%s8611_s1 + $0x48] sm:$0xff]   ;;  %v6739_v2 = vld [vmem:[%s8611_s1 + $0x50] sm:$0xff]   ;;  %vm234_vm0 = vcmask 1040384   ;;  %vm513_vm6 = vcmask 1043456  }
   0xe   : > { %p220_p3 = scmp.lt.s32.totalorder %s5401_s22, 15  ;;  %6217 = vmatprep.subr.bf16.mxu0 %v6737_v0  ;;  %v6740_v3 = vld [vmem:[%s8611_s1 + $0x58] sm:$0xff]   ;;  %vm235_vm1 = vsmask.f32 256  ;;  %v237_v4 = vld [vmem:[#allocation2] sm:$0x1] }
   0xf   : > { %6218 = vmatpush3.bf16.msra.mxu0 %v6737_v0  ;;  %vm261_vm2 = vsmask.f32 7938  ;;  %vm6951_vm3 = vmand %vm234_vm0, %vm235_vm1  ;;  %v263_v6 = vld [vmem:[#allocation2 + $0x8] sm:$0x1]  ;;  %vm351_vm5 = vsmask.f32 4368 }
  0x10   : > { %s8644_s22 = smov (!%p220_p3, %s5401_s22), 15  ;;  %6219 = vmatprep.subr.bf16.mxu0 %v6738_v1  ;;  %v238_v8 = vsel %vm6951_vm3, 0, %v237_v4  ;;  %vm6959_vm4 = vmand %vm234_vm0, %vm261_vm2  ;;  %v6741_v14 = vld [vmem:[%s8611_s1 + $0x60] sm:$0xff]   ;;  %v240_v17 = vld [vmem:[#allocation2 + $0xc] sm:$0x1]  ;;  %vm1218_vm12 = vcmask 1042432  }
  0x11   : > { %s5959_s27 = sshll.u32 %s8644_s22, 4  ;;  %239 = vst [vmem:[#allocation2] sm:$0x1] %v238_v8  ;;  %v264_v12 = vsel %vm6959_vm4, 0, %v263_v6  ;;  %v241_v20 = vsel %vm6951_vm3, 0, %v240_v17  ;;  %v6975_v23 = vld [vmem:[%s8611_s1 + $0x68] sm:$0xff]   ;;  %vm6979_vm7 = vmor %vm235_vm1, %vm351_vm5 }
  0x12   : > { %s6945_s30 = scalar_lea.vmem %s8610_s0, %s5959_s27  ;;  %265 = vst [vmem:[#allocation2 + $0x8] sm:$0x1] %v264_v12  ;;  %v266_v21 = vld [vmem:[#allocation2 + $0x14] sm:$0x1]  ;;  %242 = vst [vmem:[#allocation2 + $0xc] sm:$0x1] %v241_v20  ;;  %s8562_s9 = scalar_lea.vmem %s8615_s5, %s5959_s27 }
  0x13   : > { %6220 = vmatpush3.bf16.msra.mxu0 %v6738_v1  ;;  %v287_v7 = vld [vmem:[%s6945_s30] sm:$0xff]  ;;  %v288_v10 = vld [vmem:[%s6945_s30 + $0x8] sm:$0xff]  ;;  %v289_v22 = vld [vmem:[%s6945_s30 + $0x10] sm:$0xff]  ;;  %v267_v26 = vsel %vm6959_vm4, 0, %v266_v21  ;;  %vm612_vm9 = vsmask.f32 3328 }
  0x14   : > { %6221 = vmatprep.subr.bf16.mxu0 %v6739_v2  ;;  %v5961_v11 = vpack.c.bf16 %v287_v7, %v287_v7  ;;  %v5962_v13 = vpack.c.bf16 %v288_v10, %v288_v10  ;;  %v290_v27 = vld [vmem:[%s6945_s30 + $0x18] sm:$0xff]  ;;  %v5963_v28 = vpack.c.bf16 %v289_v22, %v289_v22  ;;  %268 = vst [vmem:[#allocation2 + $0x14] sm:$0x1] %v267_v26  ;;  %v291_v32 = vld [vmem:[%s6945_s30 + $0x20] sm:$0xff]  ;;  %vm6989_vm8 = vmand %vm513_vm6, %vm261_vm2  ;;  %vm613_vm10 = vsmask.f32 7440 }
  0x15   : > { %v5964_v30 = vpack.c.bf16 %v290_v27, %v290_v27  ;;  %v243_v31 = vld [vmem:[#allocation2 + $0x18] sm:$0x1]  ;;  %v269_v38 = vld [vmem:[#allocation2 + $0x20] sm:$0x1]  ;;  %v292_v39 = vld [vmem:[%s6945_s30 + $0x28] sm:$0xff]  ;;  %v5965_v49 = vpack.c.bf16 %v291_v32, %v291_v32  ;;  %vm1219_vm13 = vcmask 1046532  }
  0x16   : > { %v354_v15 = vshrl.u32 %v5961_v11, 16  ;;  %v357_v16 = vshll.u32 %v5961_v11, 16  ;;  %v362_v18 = vshrl.u32 %v5962_v13, 16  ;;  %v365_v19 = vshll.u32 %v5962_v13, 16  ;;  %v6997_v44 = vld [vmem:[%s8611_s1 + $0x70] sm:$0xff]   ;;  %v7015_v4 = vld [vmem:[%s8611_s1 + $0x78] sm:$0xff]   ;;  %vm7079_vm11 = vmor %vm612_vm9, %vm613_vm10 }
  0x17   : > { %6222 = vmatpush3.bf16.msra.mxu0 %v6739_v2  ;;  %v371_v36 = vshrl.u32 %v5963_v28, 16  ;;  %v374_v37 = vshll.u32 %v5963_v28, 16  ;;  %v379_v42 = vshrl.u32 %v5964_v30, 16  ;;  %v382_v43 = vshll.u32 %v5964_v30, 16  ;;  %v293_v55 = vld [vmem:[%s6945_s30 + $0x30] sm:$0xff]  ;;  %v295_v12 = vld [vmem:[%s6945_s30 + $0x40] sm:$0xff]  ;;  %vm7327_vm14 = vmor %vm1218_vm12, %vm1219_vm13 }
  0x18   : > { %6223 = vmatprep.subr.bf16.mxu0 %v6740_v3  ;;  %v356_v25 = vrot.slane %v354_v15, 7  ;;  %v364_v29 = vrot.slane %v362_v18, 7  ;;  %v515_v45 = vld [vmem:[#allocation2] sm:$0xf]  ;;  %v244_v47 = vsel %vm6951_vm3, 0, %v243_v31  ;;  %v270_v48 = vsel %vm6959_vm4, 0, %v269_v38 }
  0x19   : > { %v373_v46 = vrot.slane %v371_v36, 7  ;;  %v519_v52 = vld [vmem:[#allocation2 + $0x8] sm:$0x1]  ;;  %v381_v53 = vrot.slane %v379_v42, 7  ;;  %245 = vst [vmem:[#allocation2 + $0x18] sm:$0x1] %v244_v47  ;;  %v5966_v54 = vpack.c.bf16 %v292_v39, %v292_v39 }
  0x1a   : > { %v359_v33 = vor.u32 %v357_v16, %v356_v25  ;;  %v360_v34 = vrot.slane %v356_v25, 4  ;;  %v367_v40 = vor.u32 %v365_v19, %v364_v29  ;;  %v369_v41 = vrot.slane %v364_v29, 4  ;;  %271 = vst [vmem:[#allocation2 + $0x20] sm:$0x1] %v270_v48  ;;  %v246_v60 = vld [vmem:[#allocation2 + $0x24] sm:$0x1] }
  0x1b   : > { %6224 = vmatpush3.bf16.msra.mxu0 %v6740_v3  ;;  %v376_v57 = vor.u32 %v374_v37, %v373_v46  ;;  %v377_v58 = vrot.slane %v373_v46, 4  ;;  %v388_v59 = vshrl.u32 %v5965_v49, 16  ;;  %v272_v61 = vld [vmem:[#allocation2 + $0x2c] sm:$0x1]  ;;  %v384_v62 = vor.u32 %v382_v43, %v381_v53  ;;  %v294_v3 = vld [vmem:[%s6945_s30 + $0x38] sm:$0xff]  ;;  %v7047_v38 = vld [vmem:[%s8611_s1] sm:$0xff]  }
  0x1c   : > { %6225 = vmatprep.subr.bf16.mxu0 %v6741_v14  ;;  %v368_v50 = vsel %vm6979_vm7, %v360_v34, %v367_v40  ;;  %v516_v51 = vsel %vm6989_vm8, %v359_v33, %v515_v45  ;;  %v520_v56 = vsel %vm6951_vm3, %v369_v41, %v519_v52  ;;  %v386_v63 = vrot.slane %v381_v53, 4  ;;  %v522_v0 = vld [vmem:[#allocation2 + $0xc] sm:$0xf]  ;;  %v526_v7 = vld [vmem:[#allocation2 + $0x14] sm:$0x1] }
  0x1d   : > { %517 = vst [vmem:[#allocation2] sm:$0xf] %v516_v51  ;;  %518 = vst [vmem:[#allocation2 + $0x4] sm:$0xf] %v368_v50  ;;  %v391_v1 = vshll.u32 %v5965_v49, 16  ;;  %v396_v2 = vshrl.u32 %v5966_v54, 16  ;;  %v523_v6 = vsel %vm6989_vm8, %v376_v57, %v522_v0  ;;  %v385_v13 = vsel %vm6979_vm7, %v377_v58, %v384_v62 }
  0x1e   : > { %521 = vst [vmem:[#allocation2 + $0x8] sm:$0x1] %v520_v56  ;;  %v390_v8 = vrot.slane %v388_v59, 7  ;;  %v399_v10 = vshll.u32 %v5966_v54, 16  ;;  %v247_v11 = vsel %vm6951_vm3, 0, %v246_v60  ;;  %v273_v16 = vsel %vm6959_vm4, 0, %v272_v61 }
  0x1f   : > { %6226 = vmatpush3.bf16.msra.mxu0 %v6741_v14  ;;  %524 = vst [vmem:[#allocation2 + $0xc] sm:$0xf] %v523_v6  ;;  %v527_v14 = vsel %vm6951_vm3, %v386_v63, %v526_v7  ;;  %v398_v15 = vrot.slane %v396_v2, 7  ;;  %248 = vst [vmem:[#allocation2 + $0x24] sm:$0x1] %v247_v11  ;;  %v5967_v19 = vpack.c.bf16 %v293_v55, %v293_v55 }
  0x20   : > { %6227 = vmatprep.subr.bf16.mxu0 %v6975_v23  ;;  %525 = vst [vmem:[#allocation2 + $0x10] sm:$0xf] %v385_v13  ;;  %528 = vst [vmem:[#allocation2 + $0x14] sm:$0x1] %v527_v14  ;;  %v393_v17 = vor.u32 %v391_v1, %v390_v8  ;;  %v394_v18 = vrot.slane %v390_v8, 4  ;;  %v5968_v20 = vpack.c.bf16 %v294_v3, %v294_v3 }
  0x21   : > { %274 = vst [vmem:[#allocation2 + $0x2c] sm:$0x1] %v273_v16  ;;  %v249_v21 = vld [vmem:[#allocation2 + $0x30] sm:$0x1]  ;;  %v275_v22 = vld [vmem:[#allocation2 + $0x38] sm:$0x1]  ;;  %v401_v25 = vor.u32 %v399_v10, %v398_v15  ;;  %v7035_v33 = vpack.c.bf16 %v295_v12, %v295_v12 }
  0x22   : > { %v403_v26 = vrot.slane %v398_v15, 4  ;;  %v250_v27 = vsel %vm6951_vm3, 0, %v249_v21  ;;  %v276_v28 = vsel %vm6959_vm4, 0, %v275_v22  ;;  %v529_v29 = vld [vmem:[#allocation2 + $0x18] sm:$0xf]  ;;  %v405_v31 = vshrl.u32 %v5967_v19, 16 }
  0x23   : > { %6228 = vmatpush3.bf16.msra.mxu0 %v6975_v23  ;;  %v296_v23 = vld [vmem:[%s6945_s30 + $0x48] sm:$0xff]  ;;  %v533_v30 = vld [vmem:[#allocation2 + $0x20] sm:$0x1]  ;;  %v408_v32 = vshll.u32 %v5967_v19, 16  ;;  %251 = vst [vmem:[#allocation2 + $0x30] sm:$0x1] %v250_v27  ;;  %v402_v39 = vsel %vm6979_vm7, %v394_v18, %v401_v25  ;;  %v530_v40 = vsel %vm6989_vm8, %v393_v17, %v529_v29 }
  0x24   : > { %6229 = vmatprep.subr.bf16.mxu0 %v6997_v44  ;;  %277 = vst [vmem:[#allocation2 + $0x38] sm:$0x1] %v276_v28  ;;  %v7037_v34 = vpack.c.bf16 %v296_v23, %v296_v23  ;;  %v7040_v36 = vld [vmem:[#allocation2] sm:$0xf]  ;;  %v7042_v37 = vld [vmem:[#allocation2 + $0x4] sm:$0xf]  ;;  %v534_v41 = vsel %vm6951_vm3, %v403_v26, %v533_v30 }
  0x25   : > { %v413_v42 = vshrl.u32 %v5968_v20, 16  ;;  %v7056_v43 = vld [vmem:[#allocation2 + $0x8] sm:$0x1]  ;;  %v619_v45 = vshll.u32 %v7040_v36, 16  ;;  %v625_v46 = vshll.u32 %v7042_v37, 16  ;;  %v629_v47 = vshrl.u32 %v7042_v37, 16 }
  0x26   : > { %531 = vst [vmem:[#allocation2 + $0x18] sm:$0xf] %v530_v40  ;;  %532 = vst [vmem:[#allocation2 + $0x1c] sm:$0xf] %v402_v39  ;;  %v635_v48 = vshll.u32 %v7056_v43, 16  ;;  %v407_v49 = vrot.slane %v405_v31, 7 }
  0x27   : > { %6230 = vmatpush3.bf16.msra.mxu0 %v6997_v44  ;;  %v616_v44 = vshrl.u32 %v7040_v36, 16  ;;  %535 = vst [vmem:[#allocation2 + $0x20] sm:$0x1] %v534_v41  ;;  %v7063_v50 = vrot.slane %v413_v42, 7  ;;  %v416_v51 = vshll.u32 %v5968_v20, 16  ;;  %v621_v53 = vrot.slane %v619_v45, 5 }
  0x28   : > { %6231 = vmatprep.subr.bf16.mxu0 %v7015_v4  ;;  %v627_v54 = vrot.slane %v625_v46, 5  ;;  %v631_v55 = vrot.slane %v629_v47, 4  ;;  %v7065_v56 = vld [vmem:[#allocation2 + $0xc] sm:$0xf]  ;;  %v637_v57 = vrot.slane %v635_v48, 5  ;;  %v410_v61 = vor.u32 %v408_v32, %v407_v49 }
  0x29   : > { %v618_v52 = vrot.slane %v616_v44, 4  ;;  %v7068_v58 = vld [vmem:[#allocation2 + $0x10] sm:$0xf]  ;;  %v7070_v59 = vld [vmem:[#allocation2 + $0x14] sm:$0x1]  ;;  %v640_v60 = vshrl.u32 %v7065_v56, 16  ;;  %v418_v62 = vor.u32 %v416_v51, %v7063_v50 }
  0x2a   : > { %v632_v0 = vor.u32 %v631_v55, %v627_v54  ;;  %v643_v1 = vshll.u32 %v7065_v56, 16  ;;  %v649_v2 = vshll.u32 %v7068_v58, 16  ;;  %v536_v3 = vld [vmem:[#allocation2 + $0x24] sm:$0xf]  ;;  %v653_v7 = vshrl.u32 %v7068_v58, 16  ;;  %v6746_v55 = vld [vmem:[%s8611_s1 + $0x8] sm:$0xff]  }
  0x2b   : > { %6232 = vmatpush3.bf16.msra.mxu0 %v7015_v4  ;;  %v622_v63 = vor.u32 %v621_v53, %v618_v52  ;;  %v642_v6 = vrot.slane %v640_v60, 4  ;;  %v659_v8 = vshll.u32 %v7070_v59, 16  ;;  %v411_v10 = vrot.slane %v407_v49, 4  ;;  %v540_v31 = vld [vmem:[#allocation2 + $0x2c] sm:$0x1]  ;;  %v297_v52 = vld [vmem:[%s6945_s30 + $0x50] sm:$0xff] }
  0x2c   : > { %6249 = vmatprep.subr.bf16.mxu0 %v7047_v38  ;;  %v633_v12 = vrot.slane %v632_v0, 4  ;;  %v645_v13 = vrot.slane %v643_v1, 5  ;;  %v651_v14 = vrot.slane %v649_v2, 5  ;;  %v655_v15 = vrot.slane %v653_v7, 4  ;;  %v298_v53 = vld [vmem:[%s6945_s30 + $0x58] sm:$0xff] }
  0x2d   : > { %v623_v11 = vrot.slane %v622_v63, 4  ;;  %v661_v16 = vrot.slane %v659_v8, 5  ;;  %v7085_v17 = vld [vmem:[#allocation2 + $0x18] sm:$0xf]  ;;  %v7087_v18 = vld [vmem:[#allocation2 + $0x1c] sm:$0xf]  ;;  %v419_v19 = vsel %vm6979_vm7, %v411_v10, %v418_v62  ;;  %v537_v20 = vsel %vm6989_vm8, %v410_v61, %v536_v3 }
  0x2e   : > { %v638_v22 = vsel %vm7079_vm11, %v633_v12, %v637_v57  ;;  %v646_v23 = vor.u32 %v645_v13, %v642_v6  ;;  %v7097_v25 = vld [vmem:[#allocation2 + $0x20] sm:$0x1]  ;;  %v664_v26 = vshrl.u32 %v7085_v17, 16  ;;  %538 = vst [vmem:[#allocation2 + $0x24] sm:$0xf] %v537_v20  ;;  %v656_v28 = vor.u32 %v655_v15, %v651_v14 }
  0x2f   : > { %v628_v21 = vsel %vm7079_vm11, %v623_v11, %v627_v54  ;;  %539 = vst [vmem:[#allocation2 + $0x28] sm:$0xf] %v419_v19  ;;  %v667_v29 = vshll.u32 %v7085_v17, 16  ;;  %v673_v30 = vshll.u32 %v7087_v18, 16  ;;  %v677_v40 = vshrl.u32 %v7087_v18, 16 }
  0x30   : > { %v5439_v27 = vcombine.low %v628_v21, %v638_v22  ;;  %v647_v32 = vrot.slane %v646_v23, 4  ;;  %v666_v39 = vrot.slane %v664_v26, 4  ;;  %v683_v41 = vshll.u32 %v7097_v25, 16  ;;  %v543_v1 = vld [vmem:[#allocation2 + $0x30] sm:$0xf] }
  0x31   : > { %v657_v42 = vrot.slane %v656_v28, 4  ;;  %v669_v44 = vrot.slane %v667_v29, 5  ;;  %v675_v45 = vrot.slane %v673_v30, 5  ;;  %v420_v46 = vrot.slane %v7063_v50, 4  ;;  %v278_v20 = vld [vmem:[#allocation2 + $0x44] sm:$0x1] }
  0x32   : > { %6233 = vmatprep.mubr.bf16.mxu0 %v5439_v27  ;;  %v652_v47 = vsel %vm7079_vm11, %v647_v32, %v651_v14  ;;  %v679_v48 = vrot.slane %v677_v40, 4  ;;  %v685_v49 = vrot.slane %v683_v41, 5  ;;  %v422_v51 = vshrl.u32 %v7035_v33, 16  ;;  %v252_v14 = vld [vmem:[#allocation2 + $0x3c] sm:$0x1]  ;;  %v6747_v22 = vld [vmem:[%s8611_s1 + $0x10] sm:$0xff]  }
  0x33   : > { %v662_v54 = vsel %vm7079_vm11, %v657_v42, %v661_v16  ;;  %v670_v57 = vor.u32 %v669_v44, %v666_v39  ;;  %v541_v50 = vsel %vm6951_vm3, %v420_v46, %v540_v31  ;;  %v425_v60 = vshll.u32 %v7035_v33, 16  ;;  %v547_v27 = vld [vmem:[#allocation2 + $0x38] sm:$0x1]  ;;  %v255_v44 = vld [vmem:[#allocation2 + $0x48] sm:$0x1]  ;;  %v299_v46 = vld [vmem:[%s6945_s30 + $0x60] sm:$0xff] }
  0x34   : > { %v5440_v61 = vcombine.low %v652_v47, %v662_v54  ;;  %v680_v62 = vor.u32 %v679_v48, %v675_v45  ;;  %542 = vst [vmem:[#allocation2 + $0x2c] sm:$0x1] %v541_v50  ;;  %v424_v63 = vrot.slane %v422_v51, 7  ;;  %v430_v0 = vshrl.u32 %v7037_v34, 16  ;;  %v7143_v39 = vld [vmem:[%s8611_s1 + $0x18] sm:$0xff]  }
  0x35   : > { %v671_v2 = vrot.slane %v670_v57, 4  ;;  %v7119_v3 = vld [vmem:[#allocation2 + $0x24] sm:$0xf]  ;;  %v433_v7 = vshll.u32 %v7037_v34, 16  ;;  %v5971_v8 = vpack.c.bf16 %v297_v52, %v297_v52  ;;  %v7124_v10 = vpack.c.bf16 %v298_v53, %v298_v53  ;;  %v300_v53 = vld [vmem:[%s6945_s30 + $0x68] sm:$0xff] }
  0x36   : > { %v7121_v6 = vld [vmem:[#allocation2 + $0x28] sm:$0xf]  ;;  %6234 = vmatmul.mubr.bf16.vlgmr.msra.gmra.mrb[0].mxu0 %v5440_v61  ;;  %v681_v11 = vrot.slane %v680_v62, 4  ;;  %v688_v33 = vshrl.u32 %v7119_v3, 16  ;;  %v691_v12 = vshll.u32 %v7119_v3, 16  ;;  %v427_v34 = vor.u32 %v425_v60, %v424_v63 }
  0x37   : > { %v697_v13 = vshll.u32 %v7121_v6, 16  ;;  %6250 = vmatpush3.bf16.msra.mxu0 %v7047_v38  ;;  %v676_v15 = vsel %vm7079_vm11, %v671_v2, %v675_v45  ;;  %v701_v16 = vshrl.u32 %v7121_v6, 16  ;;  %v428_v19 = vrot.slane %v424_v63, 4  ;;  %v281_v45 = vld [vmem:[#allocation2 + $0x50] sm:$0x1] }
  0x38   : > { %6251 = vmatprep.subr.bf16.mxu0 %v6746_v55  ;;  %v686_v21 = vsel %vm7079_vm11, %v681_v11, %v685_v49  ;;  %v690_v23 = vrot.slane %v688_v33, 4  ;;  %v693_v26 = vrot.slane %v691_v12, 5  ;;  %v432_v30 = vrot.slane %v430_v0, 7  ;;  %v258_v54 = vld [vmem:[#allocation2 + $0x54] sm:$0x1] }
  0x39   : > { %v699_v38 = vrot.slane %v697_v13, 5  ;;  %v5441_v28 = vcombine.low %v676_v15, %v686_v21  ;;  %v703_v29 = vrot.slane %v701_v16, 4  ;;  %v544_v31 = vsel %vm6989_vm8, %v427_v34, %v543_v1  ;;  %v284_v62 = vld [vmem:[#allocation2 + $0x5c] sm:$0x1]  ;;  %v301_v15 = vld [vmem:[%s6945_s30 + $0x70] sm:$0xff]  ;;  %v6749_v16 = vld [vmem:[%s8611_s1 + $0x20] sm:$0xff]  }
  0x3a   : > { %v694_v32 = vor.u32 %v693_v26, %v690_v23  ;;  %545 = vst [vmem:[#allocation2 + $0x30] sm:$0xf] %v544_v31  ;;  %v253_v40 = vsel %vm6951_vm3, 0, %v252_v14  ;;  %v279_v41 = vsel %vm6959_vm4, 0, %v278_v20  ;;  %v439_v42 = vshrl.u32 %v5971_v8, 16  ;;  %v302_v21 = vld [vmem:[%s6945_s30 + $0x78] sm:$0xff] }
  0x3b   : > { %6252 = vmatpush3.bf16.msra.mxu0 %v6746_v55  ;;  %6237 = vmatprep.mubr.bf16.mxu0 %v5441_v28  ;;  %v7150_v47 = vld [vmem:[#allocation2 + $0x2c] sm:$0x1]  ;;  %v704_v48 = vor.u32 %v703_v29, %v699_v38  ;;  %v435_v49 = vor.u32 %v433_v7, %v432_v30  ;;  %v437_v51 = vrot.slane %v432_v30, 4  ;;  %254 = vst [vmem:[#allocation2 + $0x3c] sm:$0x1] %v253_v40  ;;  %v442_v52 = vshll.u32 %v5971_v8, 16 }
  0x3c   : > { %280 = vst [vmem:[#allocation2 + $0x44] sm:$0x1] %v279_v41  ;;  %6253 = vmatprep.subr.bf16.mxu0 %v6747_v22  ;;  %v695_v57 = vrot.slane %v694_v32, 4  ;;  %v707_v50 = vshll.u32 %v7150_v47, 16  ;;  %v441_v60 = vrot.slane %v439_v42, 7  ;;  %v447_v61 = vshrl.u32 %v7124_v10, 16 }
  0x3d   : > { %v705_v55 = vrot.slane %v704_v48, 4  ;;  %v436_v63 = vsel %vm6979_vm7, %v428_v19, %v435_v49  ;;  %v548_v0 = vsel %vm6951_vm3, %v437_v51, %v547_v27  ;;  %v450_v1 = vshll.u32 %v7124_v10, 16 }
  0x3e   : > { %v700_v2 = vsel %vm7079_vm11, %v695_v57, %v699_v38  ;;  %v709_v7 = vrot.slane %v707_v50, 5  ;;  %546 = vst [vmem:[#allocation2 + $0x34] sm:$0xf] %v436_v63  ;;  %549 = vst [vmem:[#allocation2 + $0x38] sm:$0x1] %v548_v0  ;;  %v444_v8 = vor.u32 %v442_v52, %v441_v60  ;;  %v445_v11 = vrot.slane %v441_v60, 4 }
  0x3f   : > { %6254 = vmatpush3.bf16.msra.mxu0 %v6747_v22  ;;  %v449_v33 = vrot.slane %v447_v61, 7  ;;  %v256_v12 = vsel %vm6951_vm3, 0, %v255_v44  ;;  %v282_v13 = vsel %vm6959_vm4, 0, %v281_v45  ;;  %v5973_v14 = vpack.c.bf16 %v299_v46, %v299_v46  ;;  %v6750_v52 = vld [vmem:[%s8611_s1 + $0x28] sm:$0xff]  }
  0x40   : > { %v710_v10 = vsel %vm7079_vm11, %v705_v55, %v709_v7  ;;  %6255 = vmatprep.subr.bf16.mxu0 %v7143_v39  ;;  %257 = vst [vmem:[#allocation2 + $0x48] sm:$0x1] %v256_v12  ;;  %283 = vst [vmem:[#allocation2 + $0x50] sm:$0x1] %v282_v13  ;;  %v5974_v34 = vpack.c.bf16 %v300_v53, %v300_v53  ;;  %v259_v19 = vsel %vm6951_vm3, 0, %v258_v54  ;;  %v285_v20 = vsel %vm6959_vm4, 0, %v284_v62 }
  0x41   : > { %v5442_v22 = vcombine.low %v700_v2, %v710_v10  ;;  %v7178_v23 = vld [vmem:[#allocation2 + $0x30] sm:$0xf]  ;;  %v452_v26 = vor.u32 %v450_v1, %v449_v33  ;;  %v454_v38 = vrot.slane %v449_v33, 4  ;;  %v456_v27 = vshrl.u32 %v5973_v14, 16  ;;  %260 = vst [vmem:[#allocation2 + $0x54] sm:$0x1] %v259_v19 }
  0x42   : > { %286 = vst [vmem:[#allocation2 + $0x5c] sm:$0x1] %v285_v20  ;;  %v712_v28 = vshrl.u32 %v7178_v23, 16  ;;  %v715_v29 = vshll.u32 %v7178_v23, 16  ;;  %v550_v30 = vld [vmem:[#allocation2 + $0x3c] sm:$0xf]  ;;  %v5975_v32 = vpack.c.bf16 %v301_v15, %v301_v15  ;;  %v7196_v54 = vpack.c.bf16 %v302_v21, %v302_v21 }
  0x43   : > { %v554_v31 = vld [vmem:[#allocation2 + $0x44] sm:$0x1]  ;;  %6238 = vmatmul.mubr.bf16.gmra.mrb[4].mxu0 %v5442_v22  ;;  %v453_v9 = vsel %vm6979_vm7, %v445_v11, %v452_v26  ;;  %v551_v40 = vsel %vm6989_vm8, %v444_v8, %v550_v30  ;;  %v458_v42 = vrot.slane %v456_v27, 7  ;;  %v459_v46 = vshll.u32 %v5973_v14, 16  ;;  %v6751_v13 = vld [vmem:[%s8611_s1 + $0x30] sm:$0xff]  }
  0x44   : > { %v555_v41 = vsel %vm6951_vm3, %v454_v38, %v554_v31  ;;  %6256 = vmatpush3.bf16.msra.mxu0 %v7143_v39  ;;  %v714_v44 = vrot.slane %v712_v28, 4  ;;  %v717_v45 = vrot.slane %v715_v29, 5  ;;  %552 = vst [vmem:[#allocation2 + $0x3c] sm:$0xf] %v551_v40  ;;  %553 = vst [vmem:[#allocation2 + $0x40] sm:$0xf] %v453_v9 }
  0x45   : > { %556 = vst [vmem:[#allocation2 + $0x44] sm:$0x1] %v555_v41  ;;  %v464_v48 = vshrl.u32 %v5974_v34, 16  ;;  %v7189_v49 = vld [vmem:[#allocation2 + $0x34] sm:$0xf]  ;;  %6257 = vmatprep.subr.bf16.mxu0 %v6749_v16  ;;  %v467_v53 = vshll.u32 %v5974_v34, 16  ;;  %v461_v61 = vor.u32 %v459_v46, %v458_v42 }
  0x46   : > { %v7191_v51 = vld [vmem:[#allocation2 + $0x38] sm:$0x1]  ;;  %v718_v39 = vor.u32 %v717_v45, %v714_v44  ;;  %v721_v57 = vshll.u32 %v7189_v49, 16  ;;  %v725_v50 = vshrl.u32 %v7189_v49, 16  ;;  %v462_v62 = vrot.slane %v458_v42, 4 }
  0x47   : > { %v731_v60 = vshll.u32 %v7191_v51, 16  ;;  %v466_v55 = vrot.slane %v464_v48, 7  ;;  %v557_v63 = vld [vmem:[#allocation2 + $0x48] sm:$0xf]  ;;  %v473_v0 = vshrl.u32 %v5975_v32, 16  ;;  %v476_v34 = vshll.u32 %v5975_v32, 16 }
  0x48   : > { %v719_v1 = vrot.slane %v718_v39, 4  ;;  %v723_v2 = vrot.slane %v721_v57, 5  ;;  %v727_v7 = vrot.slane %v725_v50, 4  ;;  %6258 = vmatpush3.bf16.msra.mxu0 %v6749_v16  ;;  %v561_v8 = vld [vmem:[#allocation2 + $0x50] sm:$0x1]  ;;  %v558_v12 = vsel %vm6989_vm8, %v461_v61, %v557_v63  ;;  %v6752_v41 = vld [vmem:[%s8611_s1 + $0x38] sm:$0xff]  }
  0x49   : > { %6259 = vmatprep.subr.bf16.mxu0 %v6750_v52  ;;  %v469_v11 = vor.u32 %v467_v53, %v466_v55  ;;  %v471_v33 = vrot.slane %v466_v55, 4  ;;  %v7206_v14 = vrot.slane %v473_v0, 7  ;;  %v733_v10 = vrot.slane %v731_v60, 5  ;;  %559 = vst [vmem:[#allocation2 + $0x48] sm:$0xf] %v558_v12 }
  0x4a   : > { %v728_v15 = vor.u32 %v727_v7, %v723_v2  ;;  %v481_v19 = vshrl.u32 %v7196_v54, 16  ;;  %v724_v16 = vsel %vm7079_vm11, %v719_v1, %v723_v2  ;;  %v564_v40 = vld [vmem:[#allocation2 + $0x54] sm:$0xf]  ;;  %v484_v57 = vshll.u32 %v7196_v54, 16  ;;  %v568_v60 = vld [vmem:[#allocation2 + $0x5c] sm:$0x1] }
  0x4b   : > { %v7211_v20 = vld [vmem:[#allocation2 + $0x3c] sm:$0xf]  ;;  %v7213_v21 = vld [vmem:[#allocation2 + $0x40] sm:$0xf]  ;;  %v470_v26 = vsel %vm6979_vm7, %v462_v62, %v469_v11  ;;  %v562_v38 = vsel %vm6951_vm3, %v471_v33, %v561_v8  ;;  %v478_v9 = vor.u32 %v476_v34, %v7206_v14  ;;  %v479_v63 = vrot.slane %v7206_v14, 4 }
  0x4c   : > { %v7215_v22 = vld [vmem:[#allocation2 + $0x44] sm:$0x1]  ;;  %v729_v27 = vrot.slane %v728_v15, 4  ;;  %v736_v28 = vshrl.u32 %v7211_v20, 16  ;;  %v739_v29 = vshll.u32 %v7211_v20, 16  ;;  %v745_v30 = vshll.u32 %v7213_v21, 16  ;;  %6260 = vmatpush3.bf16.msra.mxu0 %v6750_v52 }
  0x4d   : > { %560 = vst [vmem:[#allocation2 + $0x4c] sm:$0xf] %v470_v26  ;;  %563 = vst [vmem:[#allocation2 + $0x50] sm:$0x1] %v562_v38  ;;  %v749_v31 = vshrl.u32 %v7213_v21, 16  ;;  %v755_v32 = vshll.u32 %v7215_v22, 16  ;;  %6261 = vmatprep.subr.bf16.mxu0 %v6751_v13  ;;  %v565_v50 = vsel %vm6989_vm8, %v478_v9, %v564_v40 }
  0x4e   : > { %v734_v42 = vsel %vm7079_vm11, %v729_v27, %v733_v10  ;;  %v738_v44 = vrot.slane %v736_v28, 4  ;;  %v741_v45 = vrot.slane %v739_v29, 5  ;;  %v747_v46 = vrot.slane %v745_v30, 5  ;;  %566 = vst [vmem:[#allocation2 + $0x54] sm:$0xf] %v565_v50  ;;  %v7241_v1 = vld [vmem:[%s8611_s1 + $0x80] sm:$0xff]  }
  0x4f   : > { %v5443_v48 = vcombine.low %v724_v16, %v734_v42  ;;  %v751_v52 = vrot.slane %v749_v31, 4  ;;  %v483_v53 = vrot.slane %v481_v19, 7  ;;  %v757_v62 = vrot.slane %v755_v32, 5 }
  0x50   : > { %v742_v39 = vor.u32 %v741_v45, %v738_v44  ;;  %6262 = vmatpush3.bf16.msra.mxu0 %v6751_v13  ;;  %v7235_v55 = vld [vmem:[#allocation2 + $0x48] sm:$0xf] }
  0x51   : > { %6241 = vmatprep.mubr.bf16.mxu0 %v5443_v48  ;;  %v752_v61 = vor.u32 %v751_v52, %v747_v46  ;;  %v488_v0 = vrot.slane %v483_v53, 4  ;;  %6263 = vmatprep.subr.bf16.mxu0 %v6752_v41  ;;  %v760_v2 = vshrl.u32 %v7235_v55, 16  ;;  %v763_v7 = vshll.u32 %v7235_v55, 16 }
  0x52   : > { %v743_v54 = vrot.slane %v742_v39, 4  ;;  %v486_v8 = vor.u32 %v484_v57, %v483_v53 }
  0x53   : > { %v753_v11 = vrot.slane %v752_v61, 4  ;;  %v569_v13 = vsel %vm6951_vm3, %v488_v0, %v568_v60  ;;  %v762_v15 = vrot.slane %v760_v2, 4  ;;  %v765_v10 = vrot.slane %v763_v7, 5 }
  0x54   : > { %v7245_v33 = vld [vmem:[#allocation2 + $0x4c] sm:$0xf]  ;;  %v7247_v12 = vld [vmem:[#allocation2 + $0x50] sm:$0x1]  ;;  %v748_v14 = vsel %vm7079_vm11, %v743_v54, %v747_v46  ;;  %570 = vst [vmem:[#allocation2 + $0x5c] sm:$0x1] %v569_v13  ;;  %6264 = vmatpush3.bf16.msra.mxu0 %v6752_v41  ;;  %v487_v38 = vsel %vm6979_vm7, %v479_v63, %v486_v8 }
  0x55   : > { %v769_v34 = vshll.u32 %v7245_v33, 16  ;;  %v758_v19 = vsel %vm7079_vm11, %v753_v11, %v757_v62  ;;  %v773_v16 = vshrl.u32 %v7245_v33, 16  ;;  %v779_v26 = vshll.u32 %v7247_v12, 16  ;;  %6281 = vmatprep.subr.bf16.mxu0 %v7241_v1  ;;  %567 = vst [vmem:[#allocation2 + $0x58] sm:$0xf] %v487_v38 }
  0x56   : > { %v5444_v27 = vcombine.low %v748_v14, %v758_v19  ;;  %v766_v28 = vor.u32 %v765_v10, %v762_v15  ;;  %v7261_v32 = vld [vmem:[#allocation2 + $0x54] sm:$0xf]  ;;  %v7276_v63 = vld [vmem:[#allocation2] sm:$0xe]  ;;  %v1223_v7 = vrot.slane %v7042_v37, 5  ;;  %v1230_v15 = vrot.slane %v7068_v58, 5 }
  0x57   : > { %v771_v29 = vrot.slane %v769_v34, 5  ;;  %v775_v30 = vrot.slane %v773_v16, 4  ;;  %v781_v40 = vrot.slane %v779_v26, 5  ;;  %v784_v41 = vshrl.u32 %v7261_v32, 16  ;;  %v7279_v8 = vld [vmem:[#allocation2 + $0xc] sm:$0xe] }
  0x58   : > { %6242 = vmatmul.mubr.bf16.gmra.mrb[8].mxu0 %v5444_v27  ;;  %v767_v31 = vrot.slane %v766_v28, 4  ;;  %v787_v42 = vshll.u32 %v7261_v32, 16  ;;  %v7281_v11 = vld [vmem:[#allocation2 + $0x18] sm:$0xe]  ;;  %v7284_v10 = vld [vmem:[#allocation2 + $0x24] sm:$0xe] }
  0x59   : > { %v776_v9 = vor.u32 %v775_v30, %v771_v29  ;;  %v786_v48 = vrot.slane %v784_v41, 4  ;;  %v5471_v34 = vrot.slane %v7276_v63, 9  ;;  %v1225_v26 = vrot.slane %v1223_v7, 4 }
  0x5a   : > { %v772_v44 = vsel %vm7079_vm11, %v767_v31, %v771_v29  ;;  %v789_v52 = vrot.slane %v787_v42, 5  ;;  %v1237_v38 = vrot.slane %v7087_v18, 5  ;;  %v1226_v27 = vrot.slane %v7056_v43, 5 }
  0x5b   : > { %v777_v45 = vrot.slane %v776_v9, 4  ;;  %v7267_v46 = vld [vmem:[#allocation2 + $0x5c] sm:$0x1]  ;;  %v5472_v28 = vrot.slane %v7279_v8, 9  ;;  %v1233_v29 = vrot.slane %v7070_v59, 5  ;;  %v5473_v30 = vrot.slane %v7281_v11, 9 }
  0x5c   : > { %v7271_v39 = vld [vmem:[#allocation2 + $0x58] sm:$0xf]  ;;  %v790_v57 = vor.u32 %v789_v52, %v786_v48  ;;  %v803_v62 = vshll.u32 %v7267_v46, 16  ;;  %v5455_v9 = vcombine.low %v7040_v36, %v7042_v37  ;;  %v1244_v41 = vrot.slane %v7121_v6, 5 }
  0x5d   : > { %v782_v53 = vsel %vm7079_vm11, %v777_v45, %v781_v40  ;;  %v793_v60 = vshll.u32 %v7271_v39, 16  ;;  %v797_v61 = vshrl.u32 %v7271_v39, 16  ;;  %v1232_v40 = vrot.slane %v1230_v15, 4 }
  0x5e   : > { %v5445_v50 = vcombine.low %v772_v44, %v782_v53  ;;  %v791_v0 = vrot.slane %v790_v57, 4  ;;  %v805_v14 = vrot.slane %v803_v62, 5  ;;  %v1240_v43 = vrot.slane %v7097_v25, 5  ;;  %v6756_v25 = vld [vmem:[%s8611_s1 + $0x88] sm:$0xff]   ;;  %v6760_v53 = vld [vmem:[%s8611_s1 + $0x98] sm:$0xff]   ;;  %v6858_v57 = vld [vmem:[%s8613_s3 + $0x160] sm:$0xff]  }
  0x5f   : > { %v795_v54 = vrot.slane %v793_v60, 5  ;;  %v799_v2 = vrot.slane %v797_v61, 4  ;;  %v5474_v44 = vrot.slane %v7284_v10, 9  ;;  %v1239_v59 = vrot.slane %v1237_v38, 4 }
  0x60   : > { %6245 = vmatprep.mubr.bf16.mxu0 %v5445_v50  ;;  %v1247_v45 = vrot.slane %v7150_v47, 5  ;;  %v1246_v36 = vrot.slane %v1244_v41, 4  ;;  %v1251_v37 = vrot.slane %v7189_v49, 5  ;;  %v5456_v48 = vcombine.low %v7065_v56, %v7068_v58  ;;  %v6758_v47 = vld [vmem:[%s8611_s1 + $0x90] sm:$0xff]  }
  0x61   : > { %v800_v13 = vor.u32 %v799_v2, %v795_v54  ;;  %v796_v19 = vsel %vm7079_vm11, %v791_v0, %v795_v54  ;;  %v5457_v52 = vcombine.low %v7085_v17, %v7087_v18  ;;  %v5458_v56 = vcombine.low %v7119_v3, %v7121_v6  ;;  %v6766_v50 = vld [vmem:[%s8611_s1 + $0xb0] sm:$0xff]   ;;  %v1200_v6 = vld [vmem:[#allocation2 + $0x48] sm:$0xe] }
  0x62   : > { %v5459_v17 = vcombine.low %v7178_v23, %v7189_v49  ;;  %v5460_v3 = vcombine.low %v7211_v20, %v7213_v21  ;;  %v6764_v23 = vld [vmem:[%s8611_s1 + $0xa8] sm:$0xff]   ;;  %v5461_v49 = vcombine.low %v7235_v55, %v7245_v33  ;;  %v1224_v20 = vsel %vm7327_vm14, %v5471_v34, %v1223_v7  ;;  %v6768_v55 = vld [vmem:[%s8611_s1 + $0xb8] sm:$0xff]   ;;  %v1198_v54 = vld [vmem:[#allocation2 + $0x30] sm:$0xe] }
  0x63   : > { %v801_v16 = vrot.slane %v800_v13, 4  ;;  %v1227_v60 = vsel %vm7327_vm14, %v1225_v26, %v1226_v27  ;;  %v5462_v61 = vcombine.low %v7261_v32, %v7271_v39  ;;  %v1231_v63 = vsel %vm7327_vm14, %v5472_v28, %v1230_v15 }
  0x64   : > { %v5495_v62 = vcombine.low %v1224_v20, %v1227_v60  ;;  %v1234_v0 = vsel %vm7327_vm14, %v1232_v40, %v1233_v29  ;;  %v1238_v32 = vsel %vm7327_vm14, %v5473_v30, %v1237_v38  ;;  %v1241_v2 = vsel %vm7327_vm14, %v1239_v59, %v1240_v43 }
  0x65   : > { %v806_v31 = vsel %vm7079_vm11, %v801_v16, %v805_v14  ;;  %v5496_v7 = vcombine.low %v1231_v63, %v1234_v0  ;;  %v5497_v8 = vcombine.low %v1238_v32, %v1241_v2  ;;  %v5475_v58 = vrot.slane %v1198_v54, 9 }
  0x66   : > { %v5446_v42 = vcombine.low %v796_v19, %v806_v31  ;;  %v1253_v11 = vrot.slane %v1251_v37, 4  ;;  %v1254_v13 = vrot.slane %v7191_v51, 5  ;;  %v1245_v18 = vsel %vm7327_vm14, %v5474_v44, %v1244_v41  ;;  %v1199_v19 = vld [vmem:[#allocation2 + $0x3c] sm:$0xe]  ;;  %v1201_v41 = vld [vmem:[#allocation2 + $0x54] sm:$0xe] }
  0x67   : > { %v1248_v14 = vsel %vm7327_vm14, %v1246_v36, %v1247_v45  ;;  %v1258_v15 = vrot.slane %v7213_v21, 5  ;;  %v1252_v34 = vsel %vm7327_vm14, %v5475_v58, %v1251_v37  ;;  %v1265_v16 = vrot.slane %v7245_v33, 5  ;;  %v6769_v37 = vld [vmem:[%s8613_s3 + $0x40] sm:$0xff]  }
  0x68   : > { %6246 = vmatmul.mubr.bf16.gmra.mrb[12].mxu0 %v5446_v42  ;;  %v1255_v51 = vsel %vm7327_vm14, %v1253_v11, %v1254_v13  ;;  %v5498_v26 = vcombine.low %v1245_v18, %v1248_v14  ;;  %v5476_v38 = vrot.slane %v1199_v19, 9  ;;  %v1261_v28 = vrot.slane %v7215_v22, 5  ;;  %6313 = vmatprep.subr.bf16.mxu1 %v6769_v37 }
  0x69   : > { %6265 = vmatprep.mubr.bf16.mxu0 %v5455_v9  ;;  %v5499_v10 = vcombine.low %v1252_v34, %v1255_v51  ;;  %v1260_v27 = vrot.slane %v1258_v15, 4  ;;  %v5477_v29 = vrot.slane %v1200_v6, 9  ;;  %v1267_v30 = vrot.slane %v1265_v16, 4  ;;  %6314 = vmatpush3.bf16.msra.mxu1 %v6769_v37  ;;  %v1755_v6 = vld [vmem:[#allocation2 + $0xc] sm:$0xf] }
  0x6a   : > { %v1268_v21 = vrot.slane %v7247_v12, 5  ;;  %v1259_v31 = vsel %vm7327_vm14, %v5476_v38, %v1258_v15  ;;  %v1272_v33 = vrot.slane %v7271_v39, 5  ;;  %v5478_v12 = vrot.slane %v1201_v41, 9 }
  0x6b   : > { %v1262_v9 = vsel %vm7327_vm14, %v1260_v27, %v1261_v28  ;;  %v1266_v40 = vsel %vm7327_vm14, %v5477_v29, %v1265_v16  ;;  %v1275_v59 = vrot.slane %v7267_v46, 5  ;;  %v6770_v46 = vld [vmem:[%s8613_s3 + $0x48] sm:$0xff]  }
  0x6c   : > { %v1269_v22 = vsel %vm7327_vm14, %v1267_v30, %v1268_v21  ;;  %v5500_v42 = vcombine.low %v1259_v31, %v1262_v9  ;;  %v1274_v44 = vrot.slane %v1272_v33, 4  ;;  %v1273_v45 = vsel %vm7327_vm14, %v5478_v12, %v1272_v33  ;;  %6315 = vmatprep.subr.bf16.mxu1 %v6770_v46 }
  0x6d   : > { %v5501_v43 = vcombine.low %v1266_v40, %v1269_v22  ;;  %6316 = vmatpush3.bf16.msra.mxu1 %v6770_v46  ;;  %v1759_v22 = vld [vmem:[#allocation2 + $0x14] sm:$0x1] }
  0x6e   : > { %v1276_v39 = vsel %vm7327_vm14, %v1274_v44, %v1275_v59  ;;  %v1752_v59 = vld [vmem:[#allocation2 + $0x8] sm:$0x1] }
  0x6f   : > { %v5502_v36 = vcombine.low %v1273_v45, %v1276_v39  ;;  %v6865_v39 = vld [vmem:[#allocation2] sm:$0xf] }
  0x70   : > { %6266 = vmatmul.mubr.bf16.vlgmr.msra.gmra.mrb[0].mxu0 %v5456_v48  ;;  %v6771_v48 = vld [vmem:[%s8613_s3 + $0x50] sm:$0xff]  }
  0x71   : > { %6282 = vmatpush3.bf16.msra.mxu0 %v7241_v1  ;;  %6269 = vmatprep.mubr.bf16.mxu0 %v5457_v52  ;;  %v6762_v1 = vld [vmem:[%s8611_s1 + $0xa0] sm:$0xff]  }
  0x72   : > { %6283 = vmatprep.subr.bf16.mxu0 %v6756_v25  ;;  %6317 = vmatprep.subr.bf16.mxu1 %v6771_v48  ;;  %v6773_v52 = vld [vmem:[%s8613_s3 + $0x60] sm:$0xff]  }
  0x73   : > { %6318 = vmatpush3.bf16.msra.mxu1 %v6771_v48 }
  0x75   : > { %6284 = vmatpush3.bf16.msra.mxu0 %v6756_v25  ;;  %v6772_v25 = vld [vmem:[%s8613_s3 + $0x58] sm:$0xff]  }
  0x76   : > { %6285 = vmatprep.subr.bf16.mxu0 %v6758_v47  ;;  %6319 = vmatprep.subr.bf16.mxu1 %v6772_v25 }
  0x77   : > { %6320 = vmatpush3.bf16.msra.mxu1 %v6772_v25 }
  0x78   : > { %6270 = vmatmul.mubr.bf16.gmra.mrb[4].mxu0 %v5458_v56  ;;  %6321 = vmatprep.subr.bf16.mxu1 %v6773_v52  ;;  %v6775_v56 = vld [vmem:[%s8613_s3 + $0x70] sm:$0xff]  }
  0x79   : > { %6286 = vmatpush3.bf16.msra.mxu0 %v6758_v47  ;;  %6273 = vmatprep.mubr.bf16.mxu0 %v5459_v17  ;;  %v6774_v47 = vld [vmem:[%s8613_s3 + $0x68] sm:$0xff]   ;;  %v7423_v17 = vld [vmem:[%s8613_s3] sm:$0xff]  }
  0x7a   : > { %6287 = vmatprep.subr.bf16.mxu0 %v6760_v53 }
  0x7b   : > { %6322 = vmatpush3.bf16.msra.mxu1 %v6773_v52 }
  0x7c   : > { %6323 = vmatprep.subr.bf16.mxu1 %v6774_v47 }
  0x7d   : > { %6288 = vmatpush3.bf16.msra.mxu0 %v6760_v53  ;;  %v6776_v53 = vld [vmem:[%s8613_s3 + $0x78] sm:$0xff]  }
  0x7e   : > { %6289 = vmatprep.subr.bf16.mxu0 %v6762_v1 }
  0x7f   : > { %6324 = vmatpush3.bf16.msra.mxu1 %v6774_v47 }
  0x80   : > { %6274 = vmatmul.mubr.bf16.gmra.mrb[8].mxu0 %v5460_v3  ;;  %6325 = vmatprep.subr.bf16.mxu1 %v6775_v56 }
  0x81   : > { %6290 = vmatpush3.bf16.msra.mxu0 %v6762_v1  ;;  %6277 = vmatprep.mubr.bf16.mxu0 %v5461_v49  ;;  %v7429_v1 = vld [vmem:[%s8612_s2] ss:$0 sm:$0xff] }
  0x82   : > { %6291 = vmatprep.subr.bf16.mxu0 %v6764_v23 }
  0x83   : > { %6326 = vmatpush3.bf16.msra.mxu1 %v6775_v56 }
  0x84   : > { %6327 = vmatprep.subr.bf16.mxu1 %v6776_v53 }
  0x85   : > { %6292 = vmatpush3.bf16.msra.mxu0 %v6764_v23 }
  0x86   : > { %6293 = vmatprep.subr.bf16.mxu0 %v6766_v50 }
  0x87   : > { %6328 = vmatpush3.bf16.msra.mxu1 %v6776_v53 }
  0x88   : > { %6278 = vmatmul.mubr.bf16.gmra.mrb[12].mxu0 %v5462_v61  ;;  %6345 = vmatprep.subr.bf16.mxu1 %v7423_v17 }
  0x89   : > { %6294 = vmatpush3.bf16.msra.mxu0 %v6766_v50  ;;  %6297 = vmatprep.mubr.bf16.mxu0 %v5495_v62 }
  0x8a   : > { %6295 = vmatprep.subr.bf16.mxu0 %v6768_v55 }
  0x8d   : > { %6296 = vmatpush3.bf16.msra.mxu0 %v6768_v55 }
  0x90   : > { %6298 = vmatmul.mubr.bf16.vlgmr.msra.gmra.mrb[0].mxu0 %v5496_v7 }
  0x91   : > { %6301 = vmatprep.mubr.bf16.mxu0 %v5497_v8 }
  0x98   : > { %6302 = vmatmul.mubr.bf16.gmra.mrb[4].mxu0 %v5498_v26 }
  0x99   : > { %6305 = vmatprep.mubr.bf16.mxu0 %v5499_v10 }
  0xa0   : > { %6306 = vmatmul.mubr.bf16.gmra.mrb[8].mxu0 %v5500_v42 }
  0xa1   : > { %6309 = vmatprep.mubr.bf16.mxu0 %v5501_v43 }
  0xa8   : > { %6310 = vmatmul.mubr.bf16.gmra.mrb[12].mxu0 %v5502_v36 }
 0x163   : > { %v6299_v3 = vpop.f32.mrb[0].mxu0 }
 0x164   : > { %v1495_v23 = vadd.f32 %v6299_v3, %v7429_v1  ;;  %v1408_v49 = vpop.f32.mrb[1].mxu0 }
 0x165   : > { %v1493_v50 = vadd.f32 %v7429_v1, %v1408_v49  ;;  %v6300_v20 = vpop.f32.mrb[2].mxu0 }
 0x166   : > { %v5514_v60 = vclamps-f32 %v1495_v23, 1.0  ;;  %v1496_v61 = vadd.f32 %v6300_v20, %v7429_v1  ;;  %v1411_v55 = vpop.f32.mrb[3].mxu0 }
 0x167   : > { %v5512_v62 = vclamps-f32 %v1493_v50, 1.0  ;;  %v1494_v63 = vadd.f32 %v7429_v1, %v1411_v55 }
 0x168   : > { %v5979_v0 = vpack.c.bf16 %v5514_v60, %v5514_v60  ;;  %v5515_v54 = vclamps-f32 %v1496_v61, 1.0 }
 0x169   : > { %v5977_v32 = vpack.c.bf16 %v5512_v62, %v5512_v62  ;;  %v5513_v2 = vclamps-f32 %v1494_v63, 1.0  ;;  %v1769_v62 = vld [vmem:[#allocation2 + $0x24] sm:$0xf] }
 0x16a   : > { %v1607_v7 = vshrl.u32 %v5979_v0, 16  ;;  %v5980_v8 = vpack.c.bf16 %v5515_v54, %v5515_v54  ;;  %v1610_v58 = vshll.u32 %v5979_v0, 16 }
 0x16b   : > { %v1590_v11 = vshrl.u32 %v5977_v32, 16  ;;  %v1593_v13 = vshll.u32 %v5977_v32, 16  ;;  %v5978_v18 = vpack.c.bf16 %v5513_v2, %v5513_v2  ;;  %v6303_v14 = vpop.f32.mrb[4].mxu0 }
 0x16c   : > { %v1609_v15 = vrot.slane %v1607_v7, 7  ;;  %v1615_v34 = vshrl.u32 %v5980_v8, 16  ;;  %v1618_v51 = vshll.u32 %v5980_v8, 16  ;;  %v1499_v19 = vadd.f32 %v6303_v14, %v7429_v1  ;;  %v1424_v16 = vpop.f32.mrb[5].mxu0  ;;  %v1762_v8 = vld [vmem:[#allocation2 + $0x18] sm:$0xf] }
 0x16d   : > { %v1592_v26 = vrot.slane %v1590_v11, 7  ;;  %v1598_v10 = vshrl.u32 %v5978_v18, 16  ;;  %v1601_v38 = vshll.u32 %v5978_v18, 16  ;;  %v1497_v27 = vadd.f32 %v7429_v1, %v1424_v16  ;;  %v6304_v28 = vpop.f32.mrb[6].mxu0 }
 0x16e   : > { %v1612_v29 = vor.u32 %v1610_v58, %v1609_v15  ;;  %v1613_v30 = vrot.slane %v1609_v15, 4  ;;  %v1617_v21 = vrot.slane %v1615_v34, 7  ;;  %v5518_v31 = vclamps-f32 %v1499_v19, 1.0  ;;  %v1427_v9 = vpop.f32.mrb[7].mxu0 }
 0x16f   : > { %v1595_v33 = vor.u32 %v1593_v13, %v1592_v26  ;;  %v1596_v40 = vrot.slane %v1592_v26, 4  ;;  %v1600_v41 = vrot.slane %v1598_v10, 7  ;;  %v5516_v42 = vclamps-f32 %v1497_v27, 1.0 }
 0x170   : > { %v1756_v43 = vsel %vm6989_vm8, %v1612_v29, %v1755_v6  ;;  %v1620_v12 = vor.u32 %v1618_v51, %v1617_v21  ;;  %v1622_v44 = vrot.slane %v1617_v21, 4  ;;  %v5983_v45 = vpack.c.bf16 %v5518_v31, %v5518_v31  ;;  %v1773_v31 = vld [vmem:[#allocation2 + $0x2c] sm:$0x1] }
 0x171   : > { %1757 = vst [vmem:[#allocation2 + $0xc] sm:$0xf] %v1756_v43  ;;  %v1749_v36 = vsel %vm6989_vm8, %v1595_v33, %v6865_v39  ;;  %v1603_v37 = vor.u32 %v1601_v38, %v1600_v41  ;;  %v1605_v46 = vrot.slane %v1600_v41, 4  ;;  %v5981_v48 = vpack.c.bf16 %v5516_v42, %v5516_v42 }
 0x172   : > { %1750 = vst [vmem:[#allocation2] sm:$0xf] %v1749_v36  ;;  %v1621_v25 = vsel %vm6979_vm7, %v1613_v30, %v1620_v12  ;;  %v1760_v52 = vsel %vm6951_vm3, %v1622_v44, %v1759_v22  ;;  %v1641_v47 = vshrl.u32 %v5983_v45, 16  ;;  %v1644_v3 = vshll.u32 %v5983_v45, 16  ;;  %v1783_v36 = vld [vmem:[#allocation2 + $0x3c] sm:$0xf] }
 0x173   : > { %1758 = vst [vmem:[#allocation2 + $0x10] sm:$0xf] %v1621_v25  ;;  %1761 = vst [vmem:[#allocation2 + $0x14] sm:$0x1] %v1760_v52  ;;  %v1604_v56 = vsel %vm6979_vm7, %v1596_v40, %v1603_v37  ;;  %v1753_v53 = vsel %vm6951_vm3, %v1605_v46, %v1752_v59  ;;  %v1624_v23 = vshrl.u32 %v5981_v48, 16  ;;  %v6307_v49 = vpop.f32.mrb[8].mxu0  ;;  %v1500_v20 = vadd.f32 %v6304_v28, %v7429_v1 }
 0x174   : > { %1751 = vst [vmem:[#allocation2 + $0x4] sm:$0xf] %v1604_v56  ;;  %1754 = vst [vmem:[#allocation2 + $0x8] sm:$0x1] %v1753_v53  ;;  %v7449_v50 = vrot.slane %v1641_v47, 7  ;;  %v1498_v60 = vadd.f32 %v7429_v1, %v1427_v9  ;;  %v1503_v61 = vadd.f32 %v6307_v49, %v7429_v1  ;;  %v1440_v55 = vpop.f32.mrb[9].mxu0 }
 0x175   : > { %v1626_v63 = vrot.slane %v1624_v23, 7  ;;  %v1627_v0 = vshll.u32 %v5981_v48, 16  ;;  %v1501_v54 = vadd.f32 %v7429_v1, %v1440_v55  ;;  %v6308_v32 = vpop.f32.mrb[10].mxu0  ;;  %v5519_v58 = vclamps-f32 %v1500_v20, 1.0  ;;  %v1766_v9 = vld [vmem:[#allocation2 + $0x20] sm:$0x1] }
 0x176   : > { %v1646_v2 = vor.u32 %v1644_v3, %v7449_v50  ;;  %v1647_v7 = vrot.slane %v7449_v50, 4  ;;  %v5517_v11 = vclamps-f32 %v1498_v60, 1.0  ;;  %v1443_v13 = vpop.f32.mrb[11].mxu0  ;;  %v5522_v15 = vclamps-f32 %v1503_v61, 1.0  ;;  %v1776_v3 = vld [vmem:[#allocation2 + $0x30] sm:$0xf] }
 0x177   : > { %v1629_v18 = vor.u32 %v1627_v0, %v1626_v63  ;;  %v1630_v14 = vrot.slane %v1626_v63, 4  ;;  %v5520_v34 = vclamps-f32 %v1501_v54, 1.0  ;;  %v5984_v19 = vpack.c.bf16 %v5519_v58, %v5519_v58 }
 0x178   : > { %v1770_v51 = vsel %vm6989_vm8, %v1646_v2, %v1769_v62  ;;  %v5982_v16 = vpack.c.bf16 %v5517_v11, %v5517_v11  ;;  %v1504_v6 = vadd.f32 %v6308_v32, %v7429_v1  ;;  %v5987_v10 = vpack.c.bf16 %v5522_v15, %v5522_v15 }
 0x179   : > { %1771 = vst [vmem:[#allocation2 + $0x24] sm:$0xf] %v1770_v51  ;;  %v1763_v26 = vsel %vm6989_vm8, %v1629_v18, %v1762_v8  ;;  %v5985_v38 = vpack.c.bf16 %v5520_v34, %v5520_v34  ;;  %v1502_v27 = vadd.f32 %v7429_v1, %v1443_v13  ;;  %v1649_v28 = vshrl.u32 %v5984_v19, 16  ;;  %v7487_v13 = vld [vmem:[#allocation2] sm:$0xf] }
 0x17a   : > { %1764 = vst [vmem:[#allocation2 + $0x18] sm:$0xf] %v1763_v26  ;;  %v1652_v29 = vshll.u32 %v5984_v19, 16  ;;  %v1632_v30 = vshrl.u32 %v5982_v16, 16  ;;  %v1635_v21 = vshll.u32 %v5982_v16, 16  ;;  %v1675_v33 = vshrl.u32 %v5987_v10, 16 }
 0x17b   : > { %v1678_v40 = vshll.u32 %v5987_v10, 16  ;;  %v1658_v22 = vshrl.u32 %v5985_v38, 16  ;;  %v1661_v41 = vshll.u32 %v5985_v38, 16  ;;  %v6311_v42 = vpop.f32.mrb[12].mxu0  ;;  %v1651_v43 = vrot.slane %v1649_v28, 7 }
 0x17c   : > { %v1634_v12 = vrot.slane %v1632_v30, 7  ;;  %v5523_v44 = vclamps-f32 %v1504_v6, 1.0  ;;  %v5521_v59 = vclamps-f32 %v1502_v27, 1.0  ;;  %v1456_v45 = vpop.f32.mrb[13].mxu0  ;;  %v7463_v39 = vrot.slane %v1675_v33, 7 }
 0x17d   : > { %v7465_v37 = vrot.slane %v1658_v22, 7  ;;  %v1507_v46 = vadd.f32 %v6311_v42, %v7429_v1  ;;  %v1505_v48 = vadd.f32 %v7429_v1, %v1456_v45  ;;  %v6312_v25 = vpop.f32.mrb[14].mxu0  ;;  %v1654_v52 = vor.u32 %v1652_v29, %v1651_v43  ;;  %v1787_v10 = vld [vmem:[#allocation2 + $0x44] sm:$0x1]  ;;  %v1780_v29 = vld [vmem:[#allocation2 + $0x38] sm:$0x1] }
 0x17e   : > { %v1656_v47 = vrot.slane %v1651_v43, 4  ;;  %v1637_v56 = vor.u32 %v1635_v21, %v1634_v12  ;;  %v1639_v53 = vrot.slane %v1634_v12, 4  ;;  %v1459_v23 = vpop.f32.mrb[15].mxu0  ;;  %v1680_v49 = vor.u32 %v1678_v40, %v7463_v39 }
 0x17f   : > { %v1681_v50 = vrot.slane %v7463_v39, 4  ;;  %v1663_v20 = vor.u32 %v1661_v41, %v7465_v37  ;;  %v1664_v60 = vrot.slane %v7465_v37, 4  ;;  %v1655_v61 = vsel %vm6979_vm7, %v1647_v7, %v1654_v52  ;;  %v1790_v37 = vld [vmem:[#allocation2 + $0x48] sm:$0xf] }
 0x180   : > { %v1774_v55 = vsel %vm6951_vm3, %v1656_v47, %v1773_v31  ;;  %v1638_v62 = vsel %vm6979_vm7, %v1630_v14, %v1637_v56  ;;  %v1767_v63 = vsel %vm6951_vm3, %v1639_v53, %v1766_v9  ;;  %1772 = vst [vmem:[#allocation2 + $0x28] sm:$0xf] %v1655_v61  ;;  %v1784_v0 = vsel %vm6989_vm8, %v1680_v49, %v1783_v36  ;;  %v1797_v36 = vld [vmem:[#allocation2 + $0x54] sm:$0xf]  ;;  %v7499_v47 = vld [vmem:[#allocation2 + $0x4] sm:$0xf] }
 0x181   : > { %1775 = vst [vmem:[#allocation2 + $0x2c] sm:$0x1] %v1774_v55  ;;  %1765 = vst [vmem:[#allocation2 + $0x1c] sm:$0xf] %v1638_v62  ;;  %v1777_v54 = vsel %vm6989_vm8, %v1663_v20, %v1776_v3  ;;  %v5988_v32 = vpack.c.bf16 %v5523_v44, %v5523_v44  ;;  %v5986_v2 = vpack.c.bf16 %v5521_v59, %v5521_v59  ;;  %v5526_v7 = vclamps-f32 %v1507_v46, 1.0 }
 0x182   : > { %1768 = vst [vmem:[#allocation2 + $0x20] sm:$0x1] %v1767_v63  ;;  %1785 = vst [vmem:[#allocation2 + $0x3c] sm:$0xf] %v1784_v0  ;;  %v5524_v8 = vclamps-f32 %v1505_v48, 1.0  ;;  %v1508_v58 = vadd.f32 %v6312_v25, %v7429_v1  ;;  %v1506_v11 = vadd.f32 %v7429_v1, %v1459_v23  ;;  %v1846_v27 = vshrl.u32 %v7487_v13, 16 }
 0x183   : > { %1778 = vst [vmem:[#allocation2 + $0x30] sm:$0xf] %v1777_v54  ;;  %v1683_v18 = vshrl.u32 %v5988_v32, 16  ;;  %v1686_v14 = vshll.u32 %v5988_v32, 16  ;;  %v1666_v15 = vshrl.u32 %v5986_v2, 16  ;;  %v1669_v34 = vshll.u32 %v5986_v2, 16 }
 0x184   : > { %v5991_v51 = vpack.c.bf16 %v5526_v7, %v5526_v7  ;;  %v5989_v19 = vpack.c.bf16 %v5524_v8, %v5524_v8  ;;  %v5527_v16 = vclamps-f32 %v1508_v58, 1.0  ;;  %v5525_v6 = vclamps-f32 %v1506_v11, 1.0  ;;  %v7501_v56 = vld [vmem:[#allocation2 + $0xc] sm:$0xf]  ;;  %v1801_v63 = vld [vmem:[#allocation2 + $0x5c] sm:$0x1] }
 0x185   : > { %v1685_v26 = vrot.slane %v1683_v18, 7  ;;  %v1668_v38 = vrot.slane %v1666_v15, 7  ;;  %v1849_v28 = vshll.u32 %v7487_v13, 16  ;;  %v1848_v61 = vrot.slane %v1846_v27, 4  ;;  %v1794_v2 = vld [vmem:[#allocation2 + $0x50] sm:$0x1] }
 0x186   : > { %v1709_v30 = vshrl.u32 %v5991_v51, 16  ;;  %v1712_v1 = vshll.u32 %v5991_v51, 16  ;;  %v1692_v21 = vshrl.u32 %v5989_v19, 16  ;;  %v1695_v31 = vshll.u32 %v5989_v19, 16  ;;  %v7514_v51 = vld [vmem:[#allocation2 + $0x10] sm:$0xf] }
 0x187   : > { %v1688_v9 = vor.u32 %v1686_v14, %v1685_v26  ;;  %v1690_v33 = vrot.slane %v1685_v26, 4  ;;  %v1671_v40 = vor.u32 %v1669_v34, %v1668_v38  ;;  %v1673_v22 = vrot.slane %v1668_v38, 4  ;;  %v7516_v19 = vld [vmem:[#allocation2 + $0x14] sm:$0x1]  ;;  %v7518_v38 = vld [vmem:[#allocation2 + $0x18] sm:$0xf] }
 0x188   : > { %v1711_v41 = vrot.slane %v1709_v30, 7  ;;  %v1694_v42 = vrot.slane %v1692_v21, 7  ;;  %v5992_v43 = vpack.c.bf16 %v5527_v16, %v5527_v16  ;;  %v5990_v12 = vpack.c.bf16 %v5525_v6, %v5525_v6 }
 0x189   : > { %v1689_v44 = vsel %vm6979_vm7, %v1681_v50, %v1688_v9  ;;  %v1788_v59 = vsel %vm6951_vm3, %v1690_v33, %v1787_v10  ;;  %v1672_v45 = vsel %vm6979_vm7, %v1664_v60, %v1671_v40  ;;  %v1781_v39 = vsel %vm6951_vm3, %v1673_v22, %v1780_v29  ;;  %v7503_v50 = vld [vmem:[#allocation2 + $0x8] sm:$0x1] }
 0x18a   : > { %1786 = vst [vmem:[#allocation2 + $0x40] sm:$0xf] %v1689_v44  ;;  %1789 = vst [vmem:[#allocation2 + $0x44] sm:$0x1] %v1788_v59  ;;  %v1714_v46 = vor.u32 %v1712_v1, %v1711_v41  ;;  %v1715_v48 = vrot.slane %v1711_v41, 4  ;;  %v1697_v25 = vor.u32 %v1695_v31, %v1694_v42  ;;  %v1698_v52 = vrot.slane %v1694_v42, 4 }
 0x18b   : > { %1779 = vst [vmem:[#allocation2 + $0x34] sm:$0xf] %v1672_v45  ;;  %1782 = vst [vmem:[#allocation2 + $0x38] sm:$0x1] %v1781_v39  ;;  %v1717_v53 = vshrl.u32 %v5992_v43, 16  ;;  %v1720_v3 = vshll.u32 %v5992_v43, 16 }
 0x18c   : > { %v1700_v23 = vshrl.u32 %v5990_v12, 16  ;;  %v1703_v49 = vshll.u32 %v5990_v12, 16  ;;  %v1798_v20 = vsel %vm6989_vm8, %v1714_v46, %v1797_v36  ;;  %v1791_v60 = vsel %vm6989_vm8, %v1697_v25, %v1790_v37  ;;  %v7528_v1 = vld [vmem:[#allocation2 + $0x1c] sm:$0xf]  ;;  %v7536_v44 = vld [vmem:[#allocation2 + $0x20] sm:$0x1] }
 0x18d   : > { %v1851_v55 = vrot.slane %v1849_v28, 5  ;;  %1799 = vst [vmem:[#allocation2 + $0x54] sm:$0xf] %v1798_v20  ;;  %1792 = vst [vmem:[#allocation2 + $0x48] sm:$0xf] %v1791_v60  ;;  %v1719_v62 = vrot.slane %v1717_v53, 7 }
 0x18e   : > { %v1702_v0 = vrot.slane %v1700_v23, 7  ;;  %v1855_v54 = vshll.u32 %v7499_v47, 16  ;;  %v1859_v32 = vshrl.u32 %v7499_v47, 16  ;;  %v1865_v8 = vshll.u32 %v7503_v50, 16  ;;  %v7544_v23 = vld [vmem:[#allocation2 + $0x28] sm:$0xf] }
 0x18f   : > { %v1852_v7 = vor.u32 %v1851_v55, %v1848_v61  ;;  %v1870_v58 = vshrl.u32 %v7501_v56, 16  ;;  %v1873_v11 = vshll.u32 %v7501_v56, 16  ;;  %v1722_v18 = vor.u32 %v1720_v3, %v1719_v62 }
 0x190   : > { %v1724_v14 = vrot.slane %v1719_v62, 4  ;;  %v1705_v15 = vor.u32 %v1703_v49, %v1702_v0  ;;  %v1707_v34 = vrot.slane %v1702_v0, 4  ;;  %v1857_v6 = vrot.slane %v1855_v54, 5 }
 0x191   : > { %v1853_v16 = vrot.slane %v1852_v7, 4  ;;  %v1861_v26 = vrot.slane %v1859_v32, 4  ;;  %v1867_v10 = vrot.slane %v1865_v8, 5  ;;  %v1723_v27 = vsel %vm6979_vm7, %v1715_v48, %v1722_v18  ;;  %v7540_v48 = vld [vmem:[#allocation2 + $0x24] sm:$0xf] }
 0x192   : > { %v1802_v28 = vsel %vm6951_vm3, %v1724_v14, %v1801_v63  ;;  %v1706_v29 = vsel %vm6979_vm7, %v1698_v52, %v1705_v15  ;;  %v1795_v30 = vsel %vm6951_vm3, %v1707_v34, %v1794_v2  ;;  %1800 = vst [vmem:[#allocation2 + $0x58] sm:$0xf] %v1723_v27  ;;  %v1872_v9 = vrot.slane %v1870_v58, 4  ;;  %v7550_v63 = vld [vmem:[#allocation2 + $0x2c] sm:$0x1] }
 0x193   : > { %1803 = vst [vmem:[#allocation2 + $0x5c] sm:$0x1] %v1802_v28  ;;  %1793 = vst [vmem:[#allocation2 + $0x4c] sm:$0xf] %v1706_v29  ;;  %v1858_v21 = vsel %vm7079_vm11, %v1853_v16, %v1857_v6  ;;  %v1862_v31 = vor.u32 %v1861_v26, %v1857_v6  ;;  %v1875_v33 = vrot.slane %v1873_v11, 5  ;;  %v1879_v40 = vshll.u32 %v7514_v51, 16 }
 0x194   : > { %1796 = vst [vmem:[#allocation2 + $0x50] sm:$0x1] %v1795_v30  ;;  %v1883_v22 = vshrl.u32 %v7514_v51, 16  ;;  %v1889_v41 = vshll.u32 %v7516_v19, 16  ;;  %v1894_v42 = vshrl.u32 %v7518_v38, 16  ;;  %v1897_v59 = vshll.u32 %v7518_v38, 16 }
 0x195   : > { %v1863_v43 = vrot.slane %v1862_v31, 4  ;;  %v1876_v12 = vor.u32 %v1875_v33, %v1872_v9  ;;  %v1903_v45 = vshll.u32 %v7528_v1, 16  ;;  %v1881_v39 = vrot.slane %v1879_v40, 5  ;;  %v7556_v15 = vld [vmem:[#allocation2 + $0x30] sm:$0xf]  ;;  %v6778_v28 = vld [vmem:[%s8613_s3 + $0x8] sm:$0xff]  }
 0x196   : > { %v1885_v36 = vrot.slane %v1883_v22, 4  ;;  %v1891_v37 = vrot.slane %v1889_v41, 5  ;;  %v1896_v46 = vrot.slane %v1894_v42, 4  ;;  %v1899_v53 = vrot.slane %v1897_v59, 5  ;;  %v7568_v31 = vld [vmem:[#allocation2 + $0x38] sm:$0x1] }
 0x197   : > { %v1868_v25 = vsel %vm7079_vm11, %v1863_v43, %v1867_v10  ;;  %v1877_v52 = vrot.slane %v1876_v12, 4  ;;  %v1905_v3 = vrot.slane %v1903_v45, 5  ;;  %v1907_v60 = vshrl.u32 %v7528_v1, 16  ;;  %v7561_v10 = vld [vmem:[#allocation2 + $0x34] sm:$0xf] }
 0x198   : > { %v5560_v49 = vcombine.low %v1858_v21, %v1868_v25  ;;  %v1886_v20 = vor.u32 %v1885_v36, %v1881_v39  ;;  %v1913_v61 = vshll.u32 %v7536_v44, 16  ;;  %v1900_v62 = vor.u32 %v1899_v53, %v1896_v46  ;;  %v7574_v59 = vld [vmem:[#allocation2 + $0x3c] sm:$0xf]  ;;  %v7580_v46 = vld [vmem:[#allocation2 + $0x40] sm:$0xf] }
 0x199   : > { %v1882_v55 = vsel %vm7079_vm11, %v1877_v52, %v1881_v39  ;;  %v1918_v0 = vshrl.u32 %v7540_v48, 16  ;;  %v1921_v54 = vshll.u32 %v7540_v48, 16  ;;  %v1909_v2 = vrot.slane %v1907_v60, 4  ;;  %v6779_v52 = vld [vmem:[%s8613_s3 + $0x10] sm:$0xff]  }
 0x19a   : > { %6329 = vmatprep.mubr.bf16.mxu1 %v5560_v49  ;;  %v1887_v32 = vrot.slane %v1886_v20, 4  ;;  %v1915_v7 = vrot.slane %v1913_v61, 5  ;;  %v1927_v8 = vshll.u32 %v7544_v23, 16  ;;  %v1901_v58 = vrot.slane %v1900_v62, 4  ;;  %v7587_v61 = vld [vmem:[#allocation2 + $0x44] sm:$0x1] }
 0x19b   : > { %v1920_v11 = vrot.slane %v1918_v0, 4  ;;  %v1923_v18 = vrot.slane %v1921_v54, 5  ;;  %v1931_v14 = vshrl.u32 %v7544_v23, 16  ;;  %v1910_v16 = vor.u32 %v1909_v2, %v1905_v3  ;;  %v7595_v2 = vld [vmem:[#allocation2 + $0x48] sm:$0xf] }
 0x19c   : > { %v1892_v34 = vsel %vm7079_vm11, %v1887_v32, %v1891_v37  ;;  %v1929_v6 = vrot.slane %v1927_v8, 5  ;;  %v1937_v26 = vshll.u32 %v7550_v63, 16  ;;  %v1906_v29 = vsel %vm7079_vm11, %v1901_v58, %v1905_v3 }
 0x19d   : > { %v5561_v27 = vcombine.low %v1882_v55, %v1892_v34  ;;  %v1924_v30 = vor.u32 %v1923_v18, %v1920_v11  ;;  %v1933_v21 = vrot.slane %v1931_v14, 4  ;;  %v1911_v9 = vrot.slane %v1910_v16, 4  ;;  %v7597_v18 = vld [vmem:[#allocation2 + $0x4c] sm:$0xf]  ;;  %v6780_v14 = vld [vmem:[%s8613_s3 + $0x18] sm:$0xff]  }
 0x19e   : > { %v1939_v33 = vrot.slane %v1937_v26, 5  ;;  %v1942_v40 = vshrl.u32 %v7556_v15, 16  ;;  %v1945_v22 = vshll.u32 %v7556_v15, 16  ;;  %v1951_v43 = vshll.u32 %v7561_v10, 16 }
 0x19f   : > { %6330 = vmatmul.mubr.bf16.vlgmr.msra.gmra.mrb[0].mxu1 %v5561_v27  ;;  %v1925_v41 = vrot.slane %v1924_v30, 4  ;;  %v1934_v42 = vor.u32 %v1933_v21, %v1929_v6  ;;  %v1955_v12 = vshrl.u32 %v7561_v10, 16  ;;  %v1916_v45 = vsel %vm7079_vm11, %v1911_v9, %v1915_v7 }
 0x1a0   : > { %6346 = vmatpush3.bf16.msra.mxu1 %v7423_v17  ;;  %v1944_v39 = vrot.slane %v1942_v40, 4  ;;  %v1947_v36 = vrot.slane %v1945_v22, 5  ;;  %v1961_v37 = vshll.u32 %v7568_v31, 16  ;;  %v5562_v25 = vcombine.low %v1906_v29, %v1916_v45  ;;  %v7607_v40 = vld [vmem:[#allocation2 + $0x50] sm:$0x1] }
 0x1a1   : > { %6347 = vmatprep.subr.bf16.mxu1 %v6778_v28  ;;  %v1930_v53 = vsel %vm7079_vm11, %v1925_v41, %v1929_v6  ;;  %v1935_v3 = vrot.slane %v1934_v42, 4  ;;  %v1953_v17 = vrot.slane %v1951_v43, 5  ;;  %v1957_v20 = vrot.slane %v1955_v12, 4  ;;  %v7610_v41 = vld [vmem:[#allocation2 + $0x54] sm:$0xf] }
 0x1a2   : > { %v1948_v49 = vor.u32 %v1947_v36, %v1944_v39  ;;  %v1963_v60 = vrot.slane %v1961_v37, 5  ;;  %v1966_v55 = vshrl.u32 %v7574_v59, 16  ;;  %6333 = vmatprep.mubr.bf16.mxu1 %v5562_v25  ;;  %v1969_v0 = vshll.u32 %v7574_v59, 16  ;;  %v7615_v39 = vld [vmem:[#allocation2 + $0x58] sm:$0xf]  ;;  %v6781_v37 = vld [vmem:[%s8613_s3 + $0x20] sm:$0xff]  }
 0x1a3   : > { %v1940_v62 = vsel %vm7079_vm11, %v1935_v3, %v1939_v33  ;;  %v1975_v54 = vshll.u32 %v7580_v46, 16  ;;  %v1979_v32 = vshrl.u32 %v7580_v46, 16  ;;  %v1958_v58 = vor.u32 %v1957_v20, %v1953_v17 }
 0x1a4   : > { %6348 = vmatpush3.bf16.msra.mxu1 %v6778_v28  ;;  %v5563_v7 = vcombine.low %v1930_v53, %v1940_v62  ;;  %v1949_v8 = vrot.slane %v1948_v49, 4  ;;  %v1968_v11 = vrot.slane %v1966_v55, 4  ;;  %v1971_v34 = vrot.slane %v1969_v0, 5 }
 0x1a5   : > { %6349 = vmatprep.subr.bf16.mxu1 %v6779_v52  ;;  %v1977_v16 = vrot.slane %v1975_v54, 5  ;;  %v1981_v6 = vrot.slane %v1979_v32, 4  ;;  %v1985_v26 = vshll.u32 %v7587_v61, 16  ;;  %v1959_v28 = vrot.slane %v1958_v58, 4  ;;  %v6782_v58 = vld [vmem:[%s8613_s3 + $0x28] sm:$0xff]  }
 0x1a6   : > { %v1954_v27 = vsel %vm7079_vm11, %v1949_v8, %v1953_v17  ;;  %v1990_v29 = vshrl.u32 %v7595_v2, 16  ;;  %v1993_v30 = vshll.u32 %v7595_v2, 16  ;;  %v1972_v21 = vor.u32 %v1971_v34, %v1968_v11  ;;  %v7628_v8 = vld [vmem:[#allocation2 + $0x5c] sm:$0x1] }
 0x1a7   : > { %6334 = vmatmul.mubr.bf16.gmra.mrb[4].mxu1 %v5563_v7  ;;  %v1982_v9 = vor.u32 %v1981_v6, %v1977_v16  ;;  %v1987_v33 = vrot.slane %v1985_v26, 5  ;;  %v1999_v22 = vshll.u32 %v7597_v18, 16  ;;  %v1964_v42 = vsel %vm7079_vm11, %v1959_v28, %v1963_v60 }
 0x1a8   : > { %6350 = vmatpush3.bf16.msra.mxu1 %v6779_v52  ;;  %v1992_v43 = vrot.slane %v1990_v29, 4  ;;  %v1995_v12 = vrot.slane %v1993_v30, 5  ;;  %v2003_v45 = vshrl.u32 %v7597_v18, 16  ;;  %v5564_v36 = vcombine.low %v1954_v27, %v1964_v42 }
 0x1a9   : > { %6351 = vmatprep.subr.bf16.mxu1 %v6780_v14  ;;  %v1973_v25 = vrot.slane %v1972_v21, 4  ;;  %v1983_v53 = vrot.slane %v1982_v9, 4  ;;  %v2001_v3 = vrot.slane %v1999_v22, 5  ;;  %v2009_v49 = vshll.u32 %v7607_v40, 16 }
 0x1aa   : > { %v1996_v17 = vor.u32 %v1995_v12, %v1992_v43  ;;  %v2005_v52 = vrot.slane %v2003_v45, 4  ;;  %v2014_v20 = vshrl.u32 %v7610_v41, 16  ;;  %6337 = vmatprep.mubr.bf16.mxu1 %v5564_v36  ;;  %v2017_v62 = vshll.u32 %v7610_v41, 16 }
 0x1ab   : > { %v1978_v60 = vsel %vm7079_vm11, %v1973_v25, %v1977_v16  ;;  %v1988_v55 = vsel %vm7079_vm11, %v1983_v53, %v1987_v33  ;;  %v2023_v0 = vshll.u32 %v7615_v39, 16  ;;  %v2027_v6 = vshrl.u32 %v7615_v39, 16  ;;  %v6783_v33 = vld [vmem:[%s8613_s3 + $0x30] sm:$0xff]   ;;  %v6785_v25 = vld [vmem:[%s8613_s3 + $0x38] sm:$0xff]  }
 0x1ac   : > { %6352 = vmatpush3.bf16.msra.mxu1 %v6780_v14  ;;  %v5565_v54 = vcombine.low %v1978_v60, %v1988_v55  ;;  %v1997_v32 = vrot.slane %v1996_v17, 4  ;;  %v2006_v7 = vor.u32 %v2005_v52, %v2001_v3  ;;  %v2016_v11 = vrot.slane %v2014_v20, 4  ;;  %v6789_v52 = vld [vmem:[%s8613_s3 + $0x88] sm:$0xff]   ;;  %v6790_v20 = vld [vmem:[%s8613_s3 + $0x90] sm:$0xff]   ;;  %v6793_v60 = vld [vmem:[%s8613_s3 + $0x98] sm:$0xff]  }
 0x1ad   : > { %6353 = vmatprep.subr.bf16.mxu1 %v6781_v37  ;;  %v2019_v34 = vrot.slane %v2017_v62, 5  ;;  %v2025_v16 = vrot.slane %v2023_v0, 5  ;;  %v2011_v27 = vrot.slane %v2009_v49, 5  ;;  %v2029_v14 = vrot.slane %v2027_v6, 4  ;;  %v6794_v55 = vld [vmem:[%s8613_s3 + $0xa0] sm:$0xff]   ;;  %v6797_v0 = vld [vmem:[%s8613_s3 + $0xa8] sm:$0xff]  }
 0x1ae   : > { %v2007_v26 = vrot.slane %v2006_v7, 4  ;;  %v2033_v29 = vshll.u32 %v7628_v8, 16  ;;  %v2002_v30 = vsel %vm7079_vm11, %v1997_v32, %v2001_v3  ;;  %v5576_v53 = vcombine.low %v7487_v13, %v7499_v47  ;;  %v6786_v3 = vld [vmem:[%s8613_s3 + $0x80] sm:$0xff]  }
 0x1af   : > { %6338 = vmatmul.mubr.bf16.gmra.mrb[8].mxu1 %v5565_v54  ;;  %v2020_v28 = vor.u32 %v2019_v34, %v2016_v11  ;;  %v2030_v42 = vor.u32 %v2029_v14, %v2025_v16  ;;  %v5577_v17 = vcombine.low %v7501_v56, %v7514_v51  ;;  %v5578_v49 = vcombine.low %v7518_v38, %v7528_v1  ;;  %v2424_v32 = vld [vmem:[#allocation2] sm:$0xe] }
 0x1b0   : > { %6354 = vmatpush3.bf16.msra.mxu1 %v6781_v37  ;;  %v2012_v21 = vsel %vm7079_vm11, %v2007_v26, %v2011_v27  ;;  %v2035_v12 = vrot.slane %v2033_v29, 5  ;;  %v5579_v56 = vcombine.low %v7540_v48, %v7544_v23  ;;  %v5580_v38 = vcombine.low %v7556_v15, %v7561_v10  ;;  %v2425_v26 = vld [vmem:[#allocation2 + $0xc] sm:$0xe] }
 0x1b1   : > { %6355 = vmatprep.subr.bf16.mxu1 %v6782_v58  ;;  %v5566_v9 = vcombine.low %v2002_v30, %v2012_v21  ;;  %v2021_v22 = vrot.slane %v2020_v28, 4  ;;  %v2031_v43 = vrot.slane %v2030_v42, 4  ;;  %v2450_v62 = vrot.slane %v7499_v47, 5  ;;  %v6798_v47 = vld [vmem:[%s8613_s3 + $0xb0] sm:$0xff]   ;;  %v2426_v28 = vld [vmem:[#allocation2 + $0x18] sm:$0xe] }
 0x1b2   : > { %v5581_v48 = vcombine.low %v7574_v59, %v7580_v46  ;;  %v5582_v15 = vcombine.low %v7595_v2, %v7597_v18  ;;  %v2453_v7 = vrot.slane %v7503_v50, 5  ;;  %v2457_v59 = vrot.slane %v7514_v51, 5  ;;  %v6800_v50 = vld [vmem:[%s8613_s3 + $0xb8] sm:$0xff]  }
 0x1b3   : > { %6341 = vmatprep.mubr.bf16.mxu1 %v5566_v9  ;;  %v2026_v45 = vsel %vm7079_vm11, %v2021_v22, %v2025_v16  ;;  %v2036_v36 = vsel %vm7079_vm11, %v2031_v43, %v2035_v12  ;;  %v2452_v54 = vrot.slane %v2450_v62, 4  ;;  %v2464_v2 = vrot.slane %v7528_v1, 5  ;;  %v2427_v12 = vld [vmem:[#allocation2 + $0x24] sm:$0xe] }
 0x1b4   : > { %6356 = vmatpush3.bf16.msra.mxu1 %v6782_v58  ;;  %v5567_v37 = vcombine.low %v2026_v45, %v2036_v36  ;;  %v5592_v58 = vrot.slane %v2424_v32, 9  ;;  %v5583_v34 = vcombine.low %v7610_v41, %v7615_v39  ;;  %v2459_v51 = vrot.slane %v2457_v59, 4  ;;  %v2428_v36 = vld [vmem:[#allocation2 + $0x30] sm:$0xe] }
 0x1b5   : > { %6357 = vmatprep.subr.bf16.mxu1 %v6783_v33  ;;  %v2454_v11 = vsel %vm7327_vm14, %v2452_v54, %v2453_v7  ;;  %v2466_v27 = vrot.slane %v2464_v2, 4  ;;  %v2460_v1 = vrot.slane %v7516_v19, 5  ;;  %v2467_v41 = vrot.slane %v7536_v44, 5 }
 0x1b6   : > { %v2451_v16 = vsel %vm7327_vm14, %v5592_v58, %v2450_v62  ;;  %v5593_v14 = vrot.slane %v2425_v26, 9  ;;  %v2471_v30 = vrot.slane %v7544_v23, 5  ;;  %v5594_v21 = vrot.slane %v2426_v28, 9  ;;  %v6806_v26 = vld [vmem:[%s8611_s1 + $0x128] sm:$0xff]   ;;  %v7764_v28 = vld [vmem:[%s8611_s1 + $0xc0] sm:$0xff]  }
 0x1b7   : > { %6342 = vmatmul.mubr.bf16.gmra.mrb[12].mxu1 %v5567_v37  ;;  %v5616_v6 = vcombine.low %v2451_v16, %v2454_v11  ;;  %v2461_v29 = vsel %vm7327_vm14, %v2459_v51, %v2460_v1  ;;  %v2468_v9 = vsel %vm7327_vm14, %v2466_v27, %v2467_v41  ;;  %v2474_v23 = vrot.slane %v7550_v63, 5  ;;  %v6801_v16 = vld [vmem:[%s8611_s1 + $0x100] sm:$0xff]   ;;  %v6807_v27 = vld [vmem:[%s8611_s1 + $0x130] sm:$0xff]   ;;  %v6808_v1 = vld [vmem:[%s8611_s1 + $0x138] sm:$0xff]  }
 0x1b8   : > { %6358 = vmatpush3.bf16.msra.mxu1 %v6783_v33  ;;  %6361 = vmatprep.mubr.bf16.mxu1 %v5576_v53  ;;  %v2478_v33 = vrot.slane %v7561_v10, 5  ;;  %v2458_v19 = vsel %vm7327_vm14, %v5593_v14, %v2457_v59  ;;  %v2465_v44 = vsel %vm7327_vm14, %v5594_v21, %v2464_v2  ;;  %v2473_v43 = vrot.slane %v2471_v30, 4  ;;  %v6805_v51 = vld [vmem:[%s8611_s1 + $0x120] sm:$0xff]  }
 0x1b9   : > { %6359 = vmatprep.subr.bf16.mxu1 %v6785_v25  ;;  %v5617_v22 = vcombine.low %v2458_v19, %v2461_v29  ;;  %v5618_v42 = vcombine.low %v2465_v44, %v2468_v9  ;;  %v2481_v37 = vrot.slane %v7568_v31, 5  ;;  %v5595_v10 = vrot.slane %v2427_v12, 9  ;;  %6409 = vmatprep.subr.bf16.mxu0 %v6801_v16  ;;  %v7770_v41 = vld [vmem:[%s8614_s4] ss:$0 sm:$0xff] }
 0x1ba   : > { %v2480_v45 = vrot.slane %v2478_v33, 4  ;;  %v2485_v53 = vrot.slane %v7580_v46, 5  ;;  %v2488_v46 = vrot.slane %v7587_v61, 5  ;;  %v2495_v62 = vrot.slane %v7607_v40, 5  ;;  %v2431_v40 = vld [vmem:[#allocation2 + $0x54] sm:$0xe]  ;;  %6410 = vmatpush3.bf16.msra.mxu0 %v6801_v16 }
 0x1bb   : > { %v2502_v58 = vrot.slane %v7628_v8, 5  ;;  %v5599_v11 = vrot.slane %v2431_v40, 9  ;;  %v6803_v8 = vld [vmem:[%s8611_s1 + $0x110] sm:$0xff]   ;;  %v6871_v16 = vld [vmem:[%s6945_s30 + $0x20] sm:$0xff] }
 0x1bc   : > { %6360 = vmatpush3.bf16.msra.mxu1 %v6785_v25  ;;  %v2475_v25 = vsel %vm7327_vm14, %v2473_v43, %v2474_v23  ;;  %v6866_v43 = vld [vmem:[%s6945_s30 + $0x10] sm:$0xff]  ;;  %v6867_v23 = vld [vmem:[%s6945_s30] sm:$0xff] }
 0x1bd   : > { %6377 = vmatprep.subr.bf16.mxu1 %v6786_v3 }
 0x1bf   : > { %6362 = vmatmul.mubr.bf16.vlgmr.msra.gmra.mrb[0].mxu1 %v5577_v17  ;;  %v2482_v17 = vsel %vm7327_vm14, %v2480_v45, %v2481_v37 }
 0x1c0   : > { %6378 = vmatpush3.bf16.msra.mxu1 %v6786_v3  ;;  %6365 = vmatprep.mubr.bf16.mxu1 %v5578_v49  ;;  %v5596_v3 = vrot.slane %v2428_v36, 9  ;;  %v2472_v49 = vsel %vm7327_vm14, %v5595_v10, %v2471_v30 }
 0x1c1   : > { %6379 = vmatprep.subr.bf16.mxu1 %v6789_v52 }
 0x1c2   : > { %v2479_v63 = vsel %vm7327_vm14, %v5596_v3, %v2478_v33 }
 0x1c3   : > { %v5620_v31 = vcombine.low %v2479_v63, %v2482_v17  ;;  %v6869_v17 = vld [vmem:[%s6945_s30 + $0x8] sm:$0xff] }
 0x1c4   : > { %6380 = vmatpush3.bf16.msra.mxu1 %v6789_v52  ;;  %v2492_v52 = vrot.slane %v7597_v18, 5 }
 0x1c5   : > { %6381 = vmatprep.subr.bf16.mxu1 %v6790_v20 }
 0x1c7   : > { %6366 = vmatmul.mubr.bf16.gmra.mrb[4].mxu1 %v5579_v56  ;;  %v2487_v56 = vrot.slane %v2485_v53, 4 }
 0x1c8   : > { %6382 = vmatpush3.bf16.msra.mxu1 %v6790_v20  ;;  %6369 = vmatprep.mubr.bf16.mxu1 %v5580_v38  ;;  %v5619_v20 = vcombine.low %v2472_v49, %v2475_v25  ;;  %v2494_v38 = vrot.slane %v2492_v52, 4  ;;  %v6868_v25 = vld [vmem:[%s6945_s30 + $0x18] sm:$0xff] }
 0x1c9   : > { %6383 = vmatprep.subr.bf16.mxu1 %v6793_v60  ;;  %v2489_v18 = vsel %vm7327_vm14, %v2487_v56, %v2488_v46 }
 0x1ca   : > { %v2496_v54 = vsel %vm7327_vm14, %v2494_v38, %v2495_v62 }
 0x1cc   : > { %6384 = vmatpush3.bf16.msra.mxu1 %v6793_v60  ;;  %v2429_v60 = vld [vmem:[#allocation2 + $0x3c] sm:$0xe] }
 0x1cd   : > { %6385 = vmatprep.subr.bf16.mxu1 %v6794_v55 }
 0x1cf   : > { %6370 = vmatmul.mubr.bf16.gmra.mrb[8].mxu1 %v5581_v48  ;;  %v5597_v48 = vrot.slane %v2429_v60, 9 }
 0x1d0   : > { %6386 = vmatpush3.bf16.msra.mxu1 %v6794_v55  ;;  %6373 = vmatprep.mubr.bf16.mxu1 %v5582_v15  ;;  %v2430_v55 = vld [vmem:[#allocation2 + $0x48] sm:$0xe] }
 0x1d1   : > { %6387 = vmatprep.subr.bf16.mxu1 %v6797_v0  ;;  %v5598_v15 = vrot.slane %v2430_v55, 9  ;;  %v2486_v32 = vsel %vm7327_vm14, %v5597_v48, %v2485_v53 }
 0x1d3   : > { %v2493_v61 = vsel %vm7327_vm14, %v5598_v15, %v2492_v52 }
 0x1d4   : > { %6388 = vmatpush3.bf16.msra.mxu1 %v6797_v0  ;;  %v2499_v0 = vrot.slane %v7615_v39, 5  ;;  %v5622_v7 = vcombine.low %v2493_v61, %v2496_v54 }
 0x1d5   : > { %6389 = vmatprep.subr.bf16.mxu1 %v6798_v47 }
 0x1d6   : > { %v2501_v59 = vrot.slane %v2499_v0, 4  ;;  %v2500_v2 = vsel %vm7327_vm14, %v5599_v11, %v2499_v0 }
 0x1d7   : > { %6374 = vmatmul.mubr.bf16.gmra.mrb[12].mxu1 %v5583_v34 }
 0x1d8   : > { %6390 = vmatpush3.bf16.msra.mxu1 %v6798_v47  ;;  %6393 = vmatprep.mubr.bf16.mxu1 %v5616_v6  ;;  %v5621_v47 = vcombine.low %v2486_v32, %v2489_v18  ;;  %v2503_v39 = vsel %vm7327_vm14, %v2501_v59, %v2502_v58  ;;  %v6804_v6 = vld [vmem:[%s8611_s1 + $0x118] sm:$0xff]   ;;  %v6870_v58 = vld [vmem:[%s6945_s30 + $0x30] sm:$0xff] }
 0x1d9   : > { %6391 = vmatprep.subr.bf16.mxu1 %v6800_v50  ;;  %v5623_v34 = vcombine.low %v2500_v2, %v2503_v39 }
 0x1dc   : > { %6392 = vmatpush3.bf16.msra.mxu1 %v6800_v50  ;;  %v6802_v50 = vld [vmem:[%s8611_s1 + $0x108] sm:$0xff]  }
 0x1dd   : > { %6411 = vmatprep.subr.bf16.mxu0 %v6802_v50 }
 0x1de   : > { %6412 = vmatpush3.bf16.msra.mxu0 %v6802_v50 }
 0x1df   : > { %6394 = vmatmul.mubr.bf16.vlgmr.msra.gmra.mrb[0].mxu1 %v5617_v22  ;;  %6413 = vmatprep.subr.bf16.mxu0 %v6803_v8 }
 0x1e0   : > { %6397 = vmatprep.mubr.bf16.mxu1 %v5618_v42 }
 0x1e2   : > { %6414 = vmatpush3.bf16.msra.mxu0 %v6803_v8 }
 0x1e3   : > { %6415 = vmatprep.subr.bf16.mxu0 %v6804_v6 }
 0x1e6   : > { %6416 = vmatpush3.bf16.msra.mxu0 %v6804_v6 }
 0x1e7   : > { %6398 = vmatmul.mubr.bf16.gmra.mrb[4].mxu1 %v5619_v20  ;;  %6417 = vmatprep.subr.bf16.mxu0 %v6805_v51 }
 0x1e8   : > { %6401 = vmatprep.mubr.bf16.mxu1 %v5620_v31 }
 0x1ea   : > { %6418 = vmatpush3.bf16.msra.mxu0 %v6805_v51 }
 0x1eb   : > { %6419 = vmatprep.subr.bf16.mxu0 %v6806_v26 }
 0x1ee   : > { %6420 = vmatpush3.bf16.msra.mxu0 %v6806_v26 }
 0x1ef   : > { %6402 = vmatmul.mubr.bf16.gmra.mrb[8].mxu1 %v5621_v47  ;;  %6421 = vmatprep.subr.bf16.mxu0 %v6807_v27 }
 0x1f0   : > { %6405 = vmatprep.mubr.bf16.mxu1 %v5622_v7 }
 0x1f2   : > { %6422 = vmatpush3.bf16.msra.mxu0 %v6807_v27  ;;  %v3030_v27 = vld [vmem:[#allocation2 + $0xc] sm:$0xf] }
 0x1f3   : > { %6423 = vmatprep.subr.bf16.mxu0 %v6808_v1 }
 0x1f6   : > { %6424 = vmatpush3.bf16.msra.mxu0 %v6808_v1 }
 0x1f7   : > { %6406 = vmatmul.mubr.bf16.gmra.mrb[12].mxu1 %v5623_v34  ;;  %6441 = vmatprep.subr.bf16.mxu0 %v7764_v28 }
 0x2b2   : > { %v6395_v14 = vpop.f32.mrb[0].mxu1 }
 0x2b3   : > { %v2722_v29 = vadd.f32 %v6395_v14, %v7770_v41  ;;  %v2635_v30 = vpop.f32.mrb[1].mxu1 }
 0x2b4   : > { %v2720_v21 = vadd.f32 %v7770_v41, %v2635_v30  ;;  %v6396_v9 = vpop.f32.mrb[2].mxu1 }
 0x2b5   : > { %v5635_v33 = vclamps-f32 %v2722_v29, 1.0  ;;  %v2723_v19 = vadd.f32 %v6396_v9, %v7770_v41  ;;  %v2638_v22 = vpop.f32.mrb[3].mxu1 }
 0x2b6   : > { %v5633_v44 = vclamps-f32 %v2720_v21, 1.0  ;;  %v2721_v42 = vadd.f32 %v7770_v41, %v2638_v22 }
 0x2b7   : > { %v2770_v12 = vadd.f32 %v6866_v43, %v5635_v33  ;;  %v5636_v45 = vclamps-f32 %v2723_v19, 1.0  ;;  %v3034_v43 = vld [vmem:[#allocation2 + $0x14] sm:$0x1] }
 0x2b8   : > { %v2768_v36 = vadd.f32 %v6867_v23, %v5633_v44  ;;  %v5634_v37 = vclamps-f32 %v2721_v42, 1.0 }
 0x2b9   : > { %v7778_v10 = vclamps-f32 %v2770_v12, 1.0  ;;  %v2771_v53 = vadd.f32 %v6868_v25, %v5636_v45 }
 0x2ba   : > { %v7781_v3 = vclamps-f32 %v2768_v36, 1.0  ;;  %v2769_v52 = vadd.f32 %v6869_v17, %v5634_v37  ;;  %v6399_v49 = vpop.f32.mrb[4].mxu1 }
 0x2bb   : > { %v5995_v20 = vpack.c.bf16 %v7778_v10, %v7778_v10  ;;  %v7786_v63 = vclamps-f32 %v2771_v53, 1.0  ;;  %v2726_v31 = vadd.f32 %v6399_v49, %v7770_v41  ;;  %v2651_v56 = vpop.f32.mrb[5].mxu1  ;;  %v3027_v53 = vld [vmem:[#allocation2 + $0x8] sm:$0x1] }
 0x2bc   : > { %v5993_v60 = vpack.c.bf16 %v7781_v3, %v7781_v3  ;;  %v7791_v38 = vclamps-f32 %v2769_v52, 1.0  ;;  %v2724_v46 = vadd.f32 %v7770_v41, %v2651_v56  ;;  %v6400_v55 = vpop.f32.mrb[6].mxu1 }
 0x2bd   : > { %v2882_v62 = vshrl.u32 %v5995_v20, 16  ;;  %v2885_v48 = vshll.u32 %v5995_v20, 16  ;;  %v5996_v18 = vpack.c.bf16 %v7786_v63, %v7786_v63  ;;  %v5639_v0 = vclamps-f32 %v2726_v31, 1.0  ;;  %v2654_v15 = vpop.f32.mrb[7].mxu1 }
 0x2be   : > { %v2865_v54 = vshrl.u32 %v5993_v60, 16  ;;  %v2868_v32 = vshll.u32 %v5993_v60, 16  ;;  %v5994_v47 = vpack.c.bf16 %v7791_v38, %v7791_v38  ;;  %v5637_v61 = vclamps-f32 %v2724_v46, 1.0 }
 0x2bf   : > { %v2884_v7 = vrot.slane %v2882_v62, 7  ;;  %v2890_v59 = vshrl.u32 %v5996_v18, 16  ;;  %v2893_v40 = vshll.u32 %v5996_v18, 16  ;;  %v2774_v11 = vadd.f32 %v6870_v58, %v5639_v0 }
 0x2c0   : > { %v2867_v39 = vrot.slane %v2865_v54, 7  ;;  %v2873_v2 = vshrl.u32 %v5994_v47, 16  ;;  %v2876_v34 = vshll.u32 %v5994_v47, 16  ;;  %v2772_v50 = vadd.f32 %v6871_v16, %v5637_v61  ;;  %v6872_v16 = vld [vmem:[%s6945_s30 + $0x38] sm:$0xff] }
 0x2c1   : > { %v2887_v8 = vor.u32 %v2885_v48, %v2884_v7  ;;  %v2888_v6 = vrot.slane %v2884_v7, 4  ;;  %v2892_v51 = vrot.slane %v2890_v59, 7  ;;  %v7800_v26 = vclamps-f32 %v2774_v11, 1.0  ;;  %v3044_v59 = vld [vmem:[#allocation2 + $0x24] sm:$0xf] }
 0x2c2   : > { %v2870_v1 = vor.u32 %v2868_v32, %v2867_v39  ;;  %v2871_v14 = vrot.slane %v2867_v39, 4  ;;  %v2875_v29 = vrot.slane %v2873_v2, 7  ;;  %v7802_v30 = vclamps-f32 %v2772_v50, 1.0  ;;  %v6403_v21 = vpop.f32.mrb[8].mxu1 }
 0x2c3   : > { %v3031_v9 = vsel %vm6989_vm8, %v2887_v8, %v3030_v27  ;;  %v2895_v33 = vor.u32 %v2893_v40, %v2892_v51  ;;  %v2897_v19 = vrot.slane %v2892_v51, 4  ;;  %v5999_v22 = vpack.c.bf16 %v7800_v26, %v7800_v26  ;;  %v2667_v44 = vpop.f32.mrb[9].mxu1  ;;  %v6873_v8 = vld [vmem:[%s6945_s30 + $0x28] sm:$0xff] }
 0x2c4   : > { %3032 = vst [vmem:[#allocation2 + $0xc] sm:$0xf] %v3031_v9  ;;  %v3024_v42 = vsel %vm6989_vm8, %v2870_v1, %v7487_v13  ;;  %v2878_v12 = vor.u32 %v2876_v34, %v2875_v29  ;;  %v2880_v45 = vrot.slane %v2875_v29, 4  ;;  %v5997_v23 = vpack.c.bf16 %v7802_v30, %v7802_v30  ;;  %v6404_v36 = vpop.f32.mrb[10].mxu1  ;;  %v3037_v34 = vld [vmem:[#allocation2 + $0x18] sm:$0xf] }
 0x2c5   : > { %3025 = vst [vmem:[#allocation2] sm:$0xf] %v3024_v42  ;;  %v2896_v37 = vsel %vm6979_vm7, %v2888_v6, %v2895_v33  ;;  %v3035_v25 = vsel %vm6951_vm3, %v2897_v19, %v3034_v43  ;;  %v2916_v17 = vshrl.u32 %v5999_v22, 16  ;;  %v2919_v52 = vshll.u32 %v5999_v22, 16  ;;  %v2670_v49 = vpop.f32.mrb[11].mxu1  ;;  %v6876_v42 = vld [vmem:[%s6945_s30 + $0x58] sm:$0xff] }
 0x2c6   : > { %3033 = vst [vmem:[#allocation2 + $0x10] sm:$0xf] %v2896_v37  ;;  %3036 = vst [vmem:[#allocation2 + $0x14] sm:$0x1] %v3035_v25  ;;  %v2879_v13 = vsel %vm6979_vm7, %v2871_v14, %v2878_v12  ;;  %v3028_v20 = vsel %vm6951_vm3, %v2880_v45, %v3027_v53  ;;  %v2899_v31 = vshrl.u32 %v5997_v23, 16  ;;  %v2902_v56 = vshll.u32 %v5997_v23, 16 }
 0x2c7   : > { %3026 = vst [vmem:[#allocation2 + $0x4] sm:$0xf] %v2879_v13  ;;  %3029 = vst [vmem:[#allocation2 + $0x8] sm:$0x1] %v3028_v20  ;;  %v7821_v60 = vrot.slane %v2916_v17, 7  ;;  %v2727_v46 = vadd.f32 %v6400_v55, %v7770_v41  ;;  %v2725_v62 = vadd.f32 %v7770_v41, %v2654_v15  ;;  %v2730_v48 = vadd.f32 %v6403_v21, %v7770_v41  ;;  %v6874_v14 = vld [vmem:[%s6945_s30 + $0x50] sm:$0xff] }
 0x2c8   : > { %v7826_v18 = vrot.slane %v2899_v31, 7  ;;  %v2728_v0 = vadd.f32 %v7770_v41, %v2667_v44  ;;  %v2731_v54 = vadd.f32 %v6404_v36, %v7770_v41  ;;  %v2729_v32 = vadd.f32 %v7770_v41, %v2670_v49  ;;  %v6875_v21 = vld [vmem:[%s6945_s30 + $0x40] sm:$0xff]  ;;  %v6877_v37 = vld [vmem:[%s6945_s30 + $0x48] sm:$0xff] }
 0x2c9   : > { %v2921_v47 = vor.u32 %v2919_v52, %v7821_v60  ;;  %v2922_v61 = vrot.slane %v7821_v60, 4  ;;  %v5640_v7 = vclamps-f32 %v2727_v46, 1.0  ;;  %v5638_v55 = vclamps-f32 %v2725_v62, 1.0 }
 0x2ca   : > { %v2904_v15 = vor.u32 %v2902_v56, %v7826_v18  ;;  %v2905_v40 = vrot.slane %v7826_v18, 4  ;;  %v5643_v58 = vclamps-f32 %v2730_v48, 1.0  ;;  %v5641_v11 = vclamps-f32 %v2728_v0, 1.0  ;;  %v6407_v39 = vpop.f32.mrb[12].mxu1 }
 0x2cb   : > { %v3045_v2 = vsel %vm6989_vm8, %v2921_v47, %v3044_v59  ;;  %v2775_v50 = vadd.f32 %v6872_v16, %v5640_v7  ;;  %v2773_v6 = vadd.f32 %v6873_v8, %v5638_v55  ;;  %v5644_v51 = vclamps-f32 %v2731_v54, 1.0  ;;  %v2683_v27 = vpop.f32.mrb[13].mxu1 }
 0x2cc   : > { %3046 = vst [vmem:[#allocation2 + $0x24] sm:$0xf] %v3045_v2  ;;  %v3038_v1 = vsel %vm6989_vm8, %v2904_v15, %v3037_v34  ;;  %v2778_v29 = vadd.f32 %v6874_v14, %v5643_v58  ;;  %v2776_v9 = vadd.f32 %v6875_v21, %v5641_v11  ;;  %v5642_v33 = vclamps-f32 %v2729_v32, 1.0  ;;  %v7843_v19 = vpop.f32.mrb[14].mxu1  ;;  %v6878_v34 = vld [vmem:[%s6945_s30 + $0x70] sm:$0xff] }
 0x2cd   : > { %3039 = vst [vmem:[#allocation2 + $0x18] sm:$0xf] %v3038_v1  ;;  %v7845_v22 = vclamps-f32 %v2775_v50, 1.0  ;;  %v7847_v44 = vclamps-f32 %v2773_v6, 1.0  ;;  %v2779_v43 = vadd.f32 %v6876_v42, %v5644_v51  ;;  %v2734_v12 = vadd.f32 %v6407_v39, %v7770_v41  ;;  %v7851_v45 = vpop.f32.mrb[15].mxu1  ;;  %v6879_v50 = vld [vmem:[%s6945_s30 + $0x60] sm:$0xff] }
 0x2ce   : > { %v7853_v23 = vclamps-f32 %v2778_v29, 1.0  ;;  %v7855_v36 = vclamps-f32 %v2776_v9, 1.0  ;;  %v2777_v25 = vadd.f32 %v6877_v37, %v5642_v33  ;;  %v2732_v53 = vadd.f32 %v7770_v41, %v2683_v27  ;;  %v3048_v14 = vld [vmem:[#allocation2 + $0x2c] sm:$0x1]  ;;  %v3041_v29 = vld [vmem:[#allocation2 + $0x20] sm:$0x1] }
 0x2cf   : > { %v6000_v17 = vpack.c.bf16 %v7845_v22, %v7845_v22  ;;  %v5998_v52 = vpack.c.bf16 %v7847_v44, %v7847_v44  ;;  %v7863_v49 = vclamps-f32 %v2779_v43, 1.0  ;;  %v5647_v13 = vclamps-f32 %v2734_v12, 1.0 }
 0x2d0   : > { %v6003_v20 = vpack.c.bf16 %v7853_v23, %v7853_v23  ;;  %v6001_v31 = vpack.c.bf16 %v7855_v36, %v7855_v36  ;;  %v7869_v56 = vclamps-f32 %v2777_v25, 1.0  ;;  %v5645_v46 = vclamps-f32 %v2732_v53, 1.0  ;;  %v3058_v53 = vld [vmem:[#allocation2 + $0x3c] sm:$0xf] }
 0x2d1   : > { %v2924_v62 = vshrl.u32 %v6000_v17, 16  ;;  %v2927_v48 = vshll.u32 %v6000_v17, 16  ;;  %v2907_v0 = vshrl.u32 %v5998_v52, 16  ;;  %v2910_v54 = vshll.u32 %v5998_v52, 16  ;;  %v3051_v17 = vld [vmem:[#allocation2 + $0x30] sm:$0xf] }
 0x2d2   : > { %8633 = vst [vmem:[#allocation3_spill] sm:$0xff] %v7869_v56  ;;  %v2950_v32 = vshrl.u32 %v6003_v20, 16  ;;  %v2953_v47 = vshll.u32 %v6003_v20, 16  ;;  %v2933_v7 = vshrl.u32 %v6001_v31, 16  ;;  %v2936_v55 = vshll.u32 %v6001_v31, 16 }
 0x2d3   : > { %v2926_v59 = vrot.slane %v2924_v62, 7  ;;  %v2909_v15 = vrot.slane %v2907_v0, 7  ;;  %v6004_v58 = vpack.c.bf16 %v7863_v49, %v7863_v49  ;;  %v6002_v11 = vpack.c.bf16 %v7869_v56, %v7869_v56  ;;  %v7893_v52 = vld [vmem:[#allocation2] sm:$0xf] }
 0x2d4   : > { %v2952_v39 = vrot.slane %v2950_v32, 7  ;;  %v7875_v2 = vrot.slane %v2933_v7, 7  ;;  %v2782_v16 = vadd.f32 %v6878_v34, %v5647_v13  ;;  %v2780_v8 = vadd.f32 %v6879_v50, %v5645_v46  ;;  %v3055_v50 = vld [vmem:[#allocation2 + $0x38] sm:$0x1] }
 0x2d5   : > { %v2929_v6 = vor.u32 %v2927_v48, %v2926_v59  ;;  %v2931_v51 = vrot.slane %v2926_v59, 4  ;;  %v2912_v27 = vor.u32 %v2910_v54, %v2909_v15  ;;  %v2914_v1 = vrot.slane %v2909_v15, 4 }
 0x2d6   : > { %v2955_v21 = vor.u32 %v2953_v47, %v2952_v39  ;;  %v2956_v9 = vrot.slane %v2952_v39, 4  ;;  %v2938_v33 = vor.u32 %v2936_v55, %v7875_v2  ;;  %v2939_v42 = vrot.slane %v7875_v2, 4  ;;  %v3062_v39 = vld [vmem:[#allocation2 + $0x44] sm:$0x1] }
 0x2d7   : > { %v2930_v43 = vsel %vm6979_vm7, %v2922_v61, %v2929_v6  ;;  %v3049_v12 = vsel %vm6951_vm3, %v2931_v51, %v3048_v14  ;;  %v2913_v37 = vsel %vm6979_vm7, %v2905_v40, %v2912_v27  ;;  %v3042_v25 = vsel %vm6951_vm3, %v2914_v1, %v3041_v29  ;;  %v7917_v51 = vld [vmem:[#allocation2 + $0x4] sm:$0xf]  ;;  %v6880_v29 = vld [vmem:[%s6945_s30 + $0x78] sm:$0xff] }
 0x2d8   : > { %3047 = vst [vmem:[#allocation2 + $0x28] sm:$0xf] %v2930_v43  ;;  %3050 = vst [vmem:[#allocation2 + $0x2c] sm:$0x1] %v3049_v12  ;;  %v3059_v60 = vsel %vm6989_vm8, %v2955_v21, %v3058_v53  ;;  %v3052_v18 = vsel %vm6989_vm8, %v2938_v33, %v3051_v17  ;;  %v2958_v61 = vshrl.u32 %v6004_v58, 16  ;;  %v2961_v13 = vshll.u32 %v6004_v58, 16 }
 0x2d9   : > { %3040 = vst [vmem:[#allocation2 + $0x1c] sm:$0xf] %v2913_v37  ;;  %3043 = vst [vmem:[#allocation2 + $0x20] sm:$0x1] %v3042_v25  ;;  %v2941_v40 = vshrl.u32 %v6002_v11, 16  ;;  %v2944_v20 = vshll.u32 %v6002_v11, 16  ;;  %v2735_v48 = vadd.f32 %v7843_v19, %v7770_v41  ;;  %v2733_v0 = vadd.f32 %v7770_v41, %v7851_v45 }
 0x2da   : > { %3060 = vst [vmem:[#allocation2 + $0x3c] sm:$0xf] %v3059_v60  ;;  %3053 = vst [vmem:[#allocation2 + $0x30] sm:$0xf] %v3052_v18  ;;  %v7899_v31 = vclamps-f32 %v2782_v16, 1.0  ;;  %v7901_v46 = vclamps-f32 %v2780_v8, 1.0 }
 0x2db   : > { %v2960_v62 = vrot.slane %v2958_v61, 7  ;;  %v3123_v54 = vshrl.u32 %v7893_v52, 16  ;;  %v2943_v32 = vrot.slane %v2941_v40, 7  ;;  %v3126_v55 = vshll.u32 %v7893_v52, 16  ;;  %v6881_v33 = vld [vmem:[%s6945_s30 + $0x68] sm:$0xff] }
 0x2dc   : > { %8634 = vst [vmem:[#allocation4_spill] sm:$0xff] %v7899_v31  ;;  %8635 = vst [vmem:[#allocation5_spill] sm:$0xff] %v7901_v46  ;;  %v6007_v47 = vpack.c.bf16 %v7899_v31, %v7899_v31  ;;  %v6005_v7 = vpack.c.bf16 %v7901_v46, %v7901_v46  ;;  %v5648_v58 = vclamps-f32 %v2735_v48, 1.0  ;;  %v5646_v11 = vclamps-f32 %v2733_v0, 1.0  ;;  %v7929_v60 = vld [vmem:[#allocation2 + $0x8] sm:$0x1] }
 0x2dd   : > { %v2963_v59 = vor.u32 %v2961_v13, %v2960_v62  ;;  %v2965_v15 = vrot.slane %v2960_v62, 4  ;;  %v2946_v19 = vor.u32 %v2944_v20, %v2943_v32  ;;  %v2948_v2 = vrot.slane %v2943_v32, 4  ;;  %v3072_v18 = vld [vmem:[#allocation2 + $0x54] sm:$0xf]  ;;  %v7936_v62 = vld [vmem:[#allocation2 + $0xc] sm:$0xf] }
 0x2de   : > { %v2984_v41 = vshrl.u32 %v6007_v47, 16  ;;  %v2987_v45 = vshll.u32 %v6007_v47, 16  ;;  %v2967_v8 = vshrl.u32 %v6005_v7, 16  ;;  %v2970_v6 = vshll.u32 %v6005_v7, 16  ;;  %v3065_v0 = vld [vmem:[#allocation2 + $0x48] sm:$0xf] }
 0x2df   : > { %v2964_v34 = vsel %vm6979_vm7, %v2956_v9, %v2963_v59  ;;  %v3063_v16 = vsel %vm6951_vm3, %v2965_v15, %v3062_v39  ;;  %v2947_v27 = vsel %vm6979_vm7, %v2939_v42, %v2946_v19  ;;  %v3056_v1 = vsel %vm6951_vm3, %v2948_v2, %v3055_v50  ;;  %v7950_v2 = vld [vmem:[#allocation2 + $0x14] sm:$0x1] }
 0x2e0   : > { %3061 = vst [vmem:[#allocation2 + $0x40] sm:$0xf] %v2964_v34  ;;  %3064 = vst [vmem:[#allocation2 + $0x44] sm:$0x1] %v3063_v16  ;;  %v2986_v14 = vrot.slane %v2984_v41, 7  ;;  %v2783_v21 = vadd.f32 %v6880_v29, %v5648_v58  ;;  %v7924_v9 = vrot.slane %v2967_v8, 7  ;;  %v2781_v43 = vadd.f32 %v6881_v33, %v5646_v11 }
 0x2e1   : > { %3054 = vst [vmem:[#allocation2 + $0x34] sm:$0xf] %v2947_v27  ;;  %3057 = vst [vmem:[#allocation2 + $0x38] sm:$0x1] %v3056_v1  ;;  %v3125_v12 = vrot.slane %v3123_v54, 4  ;;  %v3128_v37 = vrot.slane %v3126_v55, 5 }
 0x2e2   : > { %v2989_v25 = vor.u32 %v2987_v45, %v2986_v14  ;;  %v2990_v53 = vrot.slane %v2986_v14, 4  ;;  %v7927_v17 = vclamps-f32 %v2783_v21, 1.0  ;;  %v3132_v42 = vshll.u32 %v7917_v51, 16  ;;  %v7948_v58 = vld [vmem:[#allocation2 + $0x10] sm:$0xf] }
 0x2e3   : > { %v2972_v61 = vor.u32 %v2970_v6, %v7924_v9  ;;  %v2973_v13 = vrot.slane %v7924_v9, 4  ;;  %v7934_v40 = vclamps-f32 %v2781_v43, 1.0  ;;  %v3129_v20 = vor.u32 %v3128_v37, %v3125_v12  ;;  %v3076_v12 = vld [vmem:[#allocation2 + $0x5c] sm:$0x1] }
 0x2e4   : > { %8636 = vst [vmem:[#allocation6_spill] sm:$0xff] %v7927_v17  ;;  %v3073_v48 = vsel %vm6989_vm8, %v2989_v25, %v3072_v18  ;;  %v6008_v54 = vpack.c.bf16 %v7927_v17, %v7927_v17  ;;  %v3134_v32 = vrot.slane %v3132_v42, 5  ;;  %v3136_v47 = vshrl.u32 %v7917_v51, 16 }
 0x2e5   : > { %8637 = vst [vmem:[#allocation7_spill] sm:$0xff] %v7934_v40  ;;  %3074 = vst [vmem:[#allocation2 + $0x54] sm:$0xf] %v3073_v48  ;;  %v3066_v7 = vsel %vm6989_vm8, %v2972_v61, %v3065_v0  ;;  %v6006_v55 = vpack.c.bf16 %v7934_v40, %v7934_v40  ;;  %v3130_v59 = vrot.slane %v3129_v20, 4  ;;  %v3142_v15 = vshll.u32 %v7929_v60, 16 }
 0x2e6   : > { %3067 = vst [vmem:[#allocation2 + $0x48] sm:$0xf] %v3066_v7  ;;  %v2992_v11 = vshrl.u32 %v6008_v54, 16  ;;  %v2995_v39 = vshll.u32 %v6008_v54, 16  ;;  %v3138_v19 = vrot.slane %v3136_v47, 4  ;;  %v3147_v41 = vshrl.u32 %v7936_v62, 16 }
 0x2e7   : > { %v2975_v45 = vshrl.u32 %v6006_v55, 16  ;;  %v2978_v34 = vshll.u32 %v6006_v55, 16  ;;  %v3135_v16 = vsel %vm7079_vm11, %v3130_v59, %v3134_v32  ;;  %v3144_v50 = vrot.slane %v3142_v15, 5  ;;  %v7959_v48 = vld [vmem:[#allocation2 + $0x18] sm:$0xf] }
 0x2e8   : > { %v2994_v8 = vrot.slane %v2992_v11, 7  ;;  %v3139_v6 = vor.u32 %v3138_v19, %v3134_v32  ;;  %v3149_v27 = vrot.slane %v3147_v41, 4  ;;  %v3150_v1 = vshll.u32 %v7936_v62, 16  ;;  %v3069_v32 = vld [vmem:[#allocation2 + $0x50] sm:$0x1] }
 0x2e9   : > { %v2977_v14 = vrot.slane %v2975_v45, 7  ;;  %v3156_v29 = vshll.u32 %v7948_v58, 16  ;;  %v3160_v21 = vshrl.u32 %v7948_v58, 16  ;;  %v3166_v9 = vshll.u32 %v7950_v2, 16  ;;  %v7967_v55 = vld [vmem:[#allocation2 + $0x1c] sm:$0xf] }
 0x2ea   : > { %v2997_v33 = vor.u32 %v2995_v39, %v2994_v8  ;;  %v2999_v43 = vrot.slane %v2994_v8, 4  ;;  %v3140_v37 = vrot.slane %v3139_v6, 4  ;;  %v3152_v25 = vrot.slane %v3150_v1, 5  ;;  %v7969_v59 = vld [vmem:[#allocation2 + $0x20] sm:$0x1] }
 0x2eb   : > { %v2980_v42 = vor.u32 %v2978_v34, %v2977_v14  ;;  %v2982_v18 = vrot.slane %v2977_v14, 4  ;;  %v3158_v61 = vrot.slane %v3156_v29, 5  ;;  %v3162_v20 = vrot.slane %v3160_v21, 4  ;;  %v7975_v19 = vld [vmem:[#allocation2 + $0x24] sm:$0xf] }
 0x2ec   : > { %v2998_v0 = vsel %vm6979_vm7, %v2990_v53, %v2997_v33  ;;  %v3077_v54 = vsel %vm6951_vm3, %v2999_v43, %v3076_v12  ;;  %v3145_v47 = vsel %vm7079_vm11, %v3140_v37, %v3144_v50  ;;  %v3153_v7 = vor.u32 %v3152_v25, %v3149_v27  ;;  %v7986_v21 = vld [vmem:[#allocation2 + $0x2c] sm:$0x1]  ;;  %v7991_v25 = vld [vmem:[#allocation2 + $0x30] sm:$0xf]  ;;  %v8040_v40 = vld [vmem:[#allocation2 + $0x54] sm:$0xf] }
 0x2ed   : > { %3075 = vst [vmem:[#allocation2 + $0x58] sm:$0xf] %v2998_v0  ;;  %3078 = vst [vmem:[#allocation2 + $0x5c] sm:$0x1] %v3077_v54  ;;  %v2981_v15 = vsel %vm6979_vm7, %v2973_v13, %v2980_v42  ;;  %v3070_v53 = vsel %vm6951_vm3, %v2982_v18, %v3069_v32  ;;  %v5714_v11 = vcombine.low %v3135_v16, %v3145_v47  ;;  %v3168_v45 = vrot.slane %v3166_v9, 5  ;;  %v6810_v18 = vld [vmem:[%s8611_s1 + $0xc8] sm:$0xff]  }
 0x2ee   : > { %v3163_v39 = vor.u32 %v3162_v20, %v3158_v61  ;;  %3068 = vst [vmem:[#allocation2 + $0x4c] sm:$0xf] %v2981_v15  ;;  %3071 = vst [vmem:[#allocation2 + $0x50] sm:$0x1] %v3070_v53  ;;  %v3154_v41 = vrot.slane %v3153_v7, 4  ;;  %v3171_v34 = vshrl.u32 %v7959_v48, 16 }
 0x2ef   : > { %v3174_v50 = vshll.u32 %v7959_v48, 16  ;;  %6425 = vmatprep.mubr.bf16.mxu0 %v5714_v11  ;;  %v3180_v6 = vshll.u32 %v7967_v55, 16  ;;  %v3184_v13 = vshrl.u32 %v7967_v55, 16  ;;  %v3190_v27 = vshll.u32 %v7969_v59, 16  ;;  %v7982_v16 = vld [vmem:[#allocation2 + $0x28] sm:$0xf] }
 0x2f0   : > { %v3164_v8 = vrot.slane %v3163_v39, 4  ;;  %v3159_v1 = vsel %vm7079_vm11, %v3154_v41, %v3158_v61  ;;  %v3173_v14 = vrot.slane %v3171_v34, 4  ;;  %v3195_v9 = vshrl.u32 %v7975_v19, 16  ;;  %v8000_v11 = vld [vmem:[#allocation2 + $0x34] sm:$0xf] }
 0x2f1   : > { %v3176_v29 = vrot.slane %v3174_v50, 5  ;;  %v3182_v43 = vrot.slane %v3180_v6, 5  ;;  %v3186_v12 = vrot.slane %v3184_v13, 4  ;;  %v3192_v37 = vrot.slane %v3190_v27, 5  ;;  %v8005_v6 = vld [vmem:[#allocation2 + $0x38] sm:$0x1] }
 0x2f2   : > { %v3169_v33 = vsel %vm7079_vm11, %v3164_v8, %v3168_v45  ;;  %v3197_v20 = vrot.slane %v3195_v9, 4  ;;  %v3198_v0 = vshll.u32 %v7975_v19, 16  ;;  %v3204_v32 = vshll.u32 %v7982_v16, 16  ;;  %v6811_v27 = vld [vmem:[%s8611_s1 + $0xd0] sm:$0xff]   ;;  %v8012_v9 = vld [vmem:[#allocation2 + $0x3c] sm:$0xf] }
 0x2f3   : > { %v5715_v42 = vcombine.low %v3159_v1, %v3169_v33  ;;  %v3177_v61 = vor.u32 %v3176_v29, %v3173_v14  ;;  %v3187_v54 = vor.u32 %v3186_v12, %v3182_v43  ;;  %v3208_v47 = vshrl.u32 %v7982_v16, 16 }
 0x2f4   : > { %v3214_v7 = vshll.u32 %v7986_v21, 16  ;;  %v3200_v53 = vrot.slane %v3198_v0, 5  ;;  %v3219_v39 = vshrl.u32 %v7991_v25, 16  ;;  %v3222_v41 = vshll.u32 %v7991_v25, 16 }
 0x2f5   : > { %6426 = vmatmul.mubr.bf16.vlgmr.msra.gmra.mrb[16].mxu0 %v5715_v42  ;;  %v3178_v15 = vrot.slane %v3177_v61, 4  ;;  %v3188_v45 = vrot.slane %v3187_v54, 4  ;;  %v3206_v34 = vrot.slane %v3204_v32, 5  ;;  %v3210_v50 = vrot.slane %v3208_v47, 4  ;;  %v8019_v32 = vld [vmem:[#allocation2 + $0x40] sm:$0xf] }
 0x2f6   : > { %6442 = vmatpush3.bf16.msra.mxu0 %v7764_v28  ;;  %v3216_v8 = vrot.slane %v3214_v7, 5  ;;  %v3201_v1 = vor.u32 %v3200_v53, %v3197_v20  ;;  %v3221_v14 = vrot.slane %v3219_v39, 4  ;;  %v3224_v29 = vrot.slane %v3222_v41, 5  ;;  %v6812_v47 = vld [vmem:[%s8611_s1 + $0xd8] sm:$0xff]   ;;  %v8027_v41 = vld [vmem:[#allocation2 + $0x44] sm:$0x1] }
 0x2f7   : > { %6443 = vmatprep.subr.bf16.mxu0 %v6810_v18  ;;  %v3183_v13 = vsel %vm7079_vm11, %v3178_v15, %v3182_v43  ;;  %v3193_v28 = vsel %vm7079_vm11, %v3188_v45, %v3192_v37  ;;  %v3211_v33 = vor.u32 %v3210_v50, %v3206_v34  ;;  %v3228_v12 = vshll.u32 %v8000_v11, 16 }
 0x2f8   : > { %v3232_v42 = vshrl.u32 %v8000_v11, 16  ;;  %v5716_v61 = vcombine.low %v3183_v13, %v3193_v28  ;;  %v3202_v0 = vrot.slane %v3201_v1, 4  ;;  %v3225_v43 = vor.u32 %v3224_v29, %v3221_v14  ;;  %v8035_v29 = vld [vmem:[#allocation2 + $0x4c] sm:$0xf] }
 0x2f9   : > { %v3238_v54 = vshll.u32 %v8005_v6, 16  ;;  %v3212_v20 = vrot.slane %v3211_v33, 4  ;;  %v3230_v7 = vrot.slane %v3228_v12, 5  ;;  %v3243_v15 = vshrl.u32 %v8012_v9, 16 }
 0x2fa   : > { %6444 = vmatpush3.bf16.msra.mxu0 %v6810_v18  ;;  %v3234_v37 = vrot.slane %v3232_v42, 4  ;;  %6429 = vmatprep.mubr.bf16.mxu0 %v5716_v61  ;;  %v3207_v53 = vsel %vm7079_vm11, %v3202_v0, %v3206_v34  ;;  %v3226_v39 = vrot.slane %v3225_v43, 4  ;;  %v3246_v45 = vshll.u32 %v8012_v9, 16  ;;  %v8030_v18 = vld [vmem:[#allocation2 + $0x48] sm:$0xf] }
 0x2fb   : > { %6445 = vmatprep.subr.bf16.mxu0 %v6811_v27  ;;  %v3217_v50 = vsel %vm7079_vm11, %v3212_v20, %v3216_v8  ;;  %v3245_v1 = vrot.slane %v3243_v15, 4  ;;  %v3252_v14 = vshll.u32 %v8019_v32, 16  ;;  %v3240_v33 = vrot.slane %v3238_v54, 5  ;;  %v6813_v8 = vld [vmem:[%s8611_s1 + $0xe0] sm:$0xff]  }
 0x2fc   : > { %v3235_v13 = vor.u32 %v3234_v37, %v3230_v7  ;;  %v5717_v28 = vcombine.low %v3207_v53, %v3217_v50  ;;  %v3248_v12 = vrot.slane %v3246_v45, 5  ;;  %v3256_v34 = vshrl.u32 %v8019_v32, 16  ;;  %v8045_v37 = vld [vmem:[#allocation2 + $0x50] sm:$0x1] }
 0x2fd   : > { %v3254_v61 = vrot.slane %v3252_v14, 5  ;;  %v3262_v0 = vshll.u32 %v8027_v41, 16  ;;  %v3267_v43 = vshrl.u32 %v8030_v18, 16  ;;  %v3276_v15 = vshll.u32 %v8035_v29, 16 }
 0x2fe   : > { %6446 = vmatpush3.bf16.msra.mxu0 %v6811_v27  ;;  %v3236_v42 = vrot.slane %v3235_v13, 4  ;;  %v3249_v20 = vor.u32 %v3248_v12, %v3245_v1  ;;  %v3258_v54 = vrot.slane %v3256_v34, 4  ;;  %v3270_v27 = vshll.u32 %v8030_v18, 16  ;;  %v8054_v12 = vld [vmem:[#allocation2 + $0x58] sm:$0xf] }
 0x2ff   : > { %6430 = vmatmul.mubr.bf16.gmra.mrb[20].mxu0 %v5717_v28  ;;  %6447 = vmatprep.subr.bf16.mxu0 %v6812_v47  ;;  %v3231_v53 = vsel %vm7079_vm11, %v3226_v39, %v3230_v7  ;;  %v3269_v50 = vrot.slane %v3267_v43, 4  ;;  %v3280_v13 = vshrl.u32 %v8035_v29, 16  ;;  %v3278_v34 = vrot.slane %v3276_v15, 5 }
 0x300   : > { %v3241_v45 = vsel %vm7079_vm11, %v3236_v42, %v3240_v33  ;;  %v3250_v28 = vrot.slane %v3249_v20, 4  ;;  %v3259_v17 = vor.u32 %v3258_v54, %v3254_v61  ;;  %v3272_v1 = vrot.slane %v3270_v27, 5  ;;  %v6814_v33 = vld [vmem:[%s8611_s1 + $0xe8] sm:$0xff]   ;;  %v8064_v54 = vld [vmem:[#allocation2 + $0x5c] sm:$0x1] }
 0x301   : > { %v5718_v14 = vcombine.low %v3231_v53, %v3241_v45  ;;  %v3282_v46 = vrot.slane %v3280_v13, 4  ;;  %v3286_v31 = vshll.u32 %v8045_v37, 16  ;;  %v3291_v56 = vshrl.u32 %v8040_v40, 16 }
 0x302   : > { %6448 = vmatpush3.bf16.msra.mxu0 %v6812_v47  ;;  %v3260_v7 = vrot.slane %v3259_v17, 4  ;;  %v3264_v39 = vrot.slane %v3262_v0, 5  ;;  %v3273_v42 = vor.u32 %v3272_v1, %v3269_v50  ;;  %v3294_v43 = vshll.u32 %v8040_v40, 16 }
 0x303   : > { %6433 = vmatprep.mubr.bf16.mxu0 %v5718_v14  ;;  %6449 = vmatprep.subr.bf16.mxu0 %v6813_v8  ;;  %v3255_v47 = vsel %vm7079_vm11, %v3250_v28, %v3254_v61  ;;  %v3283_v20 = vor.u32 %v3282_v46, %v3278_v34  ;;  %v3293_v27 = vrot.slane %v3291_v56, 4  ;;  %v3300_v15 = vshll.u32 %v8054_v12, 16  ;;  %v6815_v46 = vld [vmem:[%s8611_s1 + $0xf0] sm:$0xff]  }
 0x304   : > { %v3265_v17 = vsel %vm7079_vm11, %v3260_v7, %v3264_v39  ;;  %v3274_v0 = vrot.slane %v3273_v42, 4  ;;  %v3296_v53 = vrot.slane %v3294_v43, 5  ;;  %v3304_v45 = vshrl.u32 %v8054_v12, 16 }
 0x305   : > { %v5719_v13 = vcombine.low %v3255_v47, %v3265_v17  ;;  %v3284_v50 = vrot.slane %v3283_v20, 4  ;;  %v3288_v14 = vrot.slane %v3286_v31, 5  ;;  %v3302_v1 = vrot.slane %v3300_v15, 5  ;;  %v6817_v20 = vld [vmem:[%s8611_s1 + $0xf8] sm:$0xff]  }
 0x306   : > { %6450 = vmatpush3.bf16.msra.mxu0 %v6813_v8  ;;  %v3297_v56 = vor.u32 %v3296_v53, %v3293_v27  ;;  %v3306_v61 = vrot.slane %v3304_v45, 4  ;;  %v3310_v28 = vshll.u32 %v8064_v54, 16  ;;  %v3279_v7 = vsel %vm7079_vm11, %v3274_v0, %v3278_v34  ;;  %v6821_v53 = vld [vmem:[%s8611_s1 + $0x148] sm:$0xff]  }
 0x307   : > { %6451 = vmatprep.subr.bf16.mxu0 %v6814_v33  ;;  %6434 = vmatmul.mubr.bf16.gmra.mrb[24].mxu0 %v5719_v13  ;;  %v3289_v39 = vsel %vm7079_vm11, %v3284_v50, %v3288_v14  ;;  %v5730_v17 = vcombine.low %v7893_v52, %v7917_v51  ;;  %v5731_v0 = vcombine.low %v7936_v62, %v7948_v58  ;;  %v6822_v13 = vld [vmem:[%s8611_s1 + $0x150] sm:$0xff]   ;;  %v6825_v50 = vld [vmem:[%s8611_s1 + $0x158] sm:$0xff]   ;;  %v6826_v14 = vld [vmem:[%s8611_s1 + $0x160] sm:$0xff]  }
 0x308   : > { %v5720_v8 = vcombine.low %v3279_v7, %v3289_v39  ;;  %v3298_v42 = vrot.slane %v3297_v56, 4  ;;  %v3307_v31 = vor.u32 %v3306_v61, %v3302_v1  ;;  %v3312_v47 = vrot.slane %v3310_v28, 5  ;;  %v3701_v61 = vld [vmem:[#allocation2] sm:$0xe] }
 0x309   : > { %v5732_v45 = vcombine.low %v7959_v48, %v7967_v55  ;;  %v5733_v62 = vcombine.low %v7975_v19, %v7982_v16  ;;  %v5734_v48 = vcombine.low %v7991_v25, %v8000_v11  ;;  %v5735_v19 = vcombine.low %v8012_v9, %v8019_v32 }
 0x30a   : > { %6452 = vmatpush3.bf16.msra.mxu0 %v6814_v33  ;;  %6437 = vmatprep.mubr.bf16.mxu0 %v5720_v8  ;;  %v3308_v43 = vrot.slane %v3307_v31, 4  ;;  %v3303_v27 = vsel %vm7079_vm11, %v3298_v42, %v3302_v1  ;;  %v6818_v33 = vld [vmem:[%s8611_s1 + $0x140] sm:$0xff]   ;;  %v3727_v1 = vrot.slane %v7917_v51, 5  ;;  %v5736_v25 = vcombine.low %v8030_v18, %v8035_v29  ;;  %v6830_v51 = vld [vmem:[%s8611_s1 + $0x170] sm:$0xff]  }
 0x30b   : > { %6453 = vmatprep.subr.bf16.mxu0 %v6815_v46  ;;  %v3730_v28 = vrot.slane %v7929_v60, 5  ;;  %v3734_v9 = vrot.slane %v7948_v58, 5  ;;  %v5746_v7 = vrot.slane %v3701_v61, 9  ;;  %v3741_v18 = vrot.slane %v7967_v55, 5  ;;  %v6832_v60 = vld [vmem:[%s8611_s1 + $0x178] sm:$0xff]  }
 0x30c   : > { %v3313_v34 = vsel %vm7079_vm11, %v3308_v43, %v3312_v47  ;;  %v3729_v56 = vrot.slane %v3727_v1, 4  ;;  %v5737_v8 = vcombine.low %v8040_v40, %v8054_v12  ;;  %v3702_v43 = vld [vmem:[#allocation2 + $0xc] sm:$0xe]  ;;  %v3737_v55 = vrot.slane %v7950_v2, 5 }
 0x30d   : > { %v5721_v15 = vcombine.low %v3303_v27, %v3313_v34  ;;  %v3728_v42 = vsel %vm7327_vm14, %v5746_v7, %v3727_v1  ;;  %v3736_v58 = vrot.slane %v3734_v9, 4  ;;  %v3743_v47 = vrot.slane %v3741_v18, 4 }
 0x30e   : > { %6454 = vmatpush3.bf16.msra.mxu0 %v6815_v46  ;;  %v6829_v46 = vld [vmem:[%s8611_s1 + $0x168] sm:$0xff]   ;;  %v3731_v39 = vsel %vm7327_vm14, %v3729_v56, %v3730_v28  ;;  %v3744_v40 = vrot.slane %v7969_v59, 5  ;;  %v5747_v27 = vrot.slane %v3702_v43, 9  ;;  %v3769_v56 = vrot.slane %v8035_v29, 5 }
 0x30f   : > { %6455 = vmatprep.subr.bf16.mxu0 %v6817_v20  ;;  %6438 = vmatmul.mubr.bf16.gmra.mrb[28].mxu0 %v5721_v15  ;;  %v5770_v31 = vcombine.low %v3728_v42, %v3731_v39  ;;  %v3738_v34 = vsel %vm7327_vm14, %v3736_v58, %v3737_v55  ;;  %v3748_v15 = vrot.slane %v7982_v16, 5  ;;  %v3751_v16 = vrot.slane %v7986_v21, 5  ;;  %v3707_v39 = vld [vmem:[#allocation2 + $0x48] sm:$0xe] }
 0x310   : > { %6457 = vmatprep.mubr.bf16.mxu0 %v5730_v17  ;;  %v3735_v2 = vsel %vm7327_vm14, %v5747_v27, %v3734_v9  ;;  %v3706_v9 = vld [vmem:[#allocation2 + $0x3c] sm:$0xe]  ;;  %v3771_v7 = vrot.slane %v3769_v56, 4  ;;  %v3776_v42 = vrot.slane %v8054_v12, 5 }
 0x312   : > { %6456 = vmatpush3.bf16.msra.mxu0 %v6817_v20  ;;  %v3703_v20 = vld [vmem:[#allocation2 + $0x18] sm:$0xe]  ;;  %v3778_v55 = vrot.slane %v3776_v42, 4 }
 0x313   : > { %6473 = vmatprep.subr.bf16.mxu0 %v6818_v33  ;;  %v5748_v17 = vrot.slane %v3703_v20, 9  ;;  %v3779_v20 = vrot.slane %v8064_v54, 5  ;;  %v6835_v54 = vld [vmem:[%s8613_s3 + $0x110] sm:$0xff]  }
 0x315   : > { %v3742_v59 = vsel %vm7327_vm14, %v5748_v17, %v3741_v18  ;;  %v3772_v18 = vrot.slane %v8045_v37, 5  ;;  %v3708_v37 = vld [vmem:[#allocation2 + $0x54] sm:$0xe]  ;;  %v3780_v12 = vsel %vm7327_vm14, %v3778_v55, %v3779_v20  ;;  %v6834_v17 = vld [vmem:[%s8613_s3 + $0x108] sm:$0xff]  }
 0x317   : > { %6458 = vmatmul.mubr.bf16.vlgmr.msra.gmra.mrb[16].mxu0 %v5731_v0  ;;  %v3755_v0 = vrot.slane %v8000_v11, 5 }
 0x318   : > { %6474 = vmatpush3.bf16.msra.mxu0 %v6818_v33  ;;  %6461 = vmatprep.mubr.bf16.mxu0 %v5732_v45  ;;  %v3745_v33 = vsel %vm7327_vm14, %v3743_v47, %v3744_v40  ;;  %v5753_v40 = vrot.slane %v3708_v37, 9 }
 0x319   : > { %6475 = vmatprep.subr.bf16.mxu0 %v6821_v53  ;;  %v5772_v45 = vcombine.low %v3742_v59, %v3745_v33  ;;  %v6836_v33 = vld [vmem:[%s8613_s3 + $0x118] sm:$0xff]  }
 0x31a   : > { %v3777_v27 = vsel %vm7327_vm14, %v5753_v40, %v3776_v42  ;;  %v6840_v59 = vld [vmem:[%s8613_s3 + $0x138] sm:$0xff]  }
 0x31c   : > { %6476 = vmatpush3.bf16.msra.mxu0 %v6821_v53  ;;  %v5771_v53 = vcombine.low %v3735_v2, %v3738_v34  ;;  %v5777_v34 = vcombine.low %v3777_v27, %v3780_v12  ;;  %v6838_v2 = vld [vmem:[%s8613_s3 + $0x128] sm:$0xff]  }
 0x31d   : > { %6477 = vmatprep.subr.bf16.mxu0 %v6822_v13 }
 0x31f   : > { %6462 = vmatmul.mubr.bf16.gmra.mrb[20].mxu0 %v5733_v62  ;;  %v3704_v62 = vld [vmem:[#allocation2 + $0x24] sm:$0xe] }
 0x320   : > { %6478 = vmatpush3.bf16.msra.mxu0 %v6822_v13  ;;  %6465 = vmatprep.mubr.bf16.mxu0 %v5734_v48  ;;  %v3750_v13 = vrot.slane %v3748_v15, 4  ;;  %v3705_v48 = vld [vmem:[#allocation2 + $0x30] sm:$0xe]  ;;  %v5749_v11 = vrot.slane %v3704_v62, 9 }
 0x321   : > { %6479 = vmatprep.subr.bf16.mxu0 %v6825_v50 }
 0x322   : > { %v3752_v1 = vsel %vm7327_vm14, %v3750_v13, %v3751_v16  ;;  %v3749_v61 = vsel %vm7327_vm14, %v5749_v11, %v3748_v15  ;;  %v6833_v15 = vld [vmem:[%s8613_s3 + $0x100] sm:$0xff]  }
 0x323   : > { %6505 = vmatprep.subr.bf16.mxu1 %v6833_v15  ;;  %v8206_v13 = vld [vmem:[%s8612_s2 + $0x1] ss:$0 sm:$0xff] }
 0x324   : > { %6480 = vmatpush3.bf16.msra.mxu0 %v6825_v50  ;;  %v3757_v50 = vrot.slane %v3755_v0, 4  ;;  %6506 = vmatpush3.bf16.msra.mxu1 %v6833_v15 }
 0x325   : > { %6481 = vmatprep.subr.bf16.mxu0 %v6826_v14  ;;  %6507 = vmatprep.subr.bf16.mxu1 %v6834_v17 }
 0x327   : > { %6466 = vmatmul.mubr.bf16.gmra.mrb[24].mxu0 %v5735_v19  ;;  %v3762_v19 = vrot.slane %v8019_v32, 5  ;;  %v3765_v32 = vrot.slane %v8027_v41, 5 }
 0x328   : > { %6482 = vmatpush3.bf16.msra.mxu0 %v6826_v14  ;;  %6469 = vmatprep.mubr.bf16.mxu0 %v5736_v25  ;;  %v3758_v14 = vrot.slane %v8005_v6, 5 }
 0x329   : > { %6483 = vmatprep.subr.bf16.mxu0 %v6829_v46  ;;  %v3764_v28 = vrot.slane %v3762_v19, 4  ;;  %6508 = vmatpush3.bf16.msra.mxu1 %v6834_v17 }
 0x32a   : > { %v3759_v25 = vsel %vm7327_vm14, %v3757_v50, %v3758_v14  ;;  %6509 = vmatprep.subr.bf16.mxu1 %v6835_v54 }
 0x32b   : > { %v3766_v29 = vsel %vm7327_vm14, %v3764_v28, %v3765_v32 }
 0x32c   : > { %6484 = vmatpush3.bf16.msra.mxu0 %v6829_v46  ;;  %v5750_v46 = vrot.slane %v3705_v48, 9 }
 0x32d   : > { %6485 = vmatprep.subr.bf16.mxu0 %v6830_v51  ;;  %6510 = vmatpush3.bf16.msra.mxu1 %v6835_v54 }
 0x32e   : > { %v3756_v21 = vsel %vm7327_vm14, %v5750_v46, %v3755_v0  ;;  %6511 = vmatprep.subr.bf16.mxu1 %v6836_v33  ;;  %v6837_v0 = vld [vmem:[%s8613_s3 + $0x120] sm:$0xff]  }
 0x32f   : > { %6470 = vmatmul.mubr.bf16.gmra.mrb[28].mxu0 %v5737_v8  ;;  %v5774_v6 = vcombine.low %v3756_v21, %v3759_v25  ;;  %v5751_v8 = vrot.slane %v3706_v9, 9 }
 0x330   : > { %6486 = vmatpush3.bf16.msra.mxu0 %v6830_v51  ;;  %6489 = vmatprep.mubr.bf16.mxu0 %v5770_v31  ;;  %v5773_v51 = vcombine.low %v3749_v61, %v3752_v1  ;;  %v3773_v31 = vsel %vm7327_vm14, %v3771_v7, %v3772_v18 }
 0x331   : > { %6487 = vmatprep.subr.bf16.mxu0 %v6832_v60  ;;  %v3763_v58 = vsel %vm7327_vm14, %v5751_v8, %v3762_v19  ;;  %6512 = vmatpush3.bf16.msra.mxu1 %v6836_v33 }
 0x332   : > { %v5775_v43 = vcombine.low %v3763_v58, %v3766_v29  ;;  %6513 = vmatprep.subr.bf16.mxu1 %v6837_v0 }
 0x334   : > { %6488 = vmatpush3.bf16.msra.mxu0 %v6832_v60  ;;  %v5752_v60 = vrot.slane %v3707_v39, 9 }
 0x335   : > { %6514 = vmatpush3.bf16.msra.mxu1 %v6837_v0 }
 0x336   : > { %v3770_v41 = vsel %vm7327_vm14, %v5752_v60, %v3769_v56  ;;  %6515 = vmatprep.subr.bf16.mxu1 %v6838_v2 }
 0x337   : > { %6490 = vmatmul.mubr.bf16.vlgmr.msra.gmra.mrb[16].mxu0 %v5771_v53  ;;  %v5776_v47 = vcombine.low %v3770_v41, %v3773_v31  ;;  %v6839_v53 = vld [vmem:[%s8613_s3 + $0x130] sm:$0xff]  }
 0x338   : > { %6493 = vmatprep.mubr.bf16.mxu0 %v5772_v45  ;;  %v8200_v45 = vld [vmem:[%s8613_s3 + $0xc0] sm:$0xff]  }
 0x339   : > { %6516 = vmatpush3.bf16.msra.mxu1 %v6838_v2 }
 0x33a   : > { %6517 = vmatprep.subr.bf16.mxu1 %v6839_v53 }
 0x33d   : > { %6518 = vmatpush3.bf16.msra.mxu1 %v6839_v53 }
 0x33e   : > { %6519 = vmatprep.subr.bf16.mxu1 %v6840_v59 }
 0x33f   : > { %6494 = vmatmul.mubr.bf16.gmra.mrb[20].mxu0 %v5773_v51 }
 0x340   : > { %6497 = vmatprep.mubr.bf16.mxu0 %v5774_v6 }
 0x341   : > { %6520 = vmatpush3.bf16.msra.mxu1 %v6840_v59 }
 0x342   : > { %6537 = vmatprep.subr.bf16.mxu1 %v8200_v45 }
 0x347   : > { %6498 = vmatmul.mubr.bf16.gmra.mrb[24].mxu0 %v5775_v43 }
 0x348   : > { %6501 = vmatprep.mubr.bf16.mxu0 %v5776_v47 }
 0x34f   : > { %6502 = vmatmul.mubr.bf16.gmra.mrb[28].mxu0 %v5777_v34  ;;  %v4259_v34 = vld [vmem:[#allocation2 + $0xc] sm:$0xf] }
 0x40a   : > { %v6491_v62 = vpop.f32.mrb[16].mxu0 }
 0x40b   : > { %v3999_v50 = vadd.f32 %v6491_v62, %v8206_v13  ;;  %v3912_v16 = vpop.f32.mrb[17].mxu0 }
 0x40c   : > { %v3997_v48 = vadd.f32 %v8206_v13, %v3912_v16  ;;  %v6492_v14 = vpop.f32.mrb[18].mxu0 }
 0x40d   : > { %v5789_v11 = vclamps-f32 %v3999_v50, 1.0  ;;  %v4000_v1 = vadd.f32 %v6492_v14, %v8206_v13  ;;  %v3915_v19 = vpop.f32.mrb[19].mxu0  ;;  %v4263_v50 = vld [vmem:[#allocation2 + $0x14] sm:$0x1] }
 0x40e   : > { %v5787_v46 = vclamps-f32 %v3997_v48, 1.0  ;;  %v3998_v25 = vadd.f32 %v8206_v13, %v3915_v19  ;;  %v4256_v19 = vld [vmem:[#allocation2 + $0x8] sm:$0x1] }
 0x40f   : > { %v6011_v56 = vpack.c.bf16 %v5789_v11, %v5789_v11  ;;  %v5790_v61 = vclamps-f32 %v4000_v1, 1.0 }
 0x410   : > { %v6009_v51 = vpack.c.bf16 %v5787_v46, %v5787_v46  ;;  %v5788_v21 = vclamps-f32 %v3998_v25, 1.0 }
 0x411   : > { %v4111_v6 = vshrl.u32 %v6011_v56, 16  ;;  %v6012_v28 = vpack.c.bf16 %v5790_v61, %v5790_v61  ;;  %v4114_v9 = vshll.u32 %v6011_v56, 16 }
 0x412   : > { %v4094_v7 = vshrl.u32 %v6009_v51, 16  ;;  %v4097_v32 = vshll.u32 %v6009_v51, 16  ;;  %v6010_v39 = vpack.c.bf16 %v5788_v21, %v5788_v21  ;;  %v6495_v18 = vpop.f32.mrb[20].mxu0 }
 0x413   : > { %v4113_v8 = vrot.slane %v4111_v6, 7  ;;  %v4119_v29 = vshrl.u32 %v6012_v28, 16  ;;  %v4122_v42 = vshll.u32 %v6012_v28, 16  ;;  %v4003_v60 = vadd.f32 %v6495_v18, %v8206_v13  ;;  %v3928_v31 = vpop.f32.mrb[21].mxu0 }
 0x414   : > { %v4096_v58 = vrot.slane %v4094_v7, 7  ;;  %v4102_v43 = vshrl.u32 %v6010_v39, 16  ;;  %v4105_v41 = vshll.u32 %v6010_v39, 16  ;;  %v4001_v47 = vadd.f32 %v8206_v13, %v3928_v31  ;;  %v6496_v55 = vpop.f32.mrb[22].mxu0 }
 0x415   : > { %v4116_v37 = vor.u32 %v4114_v9, %v4113_v8  ;;  %v4117_v20 = vrot.slane %v4113_v8, 4  ;;  %v4121_v40 = vrot.slane %v4119_v29, 7  ;;  %v5793_v12 = vclamps-f32 %v4003_v60, 1.0  ;;  %v3931_v27 = vpop.f32.mrb[23].mxu0 }
 0x416   : > { %v4099_v15 = vor.u32 %v4097_v32, %v4096_v58  ;;  %v4100_v17 = vrot.slane %v4096_v58, 4  ;;  %v4104_v54 = vrot.slane %v4102_v43, 7  ;;  %v5791_v33 = vclamps-f32 %v4001_v47, 1.0  ;;  %v4273_v43 = vld [vmem:[#allocation2 + $0x24] sm:$0xf] }
 0x417   : > { %v4260_v0 = vsel %vm6989_vm8, %v4116_v37, %v4259_v34  ;;  %v4124_v2 = vor.u32 %v4122_v42, %v4121_v40  ;;  %v4126_v53 = vrot.slane %v4121_v40, 4  ;;  %v6015_v59 = vpack.c.bf16 %v5793_v12, %v5793_v12  ;;  %v4266_v40 = vld [vmem:[#allocation2 + $0x18] sm:$0xf] }
 0x418   : > { %4261 = vst [vmem:[#allocation2 + $0xc] sm:$0xf] %v4260_v0  ;;  %v4253_v62 = vsel %vm6989_vm8, %v4099_v15, %v7893_v52  ;;  %v4107_v16 = vor.u32 %v4105_v41, %v4104_v54  ;;  %v4109_v48 = vrot.slane %v4104_v54, 4  ;;  %v6013_v14 = vpack.c.bf16 %v5791_v33, %v5791_v33 }
 0x419   : > { %4254 = vst [vmem:[#allocation2] sm:$0xf] %v4253_v62  ;;  %v4125_v11 = vsel %vm6979_vm7, %v4117_v20, %v4124_v2  ;;  %v4264_v1 = vsel %vm6951_vm3, %v4126_v53, %v4263_v50  ;;  %v4145_v46 = vshrl.u32 %v6015_v59, 16  ;;  %v4148_v56 = vshll.u32 %v6015_v59, 16 }
 0x41a   : > { %4262 = vst [vmem:[#allocation2 + $0x10] sm:$0xf] %v4125_v11  ;;  %4265 = vst [vmem:[#allocation2 + $0x14] sm:$0x1] %v4264_v1  ;;  %v4108_v25 = vsel %vm6979_vm7, %v4100_v17, %v4107_v16  ;;  %v4257_v52 = vsel %vm6951_vm3, %v4109_v48, %v4256_v19  ;;  %v4128_v61 = vshrl.u32 %v6013_v14, 16  ;;  %v6499_v51 = vpop.f32.mrb[24].mxu0  ;;  %v4004_v6 = vadd.f32 %v6496_v55, %v8206_v13 }
 0x41b   : > { %4255 = vst [vmem:[#allocation2 + $0x4] sm:$0xf] %v4108_v25  ;;  %4258 = vst [vmem:[#allocation2 + $0x8] sm:$0x1] %v4257_v52  ;;  %v4147_v21 = vrot.slane %v4145_v46, 7  ;;  %v4002_v28 = vadd.f32 %v8206_v13, %v3931_v27  ;;  %v4007_v9 = vadd.f32 %v6499_v51, %v8206_v13  ;;  %v3944_v7 = vpop.f32.mrb[25].mxu0 }
 0x41c   : > { %v4130_v32 = vrot.slane %v4128_v61, 7  ;;  %v4131_v39 = vshll.u32 %v6013_v14, 16  ;;  %v4005_v18 = vadd.f32 %v8206_v13, %v3944_v7  ;;  %v6500_v8 = vpop.f32.mrb[26].mxu0  ;;  %v5794_v60 = vclamps-f32 %v4004_v6, 1.0 }
 0x41d   : > { %v4150_v29 = vor.u32 %v4148_v56, %v4147_v21  ;;  %v4151_v42 = vrot.slane %v4147_v21, 4  ;;  %v5792_v31 = vclamps-f32 %v4002_v28, 1.0  ;;  %v3947_v58 = vpop.f32.mrb[27].mxu0  ;;  %v5797_v37 = vclamps-f32 %v4007_v9, 1.0 }
 0x41e   : > { %v4133_v41 = vor.u32 %v4131_v39, %v4130_v32  ;;  %v4134_v47 = vrot.slane %v4130_v32, 4  ;;  %v5795_v55 = vclamps-f32 %v4005_v18, 1.0  ;;  %v6016_v12 = vpack.c.bf16 %v5794_v60, %v5794_v60  ;;  %v4277_v39 = vld [vmem:[#allocation2 + $0x2c] sm:$0x1]  ;;  %v4270_v18 = vld [vmem:[#allocation2 + $0x20] sm:$0x1] }
 0x41f   : > { %v4274_v20 = vsel %vm6989_vm8, %v4150_v29, %v4273_v43  ;;  %v6014_v27 = vpack.c.bf16 %v5792_v31, %v5792_v31  ;;  %v4008_v34 = vadd.f32 %v6500_v8, %v8206_v13  ;;  %v6019_v17 = vpack.c.bf16 %v5797_v37, %v5797_v37 }
 0x420   : > { %4275 = vst [vmem:[#allocation2 + $0x24] sm:$0xf] %v4274_v20  ;;  %v4267_v15 = vsel %vm6989_vm8, %v4133_v41, %v4266_v40  ;;  %v6017_v54 = vpack.c.bf16 %v5795_v55, %v5795_v55  ;;  %v4006_v33 = vadd.f32 %v8206_v13, %v3947_v58  ;;  %v4153_v0 = vshrl.u32 %v6016_v12, 16  ;;  %v4287_v55 = vld [vmem:[#allocation2 + $0x3c] sm:$0xf] }
 0x421   : > { %4268 = vst [vmem:[#allocation2 + $0x18] sm:$0xf] %v4267_v15  ;;  %v4156_v2 = vshll.u32 %v6016_v12, 16  ;;  %v4136_v53 = vshrl.u32 %v6014_v27, 16  ;;  %v4139_v59 = vshll.u32 %v6014_v27, 16  ;;  %v4179_v62 = vshrl.u32 %v6019_v17, 16 }
 0x422   : > { %v4182_v50 = vshll.u32 %v6019_v17, 16  ;;  %v4162_v16 = vshrl.u32 %v6017_v54, 16  ;;  %v4165_v48 = vshll.u32 %v6017_v54, 16  ;;  %v6503_v14 = vpop.f32.mrb[28].mxu0  ;;  %v4155_v11 = vrot.slane %v4153_v0, 7 }
 0x423   : > { %v4138_v1 = vrot.slane %v4136_v53, 7  ;;  %v5798_v19 = vclamps-f32 %v4008_v34, 1.0  ;;  %v5796_v46 = vclamps-f32 %v4006_v33, 1.0  ;;  %v3960_v25 = vpop.f32.mrb[29].mxu0  ;;  %v8237_v52 = vrot.slane %v4179_v62, 7 }
 0x424   : > { %v8239_v56 = vrot.slane %v4162_v16, 7  ;;  %v4011_v61 = vadd.f32 %v6503_v14, %v8206_v13  ;;  %v4009_v51 = vadd.f32 %v8206_v13, %v3960_v25  ;;  %v6504_v21 = vpop.f32.mrb[30].mxu0  ;;  %v4158_v6 = vor.u32 %v4156_v2, %v4155_v11  ;;  %v4280_v20 = vld [vmem:[#allocation2 + $0x30] sm:$0xf]  ;;  %v8261_v54 = vld [vmem:[#allocation2] sm:$0xf] }
 0x425   : > { %v4160_v28 = vrot.slane %v4155_v11, 4  ;;  %v4141_v9 = vor.u32 %v4139_v59, %v4138_v1  ;;  %v4143_v7 = vrot.slane %v4138_v1, 4  ;;  %v3963_v32 = vpop.f32.mrb[31].mxu0  ;;  %v4184_v8 = vor.u32 %v4182_v50, %v8237_v52 }
 0x426   : > { %v4185_v29 = vrot.slane %v8237_v52, 4  ;;  %v4167_v60 = vor.u32 %v4165_v48, %v8239_v56  ;;  %v4168_v31 = vrot.slane %v8239_v56, 4  ;;  %v4159_v58 = vsel %vm6979_vm7, %v4151_v42, %v4158_v6  ;;  %v4284_v6 = vld [vmem:[#allocation2 + $0x38] sm:$0x1] }
 0x427   : > { %v4278_v43 = vsel %vm6951_vm3, %v4160_v28, %v4277_v39  ;;  %v4142_v41 = vsel %vm6979_vm7, %v4134_v47, %v4141_v9  ;;  %v4271_v37 = vsel %vm6951_vm3, %v4143_v7, %v4270_v18  ;;  %4276 = vst [vmem:[#allocation2 + $0x28] sm:$0xf] %v4159_v58  ;;  %v4288_v40 = vsel %vm6989_vm8, %v4184_v8, %v4287_v55  ;;  %v4301_v58 = vld [vmem:[#allocation2 + $0x54] sm:$0xf] }
 0x428   : > { %4279 = vst [vmem:[#allocation2 + $0x2c] sm:$0x1] %v4278_v43  ;;  %4269 = vst [vmem:[#allocation2 + $0x1c] sm:$0xf] %v4142_v41  ;;  %v4281_v42 = vsel %vm6989_vm8, %v4167_v60, %v4280_v20  ;;  %v6020_v12 = vpack.c.bf16 %v5798_v19, %v5798_v19  ;;  %v6018_v27 = vpack.c.bf16 %v5796_v46, %v5796_v46  ;;  %v5801_v47 = vclamps-f32 %v4011_v61, 1.0 }
 0x429   : > { %4272 = vst [vmem:[#allocation2 + $0x20] sm:$0x1] %v4271_v37  ;;  %4289 = vst [vmem:[#allocation2 + $0x3c] sm:$0xf] %v4288_v40  ;;  %v5799_v34 = vclamps-f32 %v4009_v51, 1.0  ;;  %v4012_v15 = vadd.f32 %v6504_v21, %v8206_v13  ;;  %v4010_v17 = vadd.f32 %v8206_v13, %v3963_v32  ;;  %v4352_v11 = vshrl.u32 %v8261_v54, 16 }
 0x42a   : > { %4282 = vst [vmem:[#allocation2 + $0x30] sm:$0xf] %v4281_v42  ;;  %v4187_v33 = vshrl.u32 %v6020_v12, 16  ;;  %v4190_v0 = vshll.u32 %v6020_v12, 16  ;;  %v4170_v2 = vshrl.u32 %v6018_v27, 16  ;;  %v4173_v53 = vshll.u32 %v6018_v27, 16 }
 0x42b   : > { %v6023_v59 = vpack.c.bf16 %v5801_v47, %v5801_v47  ;;  %v6021_v62 = vpack.c.bf16 %v5799_v34, %v5799_v34  ;;  %v5802_v50 = vclamps-f32 %v4012_v15, 1.0  ;;  %v5800_v16 = vclamps-f32 %v4010_v17, 1.0  ;;  %v4291_v21 = vld [vmem:[#allocation2 + $0x44] sm:$0x1]  ;;  %v4294_v43 = vld [vmem:[#allocation2 + $0x48] sm:$0xf] }
 0x42c   : > { %v4189_v48 = vrot.slane %v4187_v33, 7  ;;  %v4172_v14 = vrot.slane %v4170_v2, 7  ;;  %v4355_v1 = vshll.u32 %v8261_v54, 16  ;;  %v8275_v40 = vld [vmem:[#allocation2 + $0xc] sm:$0xf]  ;;  %v4354_v17 = vrot.slane %v4352_v11, 4 }
 0x42d   : > { %v4213_v19 = vshrl.u32 %v6023_v59, 16  ;;  %v4216_v46 = vshll.u32 %v6023_v59, 16  ;;  %v4196_v25 = vshrl.u32 %v6021_v62, 16  ;;  %v4199_v13 = vshll.u32 %v6021_v62, 16  ;;  %v8277_v47 = vld [vmem:[#allocation2 + $0x8] sm:$0x1] }
 0x42e   : > { %v4192_v52 = vor.u32 %v4190_v0, %v4189_v48  ;;  %v4194_v56 = vrot.slane %v4189_v48, 4  ;;  %v4175_v61 = vor.u32 %v4173_v53, %v4172_v14  ;;  %v4177_v51 = vrot.slane %v4172_v14, 4  ;;  %v4305_v62 = vld [vmem:[#allocation2 + $0x5c] sm:$0x1] }
 0x42f   : > { %v4215_v28 = vrot.slane %v4213_v19, 7  ;;  %v4198_v9 = vrot.slane %v4196_v25, 7  ;;  %v6024_v7 = vpack.c.bf16 %v5802_v50, %v5802_v50  ;;  %v6022_v32 = vpack.c.bf16 %v5800_v16, %v5800_v16  ;;  %v4298_v50 = vld [vmem:[#allocation2 + $0x50] sm:$0x1] }
 0x430   : > { %v4193_v39 = vsel %vm6979_vm7, %v4185_v29, %v4192_v52  ;;  %v4292_v18 = vsel %vm6951_vm3, %v4194_v56, %v4291_v21  ;;  %v4176_v8 = vsel %vm6979_vm7, %v4168_v31, %v4175_v61  ;;  %v4285_v60 = vsel %vm6951_vm3, %v4177_v51, %v4284_v6  ;;  %v8273_v29 = vld [vmem:[#allocation2 + $0x4] sm:$0xf]  ;;  %v8288_v25 = vld [vmem:[#allocation2 + $0x10] sm:$0xf]  ;;  %v8292_v21 = vld [vmem:[#allocation2 + $0x18] sm:$0xf] }
 0x431   : > { %4290 = vst [vmem:[#allocation2 + $0x40] sm:$0xf] %v4193_v39  ;;  %4293 = vst [vmem:[#allocation2 + $0x44] sm:$0x1] %v4292_v18  ;;  %v4218_v41 = vor.u32 %v4216_v46, %v4215_v28  ;;  %v4219_v37 = vrot.slane %v4215_v28, 4  ;;  %v4201_v55 = vor.u32 %v4199_v13, %v4198_v9  ;;  %v4202_v20 = vrot.slane %v4198_v9, 4 }
 0x432   : > { %4283 = vst [vmem:[#allocation2 + $0x34] sm:$0xf] %v4176_v8  ;;  %4286 = vst [vmem:[#allocation2 + $0x38] sm:$0x1] %v4285_v60  ;;  %v4221_v42 = vshrl.u32 %v6024_v7, 16  ;;  %v4224_v12 = vshll.u32 %v6024_v7, 16 }
 0x433   : > { %v4204_v31 = vshrl.u32 %v6022_v32, 16  ;;  %v4207_v27 = vshll.u32 %v6022_v32, 16  ;;  %v4302_v34 = vsel %vm6989_vm8, %v4218_v41, %v4301_v58  ;;  %v4295_v15 = vsel %vm6989_vm8, %v4201_v55, %v4294_v43  ;;  %v8290_v13 = vld [vmem:[#allocation2 + $0x14] sm:$0x1]  ;;  %v8302_v32 = vld [vmem:[#allocation2 + $0x1c] sm:$0xf] }
 0x434   : > { %v4357_v33 = vrot.slane %v4355_v1, 5  ;;  %4303 = vst [vmem:[#allocation2 + $0x54] sm:$0xf] %v4302_v34  ;;  %4296 = vst [vmem:[#allocation2 + $0x48] sm:$0xf] %v4295_v15  ;;  %v4223_v0 = vrot.slane %v4221_v42, 7 }
 0x435   : > { %v4206_v2 = vrot.slane %v4204_v31, 7  ;;  %v4361_v53 = vshll.u32 %v8273_v29, 16  ;;  %v4365_v59 = vshrl.u32 %v8273_v29, 16  ;;  %v4371_v48 = vshll.u32 %v8277_v47, 16  ;;  %v8310_v55 = vld [vmem:[#allocation2 + $0x20] sm:$0x1] }
 0x436   : > { %v4358_v16 = vor.u32 %v4357_v33, %v4354_v17  ;;  %v4376_v14 = vshrl.u32 %v8275_v40, 16  ;;  %v4379_v35 = vshll.u32 %v8275_v40, 16  ;;  %v4226_v19 = vor.u32 %v4224_v12, %v4223_v0  ;;  %v8314_v15 = vld [vmem:[#allocation2 + $0x24] sm:$0xf] }
 0x437   : > { %v4228_v11 = vrot.slane %v4223_v0, 4  ;;  %v4209_v1 = vor.u32 %v4207_v27, %v4206_v2  ;;  %v4211_v46 = vrot.slane %v4206_v2, 4  ;;  %v4363_v56 = vrot.slane %v4361_v53, 5  ;;  %v8318_v53 = vld [vmem:[#allocation2 + $0x28] sm:$0xf] }
 0x438   : > { %v4359_v52 = vrot.slane %v4358_v16, 4  ;;  %v4367_v61 = vrot.slane %v4365_v59, 4  ;;  %v4373_v51 = vrot.slane %v4371_v48, 5  ;;  %v4227_v6 = vsel %vm6979_vm7, %v4219_v37, %v4226_v19 }
 0x439   : > { %v4306_v28 = vsel %vm6951_vm3, %v4228_v11, %v4305_v62  ;;  %v4210_v9 = vsel %vm6979_vm7, %v4202_v20, %v4209_v1  ;;  %v4299_v7 = vsel %vm6951_vm3, %v4211_v46, %v4298_v50  ;;  %4304 = vst [vmem:[#allocation2 + $0x58] sm:$0xf] %v4227_v6  ;;  %v4378_v8 = vrot.slane %v4376_v14, 4 }
 0x43a   : > { %4307 = vst [vmem:[#allocation2 + $0x5c] sm:$0x1] %v4306_v28  ;;  %4297 = vst [vmem:[#allocation2 + $0x4c] sm:$0xf] %v4210_v9  ;;  %v4364_v39 = vsel %vm7079_vm11, %v4359_v52, %v4363_v56  ;;  %v4368_v18 = vor.u32 %v4367_v61, %v4363_v56  ;;  %v4381_v60 = vrot.slane %v4379_v35, 5  ;;  %v4385_v58 = vshll.u32 %v8288_v25, 16 }
 0x43b   : > { %4300 = vst [vmem:[#allocation2 + $0x50] sm:$0x1] %v4299_v7  ;;  %v4389_v24 = vshrl.u32 %v8288_v25, 16  ;;  %v4395_v43 = vshll.u32 %v8290_v13, 16  ;;  %v4400_v5 = vshrl.u32 %v8292_v21, 16  ;;  %v4403_v20 = vshll.u32 %v8292_v21, 16 }
 0x43c   : > { %v4369_v41 = vrot.slane %v4368_v18, 4  ;;  %v4382_v37 = vor.u32 %v4381_v60, %v4378_v8  ;;  %v4409_v42 = vshll.u32 %v8302_v32, 16  ;;  %v4387_v12 = vrot.slane %v4385_v58, 5  ;;  %v8324_v35 = vld [vmem:[#allocation2 + $0x2c] sm:$0x1] }
 0x43d   : > { %v4391_v31 = vrot.slane %v4389_v24, 4  ;;  %v4397_v27 = vrot.slane %v4395_v43, 5  ;;  %v4402_v34 = vrot.slane %v4400_v5, 4  ;;  %v4405_v0 = vrot.slane %v4403_v20, 5  ;;  %v8330_v9 = vld [vmem:[#allocation2 + $0x30] sm:$0xf] }
 0x43e   : > { %v4374_v17 = vsel %vm7079_vm11, %v4369_v41, %v4373_v51  ;;  %v4383_v33 = vrot.slane %v4382_v37, 4  ;;  %v4411_v2 = vrot.slane %v4409_v42, 5  ;;  %v4413_v50 = vshrl.u32 %v8302_v32, 16  ;;  %v8335_v60 = vld [vmem:[#allocation2 + $0x34] sm:$0xf]  ;;  %v6842_v24 = vld [vmem:[%s8613_s3 + $0xc8] sm:$0xff]  }
 0x43f   : > { %v5852_v59 = vcombine.low %v4364_v39, %v4374_v17  ;;  %v4392_v62 = vor.u32 %v4391_v31, %v4387_v12  ;;  %v4419_v16 = vshll.u32 %v8310_v55, 16  ;;  %v4406_v14 = vor.u32 %v4405_v0, %v4402_v34  ;;  %v8342_v37 = vld [vmem:[#allocation2 + $0x38] sm:$0x1]  ;;  %v8348_v0 = vld [vmem:[#allocation2 + $0x3c] sm:$0xf] }
 0x440   : > { %v4388_v48 = vsel %vm7079_vm11, %v4383_v33, %v4387_v12  ;;  %v4424_v19 = vshrl.u32 %v8314_v15, 16  ;;  %v4427_v11 = vshll.u32 %v8314_v15, 16  ;;  %v4415_v46 = vrot.slane %v4413_v50, 4 }
 0x441   : > { %6521 = vmatprep.mubr.bf16.mxu1 %v5852_v59  ;;  %v4393_v1 = vrot.slane %v4392_v62, 4  ;;  %v4421_v52 = vrot.slane %v4419_v16, 5  ;;  %v4433_v56 = vshll.u32 %v8318_v53, 16  ;;  %v4407_v61 = vrot.slane %v4406_v14, 4  ;;  %v8354_v16 = vld [vmem:[#allocation2 + $0x40] sm:$0xf] }
 0x442   : > { %v4426_v51 = vrot.slane %v4424_v19, 4  ;;  %v4429_v6 = vrot.slane %v4427_v11, 5  ;;  %v4437_v28 = vshrl.u32 %v8318_v53, 16  ;;  %v4416_v39 = vor.u32 %v4415_v46, %v4411_v2  ;;  %v6843_v14 = vld [vmem:[%s8613_s3 + $0xd0] sm:$0xff]  }
 0x443   : > { %v4398_v7 = vsel %vm7079_vm11, %v4393_v1, %v4397_v27  ;;  %v4435_v18 = vrot.slane %v4433_v56, 5  ;;  %v4443_v8 = vshll.u32 %v8324_v35, 16  ;;  %v4412_v43 = vsel %vm7079_vm11, %v4407_v61, %v4411_v2  ;;  %v8361_v56 = vld [vmem:[#allocation2 + $0x44] sm:$0x1] }
 0x444   : > { %v5853_v58 = vcombine.low %v4388_v48, %v4398_v7  ;;  %v4430_v5 = vor.u32 %v4429_v6, %v4426_v51  ;;  %v4439_v41 = vrot.slane %v4437_v28, 4  ;;  %v4417_v20 = vrot.slane %v4416_v39, 4  ;;  %v8369_v39 = vld [vmem:[#allocation2 + $0x48] sm:$0xf] }
 0x445   : > { %v4445_v42 = vrot.slane %v4443_v8, 5  ;;  %v4448_v12 = vshrl.u32 %v8330_v9, 16  ;;  %v4451_v31 = vshll.u32 %v8330_v9, 16  ;;  %v4457_v17 = vshll.u32 %v8335_v60, 16 }
 0x446   : > { %6522 = vmatmul.mubr.bf16.vlgmr.msra.gmra.mrb[16].mxu1 %v5853_v58  ;;  %v4431_v27 = vrot.slane %v4430_v5, 4  ;;  %v4440_v34 = vor.u32 %v4439_v41, %v4435_v18  ;;  %v4461_v33 = vshrl.u32 %v8335_v60, 16  ;;  %v4422_v2 = vsel %vm7079_vm11, %v4417_v20, %v4421_v52  ;;  %v8371_v5 = vld [vmem:[#allocation2 + $0x4c] sm:$0xf]  ;;  %v6844_v41 = vld [vmem:[%s8613_s3 + $0xd8] sm:$0xff]  }
 0x447   : > { %6538 = vmatpush3.bf16.msra.mxu1 %v8200_v45  ;;  %v4450_v59 = vrot.slane %v4448_v12, 4  ;;  %v4453_v62 = vrot.slane %v4451_v31, 5  ;;  %v4467_v50 = vshll.u32 %v8342_v37, 16  ;;  %v5854_v48 = vcombine.low %v4412_v43, %v4422_v2 }
 0x448   : > { %6539 = vmatprep.subr.bf16.mxu1 %v6842_v24  ;;  %v4436_v19 = vsel %vm7079_vm11, %v4431_v27, %v4435_v18  ;;  %v4441_v11 = vrot.slane %v4440_v34, 4  ;;  %v4459_v45 = vrot.slane %v4457_v17, 5  ;;  %v4463_v46 = vrot.slane %v4461_v33, 4 }
 0x449   : > { %v4454_v1 = vor.u32 %v4453_v62, %v4450_v59  ;;  %v4469_v52 = vrot.slane %v4467_v50, 5  ;;  %v4472_v61 = vshrl.u32 %v8348_v0, 16  ;;  %6525 = vmatprep.mubr.bf16.mxu1 %v5854_v48  ;;  %v4475_v6 = vshll.u32 %v8348_v0, 16  ;;  %v8381_v62 = vld [vmem:[#allocation2 + $0x50] sm:$0x1] }
 0x44a   : > { %v4446_v51 = vsel %vm7079_vm11, %v4441_v11, %v4445_v42  ;;  %v4481_v28 = vshll.u32 %v8354_v16, 16  ;;  %v4485_v7 = vshrl.u32 %v8354_v16, 16  ;;  %v4464_v58 = vor.u32 %v4463_v46, %v4459_v45  ;;  %v8384_v48 = vld [vmem:[#allocation2 + $0x54] sm:$0xf]  ;;  %v8389_v46 = vld [vmem:[#allocation2 + $0x58] sm:$0xf] }
 0x44b   : > { %6540 = vmatpush3.bf16.msra.mxu1 %v6842_v24  ;;  %v5855_v18 = vcombine.low %v4436_v19, %v4446_v51  ;;  %v4455_v8 = vrot.slane %v4454_v1, 4  ;;  %v4474_v43 = vrot.slane %v4472_v61, 4  ;;  %v4477_v20 = vrot.slane %v4475_v6, 5  ;;  %v6845_v51 = vld [vmem:[%s8613_s3 + $0xe0] sm:$0xff]  }
 0x44c   : > { %6541 = vmatprep.subr.bf16.mxu1 %v6843_v14  ;;  %v4483_v42 = vrot.slane %v4481_v28, 5  ;;  %v4487_v12 = vrot.slane %v4485_v7, 4  ;;  %v4491_v31 = vshll.u32 %v8361_v56, 16  ;;  %v4465_v24 = vrot.slane %v4464_v58, 4 }
 0x44d   : > { %v4460_v27 = vsel %vm7079_vm11, %v4455_v8, %v4459_v45  ;;  %v4496_v34 = vshrl.u32 %v8369_v39, 16  ;;  %v4499_v17 = vshll.u32 %v8369_v39, 16  ;;  %v4478_v33 = vor.u32 %v4477_v20, %v4474_v43 }
 0x44e   : > { %6526 = vmatmul.mubr.bf16.gmra.mrb[20].mxu1 %v5855_v18  ;;  %v4488_v2 = vor.u32 %v4487_v12, %v4483_v42  ;;  %v4493_v59 = vrot.slane %v4491_v31, 5  ;;  %v4505_v50 = vshll.u32 %v8371_v5, 16  ;;  %v4470_v19 = vsel %vm7079_vm11, %v4465_v24, %v4469_v52 }
 0x44f   : > { %6542 = vmatpush3.bf16.msra.mxu1 %v6843_v14  ;;  %v4498_v11 = vrot.slane %v4496_v34, 4  ;;  %v4501_v45 = vrot.slane %v4499_v17, 5  ;;  %v4509_v1 = vshrl.u32 %v8371_v5, 16  ;;  %v5856_v61 = vcombine.low %v4460_v27, %v4470_v19  ;;  %v8402_v34 = vld [vmem:[#allocation2 + $0x5c] sm:$0x1]  ;;  %v6846_v17 = vld [vmem:[%s8613_s3 + $0xe8] sm:$0xff]  }
 0x450   : > { %6543 = vmatprep.subr.bf16.mxu1 %v6844_v41  ;;  %v4479_v6 = vrot.slane %v4478_v33, 4  ;;  %v4489_v28 = vrot.slane %v4488_v2, 4  ;;  %v4507_v7 = vrot.slane %v4505_v50, 5  ;;  %v4515_v8 = vshll.u32 %v8381_v62, 16 }
 0x451   : > { %v4502_v18 = vor.u32 %v4501_v45, %v4498_v11  ;;  %v4511_v14 = vrot.slane %v4509_v1, 4  ;;  %v4520_v52 = vshrl.u32 %v8384_v48, 16  ;;  %6529 = vmatprep.mubr.bf16.mxu1 %v5856_v61  ;;  %v4523_v20 = vshll.u32 %v8384_v48, 16 }
 0x452   : > { %v4484_v58 = vsel %vm7079_vm11, %v4479_v6, %v4483_v42  ;;  %v4494_v43 = vsel %vm7079_vm11, %v4489_v28, %v4493_v59  ;;  %v4529_v12 = vshll.u32 %v8389_v46, 16  ;;  %v4533_v59 = vshrl.u32 %v8389_v46, 16  ;;  %v4930_v6 = vld [vmem:[#allocation2] sm:$0xe] }
 0x453   : > { %6544 = vmatpush3.bf16.msra.mxu1 %v6844_v41  ;;  %v5857_v31 = vcombine.low %v4484_v58, %v4494_v43  ;;  %v4503_v27 = vrot.slane %v4502_v18, 4  ;;  %v4512_v24 = vor.u32 %v4511_v14, %v4507_v7  ;;  %v4522_v33 = vrot.slane %v4520_v52, 4  ;;  %v6847_v18 = vld [vmem:[%s8613_s3 + $0xf0] sm:$0xff]   ;;  %v4931_v52 = vld [vmem:[#allocation2 + $0xc] sm:$0xe] }
 0x454   : > { %6545 = vmatprep.subr.bf16.mxu1 %v6845_v51  ;;  %v4525_v42 = vrot.slane %v4523_v20, 5  ;;  %v4531_v2 = vrot.slane %v4529_v12, 5  ;;  %v4517_v19 = vrot.slane %v4515_v8, 5  ;;  %v4535_v41 = vrot.slane %v4533_v59, 4 }
 0x455   : > { %v4513_v50 = vrot.slane %v4512_v24, 4  ;;  %v4539_v45 = vshll.u32 %v8402_v34, 16  ;;  %v4508_v1 = vsel %vm7079_vm11, %v4503_v27, %v4507_v7  ;;  %v5868_v58 = vcombine.low %v8261_v54, %v8273_v29 }
 0x456   : > { %6530 = vmatmul.mubr.bf16.gmra.mrb[24].mxu1 %v5857_v31  ;;  %v4526_v11 = vor.u32 %v4525_v42, %v4522_v33  ;;  %v4536_v8 = vor.u32 %v4535_v41, %v4531_v2  ;;  %v5884_v12 = vrot.slane %v4930_v6, 9  ;;  %v4932_v31 = vld [vmem:[#allocation2 + $0x18] sm:$0xe]  ;;  %v4959_v24 = vrot.slane %v8277_v47, 5 }
 0x457   : > { %6546 = vmatpush3.bf16.msra.mxu1 %v6845_v51  ;;  %v4518_v61 = vsel %vm7079_vm11, %v4513_v50, %v4517_v19  ;;  %v4956_v51 = vrot.slane %v8273_v29, 5  ;;  %v4541_v20 = vrot.slane %v4539_v45, 5  ;;  %v5885_v33 = vrot.slane %v4931_v52, 9  ;;  %v6849_v47 = vld [vmem:[%s8613_s3 + $0xf8] sm:$0xff]  }
 0x458   : > { %6547 = vmatprep.subr.bf16.mxu1 %v6846_v17  ;;  %v5858_v28 = vcombine.low %v4508_v1, %v4518_v61  ;;  %v4527_v14 = vrot.slane %v4526_v11, 4  ;;  %v4537_v43 = vrot.slane %v4536_v8, 4  ;;  %v4963_v42 = vrot.slane %v8288_v25, 5  ;;  %v4933_v11 = vld [vmem:[#allocation2 + $0x24] sm:$0xe] }
 0x459   : > { %v4958_v27 = vrot.slane %v4956_v51, 4  ;;  %v8427_v29 = vsel %vm7327_vm14, %v5884_v12, %v4956_v51  ;;  %v4970_v59 = vrot.slane %v8302_v32, 5  ;;  %v5886_v4 = vrot.slane %v4932_v31, 9  ;;  %v4934_v61 = vld [vmem:[#allocation2 + $0x30] sm:$0xe] }
 0x45a   : > { %6533 = vmatprep.mubr.bf16.mxu1 %v5858_v28  ;;  %v4532_v7 = vsel %vm7079_vm11, %v4527_v14, %v4531_v2  ;;  %v4542_v54 = vsel %vm7079_vm11, %v4537_v43, %v4541_v20  ;;  %v4966_v2 = vrot.slane %v8290_v13, 5  ;;  %v4965_v19 = vrot.slane %v4963_v42, 4  ;;  %v4935_v51 = vld [vmem:[#allocation2 + $0x3c] sm:$0xe] }
 0x45b   : > { %6548 = vmatpush3.bf16.msra.mxu1 %v6846_v17  ;;  %v5859_v50 = vcombine.low %v4532_v7, %v4542_v54  ;;  %v8436_v17 = vsel %vm7327_vm14, %v4958_v27, %v4959_v24  ;;  %v5869_v41 = vcombine.low %v8275_v40, %v8288_v25  ;;  %v4972_v45 = vrot.slane %v4970_v59, 4  ;;  %v6850_v7 = vld [vmem:[%s8613_s3 + $0x140] sm:$0xff]  }
 0x45c   : > { %6549 = vmatprep.subr.bf16.mxu1 %v6847_v18  ;;  %v5908_v13 = vcombine.low %v8427_v29, %v8436_v17  ;;  %v4973_v1 = vrot.slane %v8310_v55, 5  ;;  %v8445_v6 = vsel %vm7327_vm14, %v5885_v33, %v4963_v42  ;;  %v8449_v28 = vsel %vm7327_vm14, %v4965_v19, %v4966_v2  ;;  %v4936_v33 = vld [vmem:[#allocation2 + $0x48] sm:$0xe] }
 0x45d   : > { %v8453_v14 = vsel %vm7327_vm14, %v5886_v4, %v4970_v59  ;;  %v4977_v40 = vrot.slane %v8318_v53, 5  ;;  %v5909_v25 = vcombine.low %v8445_v6, %v8449_v28  ;;  %v5887_v8 = vrot.slane %v4933_v11, 9  ;;  %v6853_v4 = vld [vmem:[%s8613_s3 + $0x148] sm:$0xff]  }
 0x45e   : > { %6534 = vmatmul.mubr.bf16.gmra.mrb[28].mxu1 %v5859_v50  ;;  %v8460_v55 = vsel %vm7327_vm14, %v4972_v45, %v4973_v1  ;;  %v4984_v52 = vrot.slane %v8335_v60, 5  ;;  %v4980_v43 = vrot.slane %v8324_v35, 5  ;;  %v5888_v20 = vrot.slane %v4934_v61, 9  ;;  %v4937_v61 = vld [vmem:[#allocation2 + $0x54] sm:$0xe] }
 0x45f   : > { %6550 = vmatpush3.bf16.msra.mxu1 %v6847_v18  ;;  %6553 = vmatprep.mubr.bf16.mxu1 %v5868_v58  ;;  %v5910_v18 = vcombine.low %v8453_v14, %v8460_v55  ;;  %v4979_v58 = vrot.slane %v4977_v40, 4  ;;  %v8471_v12 = vsel %vm7327_vm14, %v5887_v8, %v4977_v40  ;;  %v4987_v27 = vrot.slane %v8342_v37, 5 }
 0x460   : > { %6551 = vmatprep.subr.bf16.mxu1 %v6849_v47  ;;  %v4986_v31 = vrot.slane %v4984_v52, 4  ;;  %v4991_v24 = vrot.slane %v8354_v16, 5  ;;  %v8481_v54 = vsel %vm7327_vm14, %v5888_v20, %v4984_v52  ;;  %v5889_v35 = vrot.slane %v4935_v51, 9 }
 0x461   : > { %v8477_v42 = vsel %vm7327_vm14, %v4979_v58, %v4980_v43  ;;  %v4998_v2 = vrot.slane %v8371_v5, 5  ;;  %v4994_v19 = vrot.slane %v8361_v56, 5  ;;  %v5890_v45 = vrot.slane %v4936_v33, 9 }
 0x462   : > { %v5911_v59 = vcombine.low %v8471_v12, %v8477_v42  ;;  %v4988_v37 = vsel %vm7327_vm14, %v4986_v31, %v4987_v27  ;;  %v4993_v50 = vrot.slane %v4991_v24, 4  ;;  %v5870_v40 = vcombine.low %v8292_v21, %v8302_v32  ;;  %v6854_v12 = vld [vmem:[%s8613_s3 + $0x150] sm:$0xff]  }
 0x463   : > { %6552 = vmatpush3.bf16.msra.mxu1 %v6849_v47  ;;  %v5912_v11 = vcombine.low %v8481_v54, %v4988_v37  ;;  %v5000_v1 = vrot.slane %v4998_v2, 4  ;;  %v5001_v47 = vrot.slane %v8381_v62, 5  ;;  %v4992_v8 = vsel %vm7327_vm14, %v5889_v35, %v4991_v24 }
 0x464   : > { %6569 = vmatprep.subr.bf16.mxu1 %v6850_v7  ;;  %v4995_v56 = vsel %vm7327_vm14, %v4993_v50, %v4994_v19  ;;  %v5005_v52 = vrot.slane %v8389_v46, 5  ;;  %v4999_v58 = vsel %vm7327_vm14, %v5890_v45, %v4998_v2  ;;  %v5891_v21 = vrot.slane %v4937_v61, 9 }
 0x465   : > { %v5913_v51 = vcombine.low %v4992_v8, %v4995_v56  ;;  %v5002_v62 = vsel %vm7327_vm14, %v5000_v1, %v5001_v47  ;;  %v5008_v20 = vrot.slane %v8402_v34, 5  ;;  %v6857_v34 = vld [vmem:[%s8613_s3 + $0x158] sm:$0xff]   ;;  %v5872_v24 = vcombine.low %v8330_v9, %v8335_v60  ;;  %v6862_v60 = vld [vmem:[%s8613_s3 + $0x170] sm:$0xff]  }
 0x466   : > { %6554 = vmatmul.mubr.bf16.vlgmr.msra.gmra.mrb[16].mxu1 %v5869_v41  ;;  %v5914_v43 = vcombine.low %v4999_v58, %v5002_v62  ;;  %v5007_v32 = vrot.slane %v5005_v52, 4  ;;  %v5006_v41 = vsel %vm7327_vm14, %v5891_v21, %v5005_v52  ;;  %v5874_v9 = vcombine.low %v8369_v39, %v8371_v5  ;;  %v8550_v39 = vld [vmem:[%s8614_s4 + $0x1] ss:$0 sm:$0xff] }
 0x467   : > { %6570 = vmatpush3.bf16.msra.mxu1 %v6850_v7  ;;  %6557 = vmatprep.mubr.bf16.mxu1 %v5870_v40  ;;  %v5871_v7 = vcombine.low %v8314_v15, %v8318_v53  ;;  %v5873_v15 = vcombine.low %v8348_v0, %v8354_v16  ;;  %v6861_v53 = vld [vmem:[%s8613_s3 + $0x168] sm:$0xff]   ;;  %v5875_v0 = vcombine.low %v8384_v48, %v8389_v46  ;;  %v6864_v16 = vld [vmem:[%s8613_s3 + $0x178] sm:$0xff]  }
 0x468   : > { %6571 = vmatprep.subr.bf16.mxu1 %v6853_v4  ;;  %v5009_v31 = vsel %vm7327_vm14, %v5007_v32, %v5008_v20 }
 0x469   : > { %v5915_v27 = vcombine.low %v5006_v41, %v5009_v31 }
 0x46b   : > { %6572 = vmatpush3.bf16.msra.mxu1 %v6853_v4 }
 0x46c   : > { %6573 = vmatprep.subr.bf16.mxu1 %v6854_v12 }
 0x46e   : > { %6558 = vmatmul.mubr.bf16.gmra.mrb[20].mxu1 %v5871_v7 }
 0x46f   : > { %6574 = vmatpush3.bf16.msra.mxu1 %v6854_v12  ;;  %6561 = vmatprep.mubr.bf16.mxu1 %v5872_v24 }
 0x470   : > { %6575 = vmatprep.subr.bf16.mxu1 %v6857_v34 }
 0x473   : > { %6576 = vmatpush3.bf16.msra.mxu1 %v6857_v34 }
 0x474   : > { %6577 = vmatprep.subr.bf16.mxu1 %v6858_v57 }
 0x476   : > { %6562 = vmatmul.mubr.bf16.gmra.mrb[24].mxu1 %v5873_v15 }
 0x477   : > { %6578 = vmatpush3.bf16.msra.mxu1 %v6858_v57  ;;  %6565 = vmatprep.mubr.bf16.mxu1 %v5874_v9 }
 0x478   : > { %6579 = vmatprep.subr.bf16.mxu1 %v6861_v53 }
 0x47b   : > { %6580 = vmatpush3.bf16.msra.mxu1 %v6861_v53 }
 0x47c   : > { %6581 = vmatprep.subr.bf16.mxu1 %v6862_v60 }
 0x47e   : > { %6566 = vmatmul.mubr.bf16.gmra.mrb[28].mxu1 %v5875_v0 }
 0x47f   : > { %6582 = vmatpush3.bf16.msra.mxu1 %v6862_v60  ;;  %6585 = vmatprep.mubr.bf16.mxu1 %v5908_v13  ;;  %v8638_v60 = vld [vmem:[#allocation3_spill] sm:$0xff] }
 0x480   : > { %6583 = vmatprep.subr.bf16.mxu1 %v6864_v16 }
 0x483   : > { %6584 = vmatpush3.bf16.msra.mxu1 %v6864_v16 }
 0x486   : > { %6586 = vmatmul.mubr.bf16.vlgmr.msra.gmra.mrb[16].mxu1 %v5909_v25 }
 0x487   : > { %6589 = vmatprep.mubr.bf16.mxu1 %v5910_v18 }
 0x48e   : > { %6590 = vmatmul.mubr.bf16.gmra.mrb[20].mxu1 %v5911_v59 }
 0x48f   : > { %6593 = vmatprep.mubr.bf16.mxu1 %v5912_v11 }
 0x496   : > { %6594 = vmatmul.mubr.bf16.gmra.mrb[24].mxu1 %v5913_v51 }
 0x497   : > { %6597 = vmatprep.mubr.bf16.mxu1 %v5914_v43 }
 0x49e   : > { %6598 = vmatmul.mubr.bf16.gmra.mrb[28].mxu1 %v5915_v27 }
 0x559   : > { %v6587_v5 = vpop.f32.mrb[16].mxu1 }
 0x55a   : > { %v5228_v48 = vadd.f32 %v6587_v5, %v8550_v39  ;;  %v5141_v46 = vpop.f32.mrb[17].mxu1 }
 0x55b   : > { %v5226_v29 = vadd.f32 %v8550_v39, %v5141_v46  ;;  %v6588_v17 = vpop.f32.mrb[18].mxu1 }
 0x55c   : > { %v5927_v13 = vclamps-f32 %v5228_v48, 1.0  ;;  %v5229_v6 = vadd.f32 %v6588_v17, %v8550_v39  ;;  %v5144_v28 = vpop.f32.mrb[19].mxu1 }
 0x55d   : > { %v5925_v14 = vclamps-f32 %v5226_v29, 1.0  ;;  %v5227_v25 = vadd.f32 %v8550_v39, %v5144_v28 }
 0x55e   : > { %v5276_v55 = vadd.f32 %v5927_v13, %v7778_v10  ;;  %v5928_v18 = vclamps-f32 %v5229_v6, 1.0 }
 0x55f   : > { %v5274_v33 = vadd.f32 %v5925_v14, %v7781_v3  ;;  %v5926_v42 = vclamps-f32 %v5227_v25, 1.0  ;;  %v8639_v14 = vld [vmem:[#allocation4_spill] sm:$0xff] }
 0x560   : > { %v5943_v54 = vclamps-f32 %v5276_v55, 1.0  ;;  %v5277_v35 = vadd.f32 %v5928_v18, %v7786_v63  ;;  %v8640_v18 = vld [vmem:[#allocation5_spill] sm:$0xff] }
 0x561   : > { %v5941_v2 = vclamps-f32 %v5274_v33, 1.0  ;;  %v5275_v10 = vadd.f32 %v5926_v42, %v7791_v38  ;;  %v6591_v59 = vpop.f32.mrb[20].mxu1 }
 0x562   : > { %5324 = vst [vmem:[%s8562_s9 + $0x10] sm:$0xff] %v5943_v54  ;;  %v5944_v37 = vclamps-f32 %v5277_v35, 1.0  ;;  %v5232_v50 = vadd.f32 %v6591_v59, %v8550_v39  ;;  %v5157_v19 = vpop.f32.mrb[21].mxu1  ;;  %v8641_v35 = vld [vmem:[#allocation6_spill] sm:$0xff]  ;;  %v8642_v59 = vld [vmem:[#allocation7_spill] sm:$0xff] }
 0x563   : > { %5322 = vst [vmem:[%s8562_s9] sm:$0xff] %v5941_v2  ;;  %v5942_v4 = vclamps-f32 %v5275_v10, 1.0  ;;  %v5230_v11 = vadd.f32 %v8550_v39, %v5157_v19  ;;  %v6592_v45 = vpop.f32.mrb[22].mxu1 }
 0x564   : > { %5325 = vst [vmem:[%s8562_s9 + $0x18] sm:$0xff] %v5944_v37  ;;  %v5931_v3 = vclamps-f32 %v5232_v50, 1.0  ;;  %v5233_v63 = vadd.f32 %v6592_v45, %v8550_v39  ;;  %v5160_v1 = vpop.f32.mrb[23].mxu1 }
 0x565   : > { %5323 = vst [vmem:[%s8562_s9 + $0x8] sm:$0xff] %v5942_v4  ;;  %v5929_v38 = vclamps-f32 %v5230_v11, 1.0  ;;  %v5231_v47 = vadd.f32 %v8550_v39, %v5160_v1 }
 0x566   : > { %v5280_v61 = vadd.f32 %v5931_v3, %v7800_v26  ;;  %v5932_v40 = vclamps-f32 %v5233_v63, 1.0 }
 0x567   : > { %v5278_v8 = vadd.f32 %v5929_v38, %v7802_v30  ;;  %v5930_v56 = vclamps-f32 %v5231_v47, 1.0 }
 0x568   : > { %v5947_v52 = vclamps-f32 %v5280_v61, 1.0  ;;  %v5281_v51 = vadd.f32 %v5932_v40, %v7845_v22 }
 0x569   : > { %v5945_v58 = vclamps-f32 %v5278_v8, 1.0  ;;  %v5279_v62 = vadd.f32 %v5930_v56, %v7847_v44  ;;  %v6595_v43 = vpop.f32.mrb[24].mxu1 }
 0x56a   : > { %5328 = vst [vmem:[%s8562_s9 + $0x30] sm:$0xff] %v5947_v52  ;;  %v5948_v21 = vclamps-f32 %v5281_v51, 1.0  ;;  %v5236_v32 = vadd.f32 %v6595_v43, %v8550_v39  ;;  %v5173_v20 = vpop.f32.mrb[25].mxu1 }
 0x56b   : > { %5326 = vst [vmem:[%s8562_s9 + $0x20] sm:$0xff] %v5945_v58  ;;  %v5946_v26 = vclamps-f32 %v5279_v62, 1.0  ;;  %v5234_v12 = vadd.f32 %v8550_v39, %v5173_v20  ;;  %v6596_v41 = vpop.f32.mrb[26].mxu1 }
 0x56c   : > { %5329 = vst [vmem:[%s8562_s9 + $0x38] sm:$0xff] %v5948_v21  ;;  %v5935_v30 = vclamps-f32 %v5236_v32, 1.0  ;;  %v5237_v22 = vadd.f32 %v6596_v41, %v8550_v39  ;;  %v5176_v31 = vpop.f32.mrb[27].mxu1 }
 0x56d   : > { %5327 = vst [vmem:[%s8562_s9 + $0x28] sm:$0xff] %v5946_v26  ;;  %v5933_v44 = vclamps-f32 %v5234_v12, 1.0  ;;  %v5235_v27 = vadd.f32 %v8550_v39, %v5176_v31 }
 0x56e   : > { %v5284_v7 = vadd.f32 %v5935_v30, %v7853_v23  ;;  %v5936_v34 = vclamps-f32 %v5237_v22, 1.0 }
 0x56f   : > { %v5282_v24 = vadd.f32 %v5933_v44, %v7855_v36  ;;  %v5934_v57 = vclamps-f32 %v5235_v27, 1.0 }
 0x570   : > { %v5951_v15 = vclamps-f32 %v5284_v7, 1.0  ;;  %v5285_v53 = vadd.f32 %v5936_v34, %v7863_v49 }
 0x571   : > { %v5949_v9 = vclamps-f32 %v5282_v24, 1.0  ;;  %v5283_v0 = vadd.f32 %v5934_v57, %v8638_v60  ;;  %v6599_v16 = vpop.f32.mrb[28].mxu1 }
 0x572   : > { %5332 = vst [vmem:[%s8562_s9 + $0x50] sm:$0xff] %v5951_v15  ;;  %v5952_v5 = vclamps-f32 %v5285_v53, 1.0  ;;  %v5240_v48 = vadd.f32 %v6599_v16, %v8550_v39  ;;  %v5189_v46 = vpop.f32.mrb[29].mxu1 }
 0x573   : > { %5330 = vst [vmem:[%s8562_s9 + $0x40] sm:$0xff] %v5949_v9  ;;  %v5950_v23 = vclamps-f32 %v5283_v0, 1.0  ;;  %v5238_v29 = vadd.f32 %v8550_v39, %v5189_v46  ;;  %v6600_v17 = vpop.f32.mrb[30].mxu1 }
 0x574   : > { %5333 = vst [vmem:[%s8562_s9 + $0x58] sm:$0xff] %v5952_v5  ;;  %v5939_v36 = vclamps-f32 %v5240_v48, 1.0  ;;  %v5241_v49 = vadd.f32 %v6600_v17, %v8550_v39  ;;  %v5192_v13 = vpop.f32.mrb[31].mxu1 }
 0x575   : > { %5331 = vst [vmem:[%s8562_s9 + $0x48] sm:$0xff] %v5950_v23  ;;  %v5937_v6 = vclamps-f32 %v5238_v29, 1.0  ;;  %v5239_v28 = vadd.f32 %v8550_v39, %v5192_v13 }
 0x576   : > { %v5288_v25 = vadd.f32 %v5939_v36, %v8639_v14  ;;  %v5940_v55 = vclamps-f32 %v5241_v49, 1.0 }
 0x577   : > { %v5286_v33 = vadd.f32 %v5937_v6, %v8640_v18  ;;  %v5938_v42 = vclamps-f32 %v5239_v28, 1.0 }
 0x578   : > { %v5955_v54 = vclamps-f32 %v5288_v25, 1.0  ;;  %v5289_v2 = vadd.f32 %v5940_v55, %v8641_v35 }
 0x579   : > { %v5953_v10 = vclamps-f32 %v5286_v33, 1.0  ;;  %v5287_v37 = vadd.f32 %v5938_v42, %v8642_v59 }
 0x57a   : > { %5336 = vst [vmem:[%s8562_s9 + $0x70] sm:$0xff] %v5955_v54  ;;  %v5956_v50 = vclamps-f32 %v5289_v2, 1.0 }
 0x57b   : > { %5334 = vst [vmem:[%s8562_s9 + $0x60] sm:$0xff] %v5953_v10  ;;  %v5954_v19 = vclamps-f32 %v5287_v37, 1.0 }
 0x57c   : > { %5337 = vst [vmem:[%s8562_s9 + $0x78] sm:$0xff] %v5956_v50 }
 0x57d   : > { %5335 = vst [vmem:[%s8562_s9 + $0x68] sm:$0xff] %v5954_v19 }
 0x57e PF: > { %s15_s18 = sadd.s32 1, %s6888_s18  }
 0x57f   : > { %p12_p4 = scmp.ge.s32.totalorder %s15_s18, 4  }
 0x581   :  { %14 = sbr.rel (!%p12_p4) target bundleno = 1 (0x1), region = 82 }

</bundles_post_ra>
